<compile_context>
chip_gen: v7x
topology: tpu7x:2x2x1
jax: 0.10.0
libtpu: 0.0.40
codegen_flags: <defaults>
</compile_context>

<pallas_src>
import jax
import jax.numpy as jnp
from jax.experimental import pallas as pl
from jax.experimental.pallas import tpu as pltpu


# ----------------------------- model config ---------------------------------
INPUT_DIM = 3                  # e.g. (x, y, t)
OUTPUT_DIM = 3                 # e.g. (u, v, p)
HIDDEN = 32
HIDDEN_LAYERS = [HIDDEN, HIDDEN, HIDDEN]
N_LAYERS = len(HIDDEN_LAYERS) + 1          # 4 Linear layers total
N_POINTS = 2048                # collocation points (batch)
MAX_TILE_B = 4096              # per-step batch-tile cap (VMEM footprint stays tiny)

assert INPUT_DIM <= HIDDEN and OUTPUT_DIM <= 8 <= HIDDEN


# ------------------------------- init / packing ------------------------------
def _init_linear(key, fan_in, fan_out):
    """nn.Linear default init: U(-1/sqrt(fan_in), +1/sqrt(fan_in)). W: (out, in)."""
    kw, kb = jax.random.split(key)
    bound = 1.0 / jnp.sqrt(jnp.float32(fan_in))
    w = jax.random.uniform(kw, (fan_out, fan_in), jnp.float32, -bound, bound)
    b = jax.random.uniform(kb, (fan_out,), jnp.float32, -bound, bound)
    return w, b


def init_params(key):
    dims = [INPUT_DIM] + HIDDEN_LAYERS + [OUTPUT_DIM]
    keys = jax.random.split(key, len(dims) - 1)
    return [_init_linear(k, fi, fo) for k, fi, fo in zip(keys, dims[:-1], dims[1:])]


def pack_params(params):
    """Pack all layers into one (HIDDEN, HIDDEN*N_LAYERS) weight slab and one
    (HIDDEN, N_LAYERS) bias slab (zero-padded), so the kernel sees 2 small
    VMEM-resident blocks instead of 8 separately-DMA'd arrays."""
    w_slab = jnp.zeros((HIDDEN, HIDDEN * N_LAYERS), jnp.float32)
    b_slab = jnp.zeros((HIDDEN, N_LAYERS), jnp.float32)
    for l, (w, b) in enumerate(params):
        fo, fi = w.shape
        w_slab = w_slab.at[:fo, l * HIDDEN:l * HIDDEN + fi].set(w)
        b_slab = b_slab.at[:fo, l].set(b)
    return w_slab, b_slab


# ------------------------------ Pallas kernel --------------------------------
def pinn_mlp_kernel(x_ref, w_ref, b_ref, o_ref):
    """x_ref: (tile_b, INPUT_DIM) batch-major block.
       w_ref: (HIDDEN, HIDDEN*N_LAYERS) packed weights, PyTorch (out, in) per layer.
       b_ref: (HIDDEN, N_LAYERS)      packed biases (zero-padded rows).
       o_ref: (tile_b, OUTPUT_DIM)    batch-major output block."""
    w = w_ref[...]
    b = b_ref[...]

    # Batch -> lanes: tiny (tile_b, 3) -> (3, tile_b) transpose on the idle XLU,
    # so all activations are feature-major with the batch on the 128-lane axis.
    x_t = x_ref[...].T                                    # (INPUT_DIM, tile_b)

    # Layer 0: K = INPUT_DIM = 3 is far too thin for the MXU -> broadcast FMAs on
    # the VPU. (HIDDEN,1) weight column broadcasts along lanes, (1,tile_b) input
    # row broadcasts along sublanes; bias is lane-broadcast.
    acc = b[:, 0:1]
    for k in range(INPUT_DIM):
        acc = acc + w[:, k:k + 1] * x_t[k:k + 1, :]       # (HIDDEN,1)*(1,tile_b)
    h = jnp.tanh(acc)                                     # (HIDDEN, tile_b)

    # Hidden layers: 32x32 MXU matmuls with f32 accumulation; tanh goes to the EUP.
    for l in range(1, N_LAYERS - 1):
        wl = w[:, l * HIDDEN:(l + 1) * HIDDEN]
        h = jnp.tanh(jnp.dot(wl, h, preferred_element_type=jnp.float32)
                     + b[:, l:l + 1])

    # Output layer (no activation). Rows >= OUTPUT_DIM of the padded W/b are zero.
    l = N_LAYERS - 1
    out = (jnp.dot(w[:, l * HIDDEN:(l + 1) * HIDDEN], h,
                   preferred_element_type=jnp.float32) + b[:, l:l + 1])

    # Back to batch-major: transpose a sublane-aligned 8-row band on the XLU,
    # then keep only the real output columns.
    o_ref[...] = out[0:8, :].T[:, 0:OUTPUT_DIM].astype(o_ref.dtype)


# ------------------------------ wrapper ---------------------------------------
def _num_tensorcores():
    """TensorCores reachable by megacore grid sharding on the first device."""
    try:
        dev = jax.devices()[0]
        n = getattr(dev, "num_cores", None)
        if isinstance(n, int) and 1 <= n <= 8:
            return n
        kind = str(getattr(dev, "device_kind", "")).lower()
        if any(tag in kind for tag in ("v7", "v4", "v5p")):
            return 2           # 2 TensorCores per chip
    except Exception:
        pass
    return 1                   # v5e / v6e: 1 TensorCore per chip


def _choose_grid(n):
    """One batch tile per TensorCore (grid=(1,) on v5e/v6e); cap the tile so very
    large collocation batches still pipeline. Tiles stay 128-lane aligned."""
    steps = max(_num_tensorcores(), pl.cdiv(n, MAX_TILE_B))
    while steps > 1 and not (n % steps == 0 and (n // steps) % 128 == 0):
        steps -= 1
    return steps, n // steps


def pinn_forward(x, w_slab, b_slab):
    """x: (N, INPUT_DIM) batch-major (PyTorch convention) -> (N, OUTPUT_DIM)."""
    n, d_in = x.shape
    assert d_in == INPUT_DIM
    steps, tile_b = _choose_grid(n)

    x_spec = pl.BlockSpec((tile_b, INPUT_DIM), lambda i: (i, 0))
    o_spec = pl.BlockSpec((tile_b, OUTPUT_DIM), lambda i: (i, 0))
    # Constant index_map -> packed params stay resident in VMEM across grid steps.
    w_spec = pl.BlockSpec(w_slab.shape, lambda i: (0, 0))
    b_spec = pl.BlockSpec(b_slab.shape, lambda i: (0, 0))

    return pl.pallas_call(
        pinn_mlp_kernel,
        out_shape=jax.ShapeDtypeStruct((n, OUTPUT_DIM), jnp.float32),
        grid_spec=pl.GridSpec(
            grid=(steps,),
            in_specs=[x_spec, w_spec, b_spec],
            out_specs=o_spec,
        ),
        # Batch tiles are fully independent (no reduction axis, disjoint output
        # blocks) -> shard across TensorCores on 2-TC chips (v7x); "parallel" is
        # free on single-TC v5e/v6e.
        compiler_params=pltpu.CompilerParams(
            dimension_semantics=("parallel",)),
    )(x, w_slab, b_slab)


# ------------------------------ reference ------------------------------------
def pinn_forward_ref(x, params):
    h = x
    for i, (w, b) in enumerate(params):
        h = h @ w.T + b
        if i < len(params) - 1:
            h = jnp.tanh(h)
    return h


# --------------------------------- main ---------------------------------------
if __name__ == "__main__":
    key = jax.random.PRNGKey(0)
    kx, kp = jax.random.split(key)

    x = jax.random.normal(kx, (N_POINTS, INPUT_DIM), jnp.float32)
    params = init_params(kp)
    w_slab, b_slab = pack_params(params)

    fwd = jax.jit(pinn_forward)
    out = jax.block_until_ready(fwd(x, w_slab, b_slab))

    ref = pinn_forward_ref(x, params)
    assert out.shape == (N_POINTS, OUTPUT_DIM)
    max_diff = float(jnp.max(jnp.abs(out - ref)))
    assert jnp.allclose(out, ref, atol=1e-5, rtol=1e-5), (
        f"max abs diff = {max_diff}")

    print("KERNEL_OK")
</pallas_src>

<mosaic_0001>
module attributes {stable_mosaic.version = 11 : i64} {
  func.func @pinn_mlp_kernel(%arg0: i32, %arg1: memref<2048x3xf32, #tpu.memory_space<vmem>>, %arg2: memref<32x128xf32, #tpu.memory_space<vmem>>, %arg3: memref<32x4xf32, #tpu.memory_space<vmem>>, %arg4: memref<2048x3xf32, #tpu.memory_space<vmem>>) attributes {dimension_semantics = [#tpu.dimension_semantics<parallel>], iteration_bounds = array<i64: 1>, scalar_prefetch = 0 : i64, scratch_operands = 0 : i64, tpu.core_type = #tpu.core_type<tc>, window_params = [{transform_indices = @transform_0, window_bounds = array<i64: 2048, 3>}, {pipeline_mode = #tpu.pipeline_mode<synchronous>, transform_indices = @transform_1, window_bounds = array<i64: 32, 128>}, {pipeline_mode = #tpu.pipeline_mode<synchronous>, transform_indices = @transform_2, window_bounds = array<i64: 32, 4>}, {transform_indices = @transform_3, window_bounds = array<i64: 2048, 3>}]} {
    %c0 = arith.constant 0 : index
    %c0_0 = arith.constant 0 : index
    %0 = vector.load %arg2[%c0, %c0_0] : memref<32x128xf32, #tpu.memory_space<vmem>>, vector<32x128xf32>
    %c0_1 = arith.constant 0 : index
    %c0_2 = arith.constant 0 : index
    %1 = vector.load %arg3[%c0_1, %c0_2] : memref<32x4xf32, #tpu.memory_space<vmem>>, vector<32x4xf32>
    %c0_3 = arith.constant 0 : index
    %c0_4 = arith.constant 0 : index
    %2 = vector.load %arg1[%c0_3, %c0_4] : memref<2048x3xf32, #tpu.memory_space<vmem>>, vector<2048x3xf32>
    %3 = tpu.transpose %2, [1, 0] : vector<2048x3xf32> -> vector<3x2048xf32>
    %4 = vector.extract_strided_slice %1 {offsets = [0, 0], sizes = [32, 1], strides = [1, 1]} : vector<32x4xf32> to vector<32x1xf32>
    %5 = vector.extract_strided_slice %0 {offsets = [0, 0], sizes = [32, 1], strides = [1, 1]} : vector<32x128xf32> to vector<32x1xf32>
    %6 = vector.extract_strided_slice %3 {offsets = [0, 0], sizes = [1, 2048], strides = [1, 1]} : vector<3x2048xf32> to vector<1x2048xf32>
    %7 = vector.broadcast %5 : vector<32x1xf32> to vector<32x2048xf32>
    %8 = vector.broadcast %6 : vector<1x2048xf32> to vector<32x2048xf32>
    %9 = arith.mulf %7, %8 : vector<32x2048xf32>
    %10 = vector.broadcast %4 : vector<32x1xf32> to vector<32x2048xf32>
    %11 = arith.addf %10, %9 : vector<32x2048xf32>
    %12 = vector.extract_strided_slice %0 {offsets = [0, 1], sizes = [32, 1], strides = [1, 1]} : vector<32x128xf32> to vector<32x1xf32>
    %13 = vector.extract_strided_slice %3 {offsets = [1, 0], sizes = [1, 2048], strides = [1, 1]} : vector<3x2048xf32> to vector<1x2048xf32>
    %14 = vector.broadcast %12 : vector<32x1xf32> to vector<32x2048xf32>
    %15 = vector.broadcast %13 : vector<1x2048xf32> to vector<32x2048xf32>
    %16 = arith.mulf %14, %15 : vector<32x2048xf32>
    %17 = arith.addf %11, %16 : vector<32x2048xf32>
    %18 = vector.extract_strided_slice %0 {offsets = [0, 2], sizes = [32, 1], strides = [1, 1]} : vector<32x128xf32> to vector<32x1xf32>
    %19 = vector.extract_strided_slice %3 {offsets = [2, 0], sizes = [1, 2048], strides = [1, 1]} : vector<3x2048xf32> to vector<1x2048xf32>
    %20 = vector.broadcast %18 : vector<32x1xf32> to vector<32x2048xf32>
    %21 = vector.broadcast %19 : vector<1x2048xf32> to vector<32x2048xf32>
    %22 = arith.mulf %20, %21 : vector<32x2048xf32>
    %23 = arith.addf %17, %22 : vector<32x2048xf32>
    %24 = math.tanh %23 : vector<32x2048xf32>
    %25 = vector.extract_strided_slice %0 {offsets = [0, 32], sizes = [32, 32], strides = [1, 1]} : vector<32x128xf32> to vector<32x32xf32>
    %cst = arith.constant dense<0.000000e+00> : vector<32x2048xf32>
    %26 = tpu.matmul %25, %24, %cst {dimension_numbers = #tpu.dot_dimension_numbers<[1], [0], [0], [1], [0, 0, 1, 1], [], []>} : vector<32x32xf32>, vector<32x2048xf32>, vector<32x2048xf32> -> vector<32x2048xf32>
    %27 = vector.extract_strided_slice %1 {offsets = [0, 1], sizes = [32, 1], strides = [1, 1]} : vector<32x4xf32> to vector<32x1xf32>
    %28 = vector.broadcast %27 : vector<32x1xf32> to vector<32x2048xf32>
    %29 = arith.addf %26, %28 : vector<32x2048xf32>
    %30 = math.tanh %29 : vector<32x2048xf32>
    %31 = vector.extract_strided_slice %0 {offsets = [0, 64], sizes = [32, 32], strides = [1, 1]} : vector<32x128xf32> to vector<32x32xf32>
    %cst_5 = arith.constant dense<0.000000e+00> : vector<32x2048xf32>
    %32 = tpu.matmul %31, %30, %cst_5 {dimension_numbers = #tpu.dot_dimension_numbers<[1], [0], [0], [1], [0, 0, 1, 1], [], []>} : vector<32x32xf32>, vector<32x2048xf32>, vector<32x2048xf32> -> vector<32x2048xf32>
    %33 = vector.extract_strided_slice %1 {offsets = [0, 2], sizes = [32, 1], strides = [1, 1]} : vector<32x4xf32> to vector<32x1xf32>
    %34 = vector.broadcast %33 : vector<32x1xf32> to vector<32x2048xf32>
    %35 = arith.addf %32, %34 : vector<32x2048xf32>
    %36 = math.tanh %35 : vector<32x2048xf32>
    %37 = vector.extract_strided_slice %0 {offsets = [0, 96], sizes = [32, 32], strides = [1, 1]} : vector<32x128xf32> to vector<32x32xf32>
    %cst_6 = arith.constant dense<0.000000e+00> : vector<32x2048xf32>
    %38 = tpu.matmul %37, %36, %cst_6 {dimension_numbers = #tpu.dot_dimension_numbers<[1], [0], [0], [1], [0, 0, 1, 1], [], []>} : vector<32x32xf32>, vector<32x2048xf32>, vector<32x2048xf32> -> vector<32x2048xf32>
    %39 = vector.extract_strided_slice %1 {offsets = [0, 3], sizes = [32, 1], strides = [1, 1]} : vector<32x4xf32> to vector<32x1xf32>
    %40 = vector.broadcast %39 : vector<32x1xf32> to vector<32x2048xf32>
    %41 = arith.addf %38, %40 : vector<32x2048xf32>
    %42 = vector.extract_strided_slice %41 {offsets = [0, 0], sizes = [8, 2048], strides = [1, 1]} : vector<32x2048xf32> to vector<8x2048xf32>
    %43 = tpu.transpose %42, [1, 0] : vector<8x2048xf32> -> vector<2048x8xf32>
    %44 = vector.extract_strided_slice %43 {offsets = [0, 0], sizes = [2048, 3], strides = [1, 1]} : vector<2048x8xf32> to vector<2048x3xf32>
    %c0_7 = arith.constant 0 : index
    %c0_8 = arith.constant 0 : index
    %45 = vector.load %arg4[%c0_7, %c0_8] : memref<2048x3xf32, #tpu.memory_space<vmem>>, vector<2048x3xf32>
    tpu.vector_store %arg4[%c0_7, %c0_8], %44 {strides = array<i32>} : memref<2048x3xf32, #tpu.memory_space<vmem>>, vector<2048x3xf32>,
    return
  }
  func.func @transform_0(%arg0: i32) -> (i32, i32) {
    %c0_i32 = arith.constant 0 : i32
    %c0_i32_0 = arith.constant 0 : i32
    return %arg0, %c0_i32 : i32, i32
  }
  func.func @transform_1(%arg0: i32) -> (i32, i32) {
    %c0_i32 = arith.constant 0 : i32
    %c0_i32_0 = arith.constant 0 : i32
    %c0_i32_1 = arith.constant 0 : i32
    return %c0_i32, %c0_i32_0 : i32, i32
  }
  func.func @transform_2(%arg0: i32) -> (i32, i32) {
    %c0_i32 = arith.constant 0 : i32
    %c0_i32_0 = arith.constant 0 : i32
    %c0_i32_1 = arith.constant 0 : i32
    return %c0_i32, %c0_i32_0 : i32, i32
  }
  func.func @transform_3(%arg0: i32) -> (i32, i32) {
    %c0_i32 = arith.constant 0 : i32
    %c0_i32_0 = arith.constant 0 : i32
    return %arg0, %c0_i32 : i32, i32
  }
}

</mosaic_0001>

<bundles_post_ra>
// kernel: pinn_forward.1
= control target key start
LH: loop header
LB: loop body
LE: loop exit
PB: predicated region body
PF: predicated region fallthrough
CT: control target
= control target key end

     0   :  { %v5284_v0 = vmov 0   ;;  %s5285_s20 = smov 96   ;;  %v8208_v8 = vmov 1   ;;  %v8205_v9 = vmov 2   ;;  %v8206_v50 = vmov 0.0   ;;  %s8201_s2 = inlined_call_operand.vmem [shape: f32[32,4], index: 2, kind: input, shape index: {}]   ;;  %s8202_s1 = inlined_call_operand.vmem [shape: f32[32,128], index: 1, kind: input, shape index: {}]   ;;  %s8203_s0 = inlined_call_operand.vmem [shape: f32[2048,3], index: 0, kind: input, shape index: {}]   ;;  %s8204_s3 = inlined_call_operand.vmem [shape: f32[2048,3], index: 3, kind: output, shape index: {}]  }
   0x1   :  { %4885 = vset.pattern.permute.xlu0 %v5284_v0  ;;  %4881 = vset.pattern.permute.xlu1 %v5284_v0  ;;  %v20_v1 = vld [vmem:[%s8201_s2 + $0x10] sm:$0xff]  ;;  %v14_v2 = vld [vmem:[%s8202_s1] sm:$0xff]  ;;  %v15_v4 = vld [vmem:[%s8202_s1 + $0x8] sm:$0xff]  ;;  %vm1526_vm0 = vcmask 261120   ;;  %vm4324_vm1 = vcmask 23552  }
   0x2   :  { %950 = vperm.xlu0 %4885, %v20_v1   ;;  %792 = vperm.xlu1 %4881, %v14_v2   ;;  %v16_v3 = vld [vmem:[%s8202_s1 + $0x10] sm:$0xff]  ;;  %v17_v5 = vld [vmem:[%s8202_s1 + $0x18] sm:$0xff]  ;;  %v18_v6 = vld [vmem:[%s8201_s2] sm:$0xff] }
   0x3   :  { %v19_v7 = vld [vmem:[%s8201_s2 + $0x8] sm:$0xff]  ;;  %v22_v10 = vld [vmem:[%s8203_s0] sm:$0xff]  ;;  %v21_v12 = vld [vmem:[%s8201_s2 + $0x18] sm:$0xff]  ;;  %1599 = vmatprep.mubr.f32.mxu0 %v8206_v50  ;;  %1688 = vmatprep.mubr.f32.mxu1 %v8206_v50 }
   0x4   :  { %v23_v11 = vld [vmem:[%s8203_s0 + $0x8] sm:$0xff]  ;;  %v24_v13 = vld [vmem:[%s8203_s0 + $0x10] sm:$0xff]  ;;  %v25_v14 = vld [vmem:[%s8203_s0 + $0x18] sm:$0xff] }
   0x5   :  { %v26_v15 = vld [vmem:[%s8203_s0 + $0x20] sm:$0xff]  ;;  %v27_v16 = vld [vmem:[%s8203_s0 + $0x28] sm:$0xff]  ;;  %v28_v17 = vld [vmem:[%s8203_s0 + $0x30] sm:$0xff] }
   0x6   :  { %1522 = vrot.lane.b32.xlu0 %v16_v3, %s5285_s20  ;;  %797 = vperm.xlu1 %4881, %v15_v4   ;;  %v29_v18 = vld [vmem:[%s8203_s0 + $0x38] sm:$0xff]  ;;  %v30_v19 = vld [vmem:[%s8203_s0 + $0x40] sm:$0xff]  ;;  %v31_v20 = vld [vmem:[%s8203_s0 + $0x48] sm:$0xff] }
   0x7   :  { %v32_v21 = vld [vmem:[%s8203_s0 + $0x50] sm:$0xff]  ;;  %v33_v22 = vld [vmem:[%s8203_s0 + $0x58] sm:$0xff]  ;;  %v34_v23 = vld [vmem:[%s8203_s0 + $0x60] sm:$0xff] }
   0x8   :  { %v35_v24 = vld [vmem:[%s8203_s0 + $0x68] sm:$0xff]  ;;  %v36_v25 = vld [vmem:[%s8203_s0 + $0x70] sm:$0xff]  ;;  %v37_v26 = vld [vmem:[%s8203_s0 + $0x78] sm:$0xff] }
   0x9   :  { %v54_v27 = vld [vmem:[%s8203_s0 + $0x100] sm:$0xff]  ;;  %v55_v28 = vld [vmem:[%s8203_s0 + $0x108] sm:$0xff]  ;;  %v56_v29 = vld [vmem:[%s8203_s0 + $0x110] sm:$0xff] }
   0xa   :  { %1524 = vrot.lane.b32.xlu0 %v17_v5, %s5285_s20  ;;  %940 = vperm.xlu1 %4881, %v18_v6   ;;  %v38_v30 = vld [vmem:[%s8203_s0 + $0x80] sm:$0xff]  ;;  %v57_v31 = vld [vmem:[%s8203_s0 + $0x118] sm:$0xff]  ;;  %v39_v32 = vld [vmem:[%s8203_s0 + $0x88] sm:$0xff] }
   0xb   :  { %v58_v33 = vld [vmem:[%s8203_s0 + $0x120] sm:$0xff]  ;;  %v40_v34 = vld [vmem:[%s8203_s0 + $0x90] sm:$0xff]  ;;  %v59_v35 = vld [vmem:[%s8203_s0 + $0x128] sm:$0xff] }
   0xc   :  { %v41_v36 = vld [vmem:[%s8203_s0 + $0x98] sm:$0xff]  ;;  %v60_v37 = vld [vmem:[%s8203_s0 + $0x130] sm:$0xff]  ;;  %v42_v38 = vld [vmem:[%s8203_s0 + $0xa0] sm:$0xff] }
   0xd   :  { %v61_v39 = vld [vmem:[%s8203_s0 + $0x138] sm:$0xff]  ;;  %v43_v40 = vld [vmem:[%s8203_s0 + $0xa8] sm:$0xff]  ;;  %v62_v41 = vld [vmem:[%s8203_s0 + $0x140] sm:$0xff] }
   0xe   :  { %945 = vperm.xlu1 %4881, %v19_v7   ;;  %v44_v42 = vld [vmem:[%s8203_s0 + $0xb0] sm:$0xff]  ;;  %v63_v43 = vld [vmem:[%s8203_s0 + $0x148] sm:$0xff]  ;;  %v45_v44 = vld [vmem:[%s8203_s0 + $0xb8] sm:$0xff] }
   0xf   :  { %v64_v46 = vld [vmem:[%s8203_s0 + $0x150] sm:$0xff]  ;;  %v46_v47 = vld [vmem:[%s8203_s0 + $0xc0] sm:$0xff]  ;;  %v65_v48 = vld [vmem:[%s8203_s0 + $0x158] sm:$0xff] }
  0x10   :  { %v47_v49 = vld [vmem:[%s8203_s0 + $0xc8] sm:$0xff]  ;;  %v66_v52 = vld [vmem:[%s8203_s0 + $0x160] sm:$0xff]  ;;  %v48_v53 = vld [vmem:[%s8203_s0 + $0xd0] sm:$0xff] }
  0x11   :  { %v67_v55 = vld [vmem:[%s8203_s0 + $0x168] sm:$0xff]  ;;  %v49_v56 = vld [vmem:[%s8203_s0 + $0xd8] sm:$0xff]  ;;  %v68_v57 = vld [vmem:[%s8203_s0 + $0x170] sm:$0xff] }
  0x12   :  { %4882 = vset.pattern.permute.xlu1 %v8208_v8  ;;  %v50_v58 = vld [vmem:[%s8203_s0 + $0xe0] sm:$0xff]  ;;  %v69_v60 = vld [vmem:[%s8203_s0 + $0x178] sm:$0xff]  ;;  %v51_v61 = vld [vmem:[%s8203_s0 + $0xe8] sm:$0xff] }
  0x13   :  { %1023 = vperm.xlu1 %4882, %v14_v2   ;;  %v86_v63 = vld [vmem:[%s8203_s0 + $0x200] sm:$0xff]  ;;  %v87_v1 = vld [vmem:[%s8203_s0 + $0x208] sm:$0xff]  ;;  %v89_v7 = vld [vmem:[%s8203_s0 + $0x218] sm:$0xff] }
  0x17   :  { %1027 = vperm.xlu1 %4882, %v15_v4  }
  0x1b   :  { %4883 = vset.pattern.permute.xlu1 %v5284_v0 }
  0x1c   :  { %802 = vperm.xlu1 %4883, %v16_v3  }
  0x20   :  { %807 = vperm.xlu1 %4883, %v17_v5  }
  0x24   :  { %4884 = vset.pattern.permute.xlu1 %v8205_v9 }
  0x25   :  { %1231 = vperm.xlu1 %4884, %v14_v2  }
  0x28   :  { %278 = vxpose.xlu0.b32.start [1/16] (narrow) %v22_v10, 8  ;;  %v71_v10 = vld [vmem:[%s8203_s0 + $0x188] sm:$0xff] }
  0x29   :  { %1235 = vperm.xlu1 %4884, %v15_v4  }
  0x2c   :  { %279 = vxpose.xlu0.b32.cont [2/16] (narrow) %v23_v11, 8  ;;  %v90_v11 = vld [vmem:[%s8203_s0 + $0x220] sm:$0xff] }
  0x2d   :  { %4886 = vset.pattern.permute.xlu1 %v5284_v0  ;;  %v52_v0 = vld [vmem:[%s8203_s0 + $0xf0] sm:$0xff] }
  0x2e   :  { %955 = vperm.xlu1 %4886, %v21_v12   ;;  %v72_v12 = vld [vmem:[%s8203_s0 + $0x190] sm:$0xff] }
  0x30   :  { %280 = vxpose.xlu0.b32.cont [3/16] (narrow) %v24_v13, 8 }
  0x32   :  { %4887 = vset.pattern.permute.xlu1 %v8208_v8 }
  0x33   :  { %1031 = vperm.xlu1 %4887, %v16_v3  }
  0x34   :  { %281 = vxpose.xlu0.b32.cont [4/16] (narrow) %v25_v14, 8  ;;  %v91_v14 = vld [vmem:[%s8203_s0 + $0x228] sm:$0xff] }
  0x37   :  { %1035 = vperm.xlu1 %4887, %v17_v5  }
  0x38   :  { %282 = vxpose.xlu0.b32.cont [5/16] (narrow) %v26_v15, 8  ;;  %v73_v15 = vld [vmem:[%s8203_s0 + $0x198] sm:$0xff] }
  0x3b   :  { %4888 = vset.pattern.permute.xlu1 %v8205_v9 }
  0x3c   :  { %1239 = vperm.xlu1 %4888, %v16_v3   ;;  %283 = vxpose.xlu0.b32.cont [6/16] (narrow) %v27_v16, 8 }
  0x40   :  { %1243 = vperm.xlu1 %4888, %v17_v5   ;;  %284 = vxpose.xlu0.b32.cont [7/16] (narrow) %v28_v17, 8  ;;  %v70_v5 = vld [vmem:[%s8203_s0 + $0x180] sm:$0xff]  ;;  %v92_v17 = vld [vmem:[%s8203_s0 + $0x230] sm:$0xff] }
  0x44   :  { %1518 = vrot.lane.b32.xlu1 %v14_v2, %s5285_s20  ;;  %285 = vxpose.xlu0.b32.cont [8/16] (narrow) %v29_v18, 8  ;;  %v53_v2 = vld [vmem:[%s8203_s0 + $0xf8] sm:$0xff]  ;;  %v74_v18 = vld [vmem:[%s8203_s0 + $0x1a0] sm:$0xff] }
  0x48   :  { %1520 = vrot.lane.b32.xlu1 %v15_v4, %s5285_s20  ;;  %286 = vxpose.xlu0.b32.cont [9/16] (narrow) %v30_v19, 8  ;;  %v88_v4 = vld [vmem:[%s8203_s0 + $0x210] sm:$0xff]  ;;  %v93_v19 = vld [vmem:[%s8203_s0 + $0x238] sm:$0xff] }
  0x4c   :  { %287 = vxpose.xlu0.b32.cont [10/16] (narrow) %v31_v20, 8  ;;  %v75_v20 = vld [vmem:[%s8203_s0 + $0x1a8] sm:$0xff] }
  0x50   :  { %288 = vxpose.xlu0.b32.cont [11/16] (narrow) %v32_v21, 8 }
  0x54   :  { %289 = vxpose.xlu0.b32.cont [12/16] (narrow) %v33_v22, 8  ;;  %v94_v22 = vld [vmem:[%s8203_s0 + $0x240] sm:$0xff] }
  0x58   :  { %290 = vxpose.xlu0.b32.cont [13/16] (narrow) %v34_v23, 8  ;;  %v76_v23 = vld [vmem:[%s8203_s0 + $0x1b0] sm:$0xff] }
  0x5c   :  { %291 = vxpose.xlu0.b32.cont [14/16] (narrow) %v35_v24, 8 }
  0x60   :  { %292 = vxpose.xlu0.b32.cont [15/16] (narrow) %v36_v25, 8  ;;  %v95_v25 = vld [vmem:[%s8203_s0 + $0x248] sm:$0xff] }
  0x64   :  { %293 = vxpose.xlu0.b32.end [16/16] (narrow) %v37_v26, 8  ;;  %v77_v26 = vld [vmem:[%s8203_s0 + $0x1b8] sm:$0xff] }
  0x68   :  { %342 = vxpose.xlu0.b32.start [1/16] (narrow) %v54_v27, 8  ;;  %v96_v27 = vld [vmem:[%s8203_s0 + $0x250] sm:$0xff] }
  0x6c   :  { %343 = vxpose.xlu0.b32.cont [2/16] (narrow) %v55_v28, 8  ;;  %v78_v28 = vld [vmem:[%s8203_s0 + $0x1c0] sm:$0xff] }
  0x70   :  { %344 = vxpose.xlu0.b32.cont [3/16] (narrow) %v56_v29, 8 }
  0x71   :  { %310 = vxpose.xlu1.b32.start [1/16] (narrow) %v38_v30, 8 }
  0x74   :  { %345 = vxpose.xlu0.b32.cont [4/16] (narrow) %v57_v31, 8  ;;  %v97_v31 = vld [vmem:[%s8203_s0 + $0x258] sm:$0xff] }
  0x75   :  { %311 = vxpose.xlu1.b32.cont [2/16] (narrow) %v39_v32, 8  ;;  %v79_v32 = vld [vmem:[%s8203_s0 + $0x1c8] sm:$0xff] }
  0x78   :  { %346 = vxpose.xlu0.b32.cont [5/16] (narrow) %v58_v33, 8 }
  0x79   :  { %312 = vxpose.xlu1.b32.cont [3/16] (narrow) %v40_v34, 8  ;;  %v98_v34 = vld [vmem:[%s8203_s0 + $0x260] sm:$0xff] }
  0x7c   :  { %347 = vxpose.xlu0.b32.cont [6/16] (narrow) %v59_v35, 8  ;;  %v80_v35 = vld [vmem:[%s8203_s0 + $0x1d0] sm:$0xff] }
  0x7d   :  { %313 = vxpose.xlu1.b32.cont [4/16] (narrow) %v41_v36, 8 }
  0x80   :  { %348 = vxpose.xlu0.b32.cont [7/16] (narrow) %v60_v37, 8  ;;  %v810_v37 = vlaneseq }
  0x81   :  { %314 = vxpose.xlu1.b32.cont [5/16] (narrow) %v42_v38, 8  ;;  %v5446_v45 = vpop.permute.xlu1 %792  ;;  %v5574_v30 = vpop.permute.xlu0 %950  ;;  %v99_v38 = vld [vmem:[%s8203_s0 + $0x268] sm:$0xff] }
  0x84   :  { %349 = vxpose.xlu0.b32.cont [8/16] (narrow) %v61_v39, 8  ;;  %v81_v39 = vld [vmem:[%s8203_s0 + $0x1d8] sm:$0xff] }
  0x85   :  { %315 = vxpose.xlu1.b32.cont [6/16] (narrow) %v43_v40, 8  ;;  %v5462_v51 = vpop.permute.xlu1 %797  ;;  %v5590_v36 = vpop.permute.xlu0 %1522 }
  0x88   :  { %350 = vxpose.xlu0.b32.cont [9/16] (narrow) %v62_v41, 8  ;;  %v811_v41 = vshrl.u32 %v810_v37, 7 }
  0x89   :  { %316 = vxpose.xlu1.b32.cont [7/16] (narrow) %v44_v42, 8  ;;  %v5470_v54 = vpop.permute.xlu1 %940  ;;  %v5600_v42 = vpop.permute.xlu0 %1524 }
  0x8c   :  { %351 = vxpose.xlu0.b32.cont [10/16] (narrow) %v63_v43, 8  ;;  %v100_v43 = vld [vmem:[%s8203_s0 + $0x270] sm:$0xff] }
  0x8d   :  { %317 = vxpose.xlu1.b32.cont [8/16] (narrow) %v45_v44, 8  ;;  %v5484_v59 = vpop.permute.xlu1 %945  ;;  %v82_v44 = vld [vmem:[%s8203_s0 + $0x1e0] sm:$0xff] }
  0x90   :  { %352 = vxpose.xlu0.b32.cont [11/16] (narrow) %v64_v46, 8  ;;  %v5608_v46 = vsub.s32 0, %v811_v41 }
  0x91   :  { %318 = vxpose.xlu1.b32.cont [9/16] (narrow) %v46_v47, 8 }
  0x92   :  { %v5492_v62 = vpop.permute.xlu1 %1023 }
  0x94   :  { %353 = vxpose.xlu0.b32.cont [12/16] (narrow) %v65_v48, 8 }
  0x95   :  { %319 = vxpose.xlu1.b32.cont [10/16] (narrow) %v47_v49, 8  ;;  %v101_v49 = vld [vmem:[%s8203_s0 + $0x278] sm:$0xff] }
  0x96   :  { %v5506_v3 = vpop.permute.xlu1 %1027 }
  0x98   :  { %354 = vxpose.xlu0.b32.cont [13/16] (narrow) %v66_v52, 8  ;;  %v83_v52 = vld [vmem:[%s8203_s0 + $0x1e8] sm:$0xff] }
  0x99   :  { %320 = vxpose.xlu1.b32.cont [11/16] (narrow) %v48_v53, 8 }
  0x9b   :  { %v5514_v6 = vpop.permute.xlu1 %802 }
  0x9c   :  { %355 = vxpose.xlu0.b32.cont [14/16] (narrow) %v67_v55, 8  ;;  %v118_v55 = vld [vmem:[%s8203_s0 + $0x300] sm:$0xff] }
  0x9d   :  { %321 = vxpose.xlu1.b32.cont [12/16] (narrow) %v49_v56, 8  ;;  %v5622_v56 = vsub.s32 1, %v811_v41 }
  0x9f   :  { %v5528_v13 = vpop.permute.xlu1 %807 }
  0xa0   :  { %356 = vxpose.xlu0.b32.cont [15/16] (narrow) %v68_v57, 8  ;;  %v84_v57 = vld [vmem:[%s8203_s0 + $0x1f0] sm:$0xff] }
  0xa1   :  { %322 = vxpose.xlu1.b32.cont [13/16] (narrow) %v50_v58, 8 }
  0xa4   :  { %357 = vxpose.xlu0.b32.end [16/16] (narrow) %v69_v60, 8  ;;  %v5536_v16 = vpop.permute.xlu1 %1231 }
  0xa5   :  { %323 = vxpose.xlu1.b32.cont [14/16] (narrow) %v51_v61, 8 }
  0xa8   :  { %406 = vxpose.xlu0.b32.start [1/16] (narrow) %v86_v63, 8  ;;  %v5550_v21 = vpop.permute.xlu1 %1235  ;;  %v294_v47 = vpop.trf.xlu0  ;;  %v119_v63 = vld [vmem:[%s8203_s0 + $0x308] sm:$0xff] }
  0xa9   :  { %324 = vxpose.xlu1.b32.cont [15/16] (narrow) %v52_v0, 8  ;;  %v813_v53 = vrot.slane %v294_v47, %v5608_v46  ;;  %v5634_v0 = vsub.s32 2, %v811_v41 }
  0xab   :  { %v874_v60 = vmul.f32 %v813_v53, %v5446_v45  ;;  %v890_v61 = vmul.f32 %v813_v53, %v5462_v51 }
  0xac   :  { %407 = vxpose.xlu0.b32.cont [2/16] (narrow) %v87_v1, 8  ;;  %v1041_v1 = vrot.slane %v294_v47, %v5622_v56 }
  0xad   :  { %325 = vxpose.xlu1.b32.end [16/16] (narrow) %v53_v2, 8  ;;  %v5558_v24 = vpop.permute.xlu1 %955  ;;  %v85_v2 = vld [vmem:[%s8203_s0 + $0x1f8] sm:$0xff] }
  0xb0   :  { %408 = vxpose.xlu0.b32.cont [3/16] (narrow) %v88_v4, 8  ;;  %v958_v4 = vadd.f32 %v5470_v54, %v874_v60  ;;  %v104_v60 = vld [vmem:[%s8203_s0 + $0x290] sm:$0xff] }
  0xb1   :  { %374 = vxpose.xlu1.b32.start [1/16] (narrow) %v70_v5, 8  ;;  %v974_v5 = vadd.f32 %v5484_v59, %v890_v61 }
  0xb2   :  { %v5572_v29 = vpop.permute.xlu1 %1031 }
  0xb4   :  { %409 = vxpose.xlu0.b32.cont [4/16] (narrow) %v89_v7, 8 }
  0xb5   :  { %375 = vxpose.xlu1.b32.cont [2/16] (narrow) %v71_v10, 8  ;;  %v120_v10 = vld [vmem:[%s8203_s0 + $0x310] sm:$0xff] }
  0xb6   :  { %v5582_v33 = vpop.permute.xlu1 %1035 }
  0xb8   :  { %410 = vxpose.xlu0.b32.cont [5/16] (narrow) %v90_v11, 8  ;;  %v1102_v11 = vmul.f32 %v1041_v1, %v5492_v62 }
  0xb9   :  { %376 = vxpose.xlu1.b32.cont [3/16] (narrow) %v72_v12, 8  ;;  %v1249_v12 = vrot.slane %v294_v47, %v5634_v0  ;;  %v122_v47 = vld [vmem:[%s8203_s0 + $0x320] sm:$0xff] }
  0xbb   :  { %v5598_v40 = vpop.permute.xlu1 %1239 }
  0xbc   :  { %411 = vxpose.xlu0.b32.cont [6/16] (narrow) %v91_v14, 8  ;;  %v102_v14 = vld [vmem:[%s8203_s0 + $0x280] sm:$0xff] }
  0xbd   :  { %377 = vxpose.xlu1.b32.cont [4/16] (narrow) %v73_v15, 8  ;;  %v922_v15 = vmul.f32 %v813_v53, %v5528_v13 }
  0xbf   :  { %v5610_v48 = vpop.permute.xlu1 %1243 }
  0xc0   :  { %412 = vxpose.xlu0.b32.cont [7/16] (narrow) %v92_v17, 8  ;;  %v1118_v17 = vmul.f32 %v1041_v1, %v5506_v3 }
  0xc1   :  { %378 = vxpose.xlu1.b32.cont [5/16] (narrow) %v74_v18, 8  ;;  %v1166_v18 = vadd.f32 %v1102_v11, %v958_v4  ;;  %v1150_v4 = vmul.f32 %v1041_v1, %v5582_v33 }
  0xc3   :  { %v5627_v58 = vpop.permute.xlu1 %1518 }
  0xc4   :  { %413 = vxpose.xlu0.b32.cont [8/16] (narrow) %v93_v19, 8  ;;  %v1182_v19 = vadd.f32 %v1118_v17, %v974_v5 }
  0xc5   :  { %379 = vxpose.xlu1.b32.cont [6/16] (narrow) %v75_v20, 8 }
  0xc7   :  { %v5642_v7 = vpop.permute.xlu1 %1520 }
  0xc8   :  { %414 = vxpose.xlu0.b32.cont [9/16] (narrow) %v94_v22, 8  ;;  %v121_v22 = vld [vmem:[%s8203_s0 + $0x318] sm:$0xff] }
  0xc9   :  { %380 = vxpose.xlu1.b32.cont [7/16] (narrow) %v76_v23, 8  ;;  %v1310_v23 = vmul.f32 %v1249_v12, %v5536_v16 }
  0xcc   :  { %415 = vxpose.xlu0.b32.cont [10/16] (narrow) %v95_v25, 8 }
  0xcd   :  { %381 = vxpose.xlu1.b32.cont [8/16] (narrow) %v77_v26, 8 }
  0xd0   :  { %416 = vxpose.xlu0.b32.cont [11/16] (narrow) %v96_v27, 8  ;;  %v103_v27 = vld [vmem:[%s8203_s0 + $0x288] sm:$0xff] }
  0xd1   :  { %382 = vxpose.xlu1.b32.cont [9/16] (narrow) %v78_v28, 8  ;;  %v906_v28 = vmul.f32 %v813_v53, %v5514_v6 }
  0xd4   :  { %417 = vxpose.xlu0.b32.cont [12/16] (narrow) %v97_v31, 8  ;;  %v1326_v31 = vmul.f32 %v1249_v12, %v5550_v21 }
  0xd5   :  { %383 = vxpose.xlu1.b32.cont [10/16] (narrow) %v79_v32, 8 }
  0xd8   :  { %418 = vxpose.xlu0.b32.cont [13/16] (narrow) %v98_v34, 8  ;;  %v1006_v34 = vadd.f32 %v5558_v24, %v922_v15 }
  0xd9   :  { %384 = vxpose.xlu1.b32.cont [11/16] (narrow) %v80_v35, 8 }
  0xdc   :  { %419 = vxpose.xlu0.b32.cont [14/16] (narrow) %v99_v38, 8 }
  0xdd   :  { %385 = vxpose.xlu1.b32.cont [12/16] (narrow) %v81_v39, 8  ;;  %v1374_v39 = vadd.f32 %v1310_v23, %v1166_v18 }
  0xdf   :  { %4892 = vtanh.f32 %v1374_v39 }
  0xe0   :  { %420 = vxpose.xlu0.b32.cont [15/16] (narrow) %v100_v43, 8 }
  0xe1   :  { %386 = vxpose.xlu1.b32.cont [13/16] (narrow) %v82_v44, 8 }
  0xe4   :  { %421 = vxpose.xlu0.b32.end [16/16] (narrow) %v101_v49, 8  ;;  %v1390_v49 = vadd.f32 %v1326_v31, %v1182_v19  ;;  %v123_v19 = vld [vmem:[%s8203_s0 + $0x328] sm:$0xff] }
  0xe5   :  { %387 = vxpose.xlu1.b32.cont [14/16] (narrow) %v83_v52, 8 }
  0xe6   :  { %4894 = vtanh.f32 %v1390_v49 }
  0xe8   :  { %470 = vxpose.xlu0.b32.start [1/16] (narrow) %v118_v55, 8 }
  0xe9   :  { %388 = vxpose.xlu1.b32.cont [15/16] (narrow) %v84_v57, 8 }
  0xec   :  { %471 = vxpose.xlu0.b32.cont [2/16] (narrow) %v119_v63, 8 }
  0xed   :  { %389 = vxpose.xlu1.b32.end [16/16] (narrow) %v85_v2, 8 }
  0xf0   :  { %472 = vxpose.xlu0.b32.cont [3/16] (narrow) %v120_v10, 8 }
  0xf1   :  { %438 = vxpose.xlu1.b32.start [1/16] (narrow) %v102_v14, 8  ;;  %v326_v20 = vpop.trf.xlu1 }
  0xf2   :  { %v817_v25 = vrot.slane %v326_v20, %v5608_v46  ;;  %v1045_v26 = vrot.slane %v326_v20, %v5622_v56  ;;  %v1253_v32 = vrot.slane %v326_v20, %v5634_v0 }
  0xf4   :  { %v875_v35 = vmul.f32 %v817_v25, %v5446_v45  ;;  %v891_v37 = vmul.f32 %v817_v25, %v5462_v51  ;;  %v907_v38 = vmul.f32 %v817_v25, %v5514_v6  ;;  %473 = vxpose.xlu0.b32.cont [4/16] (narrow) %v121_v22, 8  ;;  %v923_v41 = vmul.f32 %v817_v25, %v5528_v13  ;;  %v105_v22 = vld [vmem:[%s8203_s0 + $0x298] sm:$0xff] }
  0xf5   :  { %v1103_v43 = vmul.f32 %v1045_v26, %v5492_v62  ;;  %v1119_v44 = vmul.f32 %v1045_v26, %v5506_v3  ;;  %439 = vxpose.xlu1.b32.cont [2/16] (narrow) %v103_v27, 8  ;;  %v1135_v57 = vmul.f32 %v1045_v26, %v5572_v29  ;;  %v1151_v63 = vmul.f32 %v1045_v26, %v5582_v33 }
  0xf6   :  { %v959_v52 = vadd.f32 %v5470_v54, %v875_v35  ;;  %v975_v53 = vadd.f32 %v5484_v59, %v891_v37  ;;  %v991_v55 = vadd.f32 %v5574_v30, %v907_v38  ;;  %v1007_v61 = vadd.f32 %v5558_v24, %v923_v41  ;;  %v124_v38 = vld [vmem:[%s8203_s0 + $0x330] sm:$0xff] }
  0xf7   :  { %v1311_v2 = vmul.f32 %v1253_v32, %v5536_v16  ;;  %v1343_v10 = vmul.f32 %v1253_v32, %v5598_v40  ;;  %v1327_v17 = vmul.f32 %v1253_v32, %v5550_v21  ;;  %v1359_v18 = vmul.f32 %v1253_v32, %v5610_v48 }
  0xf8   :  { %v1199_v5 = vadd.f32 %v1135_v57, %v991_v55  ;;  %474 = vxpose.xlu0.b32.cont [5/16] (narrow) %v122_v47, 8  ;;  %v1167_v11 = vadd.f32 %v1103_v43, %v959_v52  ;;  %v1183_v14 = vadd.f32 %v1119_v44, %v975_v53  ;;  %v1215_v15 = vadd.f32 %v1151_v63, %v1007_v61  ;;  %v4893_v43 = vpop.eup %4892  ;;  %v126_v47 = vld [vmem:[%s8203_s0 + $0x340] sm:$0xff]  ;;  %v108_v52 = vld [vmem:[%s8203_s0 + $0x2b0] sm:$0xff]  ;;  %v109_v63 = vld [vmem:[%s8203_s0 + $0x2b8] sm:$0xff] }
  0xf9   :  { %440 = vxpose.xlu1.b32.cont [3/16] (narrow) %v104_v60, 8  ;;  %v1134_v25 = vmul.f32 %v1041_v1, %v5572_v29  ;;  %v1358_v26 = vmul.f32 %v1249_v12, %v5610_v48  ;;  %v990_v32 = vadd.f32 %v5574_v30, %v906_v28  ;;  %v1214_v35 = vadd.f32 %v1150_v4, %v1006_v34  ;;  %v106_v1 = vld [vmem:[%s8203_s0 + $0x2a0] sm:$0xff]  ;;  %v107_v34 = vld [vmem:[%s8203_s0 + $0x2a8] sm:$0xff]  ;;  %v4895_v44 = vpop.eup %4894 }
  0xfa   :  { %v1407_v20 = vadd.f32 %v1343_v10, %v1199_v5  ;;  %v1375_v23 = vadd.f32 %v1311_v2, %v1167_v11  ;;  %v1423_v27 = vadd.f32 %v1359_v18, %v1215_v15  ;;  %v1391_v31 = vadd.f32 %v1327_v17, %v1183_v14  ;;  %v127_v60 = vld [vmem:[%s8203_s0 + $0x348] sm:$0xff]  ;;  %v128_v10 = vld [vmem:[%s8203_s0 + $0x350] sm:$0xff]  ;;  %v110_v14 = vld [vmem:[%s8203_s0 + $0x2c0] sm:$0xff] }
  0xfb   :  { %v1342_v37 = vmul.f32 %v1249_v12, %v5598_v40  ;;  %v1198_v39 = vadd.f32 %v1134_v25, %v990_v32  ;;  %v1422_v41 = vadd.f32 %v1358_v26, %v1214_v35  ;;  %v125_v12 = vld [vmem:[%s8203_s0 + $0x338] sm:$0xff]  ;;  %v4683_v2 = vpack.c.bf16 %v4895_v44, %v4893_v43  ;;  %v111_v18 = vld [vmem:[%s8203_s0 + $0x2c8] sm:$0xff]  ;;  %v132_v25 = vld [vmem:[%s8203_s0 + $0x370] sm:$0xff] }
  0xfc   :  { %4896 = vtanh.f32 %v1407_v20  ;;  %475 = vxpose.xlu0.b32.cont [6/16] (narrow) %v123_v19, 8  ;;  %v129_v17 = vld [vmem:[%s8203_s0 + $0x358] sm:$0xff]  ;;  %v130_v19 = vld [vmem:[%s8203_s0 + $0x360] sm:$0xff]  ;;  %v112_v20 = vld [vmem:[%s8203_s0 + $0x2d0] sm:$0xff] }
  0xfd   :  { %4898 = vtanh.f32 %v1423_v27  ;;  %441 = vxpose.xlu1.b32.cont [4/16] (narrow) %v105_v22, 8  ;;  %v1406_v28 = vadd.f32 %v1342_v37, %v1198_v39  ;;  %v131_v22 = vld [vmem:[%s8203_s0 + $0x368] sm:$0xff]  ;;  %v114_v26 = vld [vmem:[%s8203_s0 + $0x2e0] sm:$0xff]  ;;  %v133_v27 = vld [vmem:[%s8203_s0 + $0x378] sm:$0xff] }
  0xfe   :  { %4900 = vtanh.f32 %v1375_v23  ;;  %v113_v23 = vld [vmem:[%s8203_s0 + $0x2d8] sm:$0xff]  ;;  %v115_v32 = vld [vmem:[%s8203_s0 + $0x2e8] sm:$0xff]  ;;  %v166_v37 = vld [vmem:[%s8203_s0 + $0x480] sm:$0xff] }
  0xff   :  { %4902 = vtanh.f32 %v1391_v31  ;;  %v358_v31 = vpop.trf.xlu0 }
 0x100   :  { %476 = vxpose.xlu0.b32.cont [7/16] (narrow) %v124_v38, 8  ;;  %4904 = vtanh.f32 %v1422_v41  ;;  %v821_v35 = vrot.slane %v358_v31, %v5608_v46  ;;  %v116_v38 = vld [vmem:[%s8203_s0 + $0x2f0] sm:$0xff]  ;;  %v167_v41 = vld [vmem:[%s8203_s0 + $0x488] sm:$0xff] }
 0x101   :  { %442 = vxpose.xlu1.b32.cont [5/16] (narrow) %v106_v1, 8  ;;  %4906 = vtanh.f32 %v1406_v28  ;;  %v117_v28 = vld [vmem:[%s8203_s0 + $0x2f8] sm:$0xff] }
 0x102   :  { %v876_v1 = vmul.f32 %v821_v35, %v5446_v45  ;;  %v892_v39 = vmul.f32 %v821_v35, %v5462_v51 }
 0x104   :  { %477 = vxpose.xlu0.b32.cont [8/16] (narrow) %v125_v12, 8  ;;  %v1049_v12 = vrot.slane %v358_v31, %v5622_v56  ;;  %v960_v43 = vadd.f32 %v5470_v54, %v876_v1  ;;  %v976_v44 = vadd.f32 %v5484_v59, %v892_v39 }
 0x105   :  { %443 = vxpose.xlu1.b32.cont [6/16] (narrow) %v107_v34, 8  ;;  %v908_v34 = vmul.f32 %v821_v35, %v5514_v6 }
 0x106   :  { %v4897_v49 = vpop.eup %4896 }
 0x107   :  { %v4899_v53 = vpop.eup %4898 }
 0x108   :  { %v4901_v55 = vpop.eup %4900  ;;  %478 = vxpose.xlu0.b32.cont [9/16] (narrow) %v126_v47, 8  ;;  %v4685_v5 = vpack.c.bf16 %v4899_v53, %v4897_v49  ;;  %v168_v47 = vld [vmem:[%s8203_s0 + $0x490] sm:$0xff]  ;;  %v134_v49 = vld [vmem:[%s8203_s0 + $0x380] sm:$0xff]  ;;  %v1104_v53 = vmul.f32 %v1049_v12, %v5492_v62 }
 0x109   :  { %v4903_v57 = vpop.eup %4902  ;;  %444 = vxpose.xlu1.b32.cont [7/16] (narrow) %v108_v52, 8  ;;  %v924_v52 = vmul.f32 %v821_v35, %v5528_v13 }
 0x10a   :  { %v4681_v61 = vpack.c.bf16 %v4903_v57, %v4901_v55  ;;  %v4905_v4 = vpop.eup %4904  ;;  %v1120_v55 = vmul.f32 %v1049_v12, %v5506_v3  ;;  %v1257_v57 = vrot.slane %v358_v31, %v5634_v0  ;;  %v170_v31 = vld [vmem:[%s8203_s0 + $0x4a0] sm:$0xff] }
 0x10b   :  { %v4907_v11 = vpop.eup %4906 }
 0x10c   :  { %4682 = vmatprep.subr.bf16.mxu0 %v4681_v61  ;;  %479 = vxpose.xlu0.b32.cont [10/16] (narrow) %v127_v60, 8  ;;  %v4687_v15 = vpack.c.bf16 %v4905_v4, %v4907_v11  ;;  %v992_v60 = vadd.f32 %v5574_v30, %v908_v34  ;;  %v1168_v61 = vadd.f32 %v1104_v53, %v960_v43  ;;  %v169_v4 = vld [vmem:[%s8203_s0 + $0x498] sm:$0xff] }
 0x10d   :  { %4684 = vmatpush1.bf16.msra.mxu0 %v4683_v2  ;;  %445 = vxpose.xlu1.b32.cont [8/16] (narrow) %v109_v63, 8  ;;  %v1184_v63 = vadd.f32 %v1120_v55, %v976_v44 }
 0x10e   :  { %4686 = vmatprep.subr.bf16.mxu0 %v4685_v5  ;;  %v1136_v5 = vmul.f32 %v1049_v12, %v5572_v29 }
 0x110   :  { %480 = vxpose.xlu0.b32.cont [11/16] (narrow) %v128_v10, 8 }
 0x111   :  { %4688 = vmatpush1.bf16.msra.mxu0 %v4687_v15  ;;  %446 = vxpose.xlu1.b32.cont [9/16] (narrow) %v110_v14, 8  ;;  %v135_v14 = vld [vmem:[%s8203_s0 + $0x388] sm:$0xff]  ;;  %v1008_v15 = vadd.f32 %v5558_v24, %v924_v52 }
 0x114   :  { %4585 = vmatmul.mubr.msk.f32.vlgmr.msra.gmra.mrb[0].mxu0 %vm1526_vm0, %v5627_v58  ;;  %481 = vxpose.xlu0.b32.cont [12/16] (narrow) %v129_v17, 8  ;;  %v1152_v17 = vmul.f32 %v1049_v12, %v5582_v33 }
 0x115   :  { %1605 = vmatprep.mubr.f32.mxu0 %v8206_v50  ;;  %447 = vxpose.xlu1.b32.cont [10/16] (narrow) %v111_v18, 8  ;;  %v1312_v18 = vmul.f32 %v1257_v57, %v5536_v16 }
 0x118   :  { %4586 = vmatmul.mubr.msk.f32.gmra.mrb[2].mxu0 %vm1526_vm0, %v5642_v7  ;;  %482 = vxpose.xlu0.b32.cont [13/16] (narrow) %v130_v19, 8  ;;  %v1328_v19 = vmul.f32 %v1257_v57, %v5550_v21 }
 0x119   :  { %1611 = vmatprep.mubr.f32.mxu0 %v8206_v50  ;;  %448 = vxpose.xlu1.b32.cont [11/16] (narrow) %v112_v20, 8 }
 0x11a   :  { %v1392_v35 = vadd.f32 %v1328_v19, %v1184_v63  ;;  %v1360_v19 = vmul.f32 %v1257_v57, %v5610_v48 }
 0x11c   :  { %4587 = vmatmul.mubr.msk.f32.gmra.mrb[4].mxu0 %vm1526_vm0, %v5590_v36  ;;  %483 = vxpose.xlu0.b32.cont [14/16] (narrow) %v131_v22, 8 }
 0x11d   :  { %1617 = vmatprep.mubr.f32.mxu0 %v8206_v50  ;;  %449 = vxpose.xlu1.b32.cont [12/16] (narrow) %v113_v23, 8 }
 0x120   :  { %4588 = vmatmul.mubr.msk.f32.gmra.mrb[6].mxu0 %vm1526_vm0, %v5600_v42  ;;  %484 = vxpose.xlu0.b32.cont [15/16] (narrow) %v132_v25, 8 }
 0x121   :  { %450 = vxpose.xlu1.b32.cont [13/16] (narrow) %v114_v26, 8  ;;  %1777 = vmatprep.mubr.f32.mxu0 %v8206_v50  ;;  %v1200_v26 = vadd.f32 %v1136_v5, %v992_v60  ;;  %v137_v5 = vld [vmem:[%s8203_s0 + $0x398] sm:$0xff] }
 0x124   :  { %485 = vxpose.xlu0.b32.end [16/16] (narrow) %v133_v27, 8 }
 0x125   :  { %451 = vxpose.xlu1.b32.cont [14/16] (narrow) %v115_v32, 8  ;;  %v1376_v32 = vadd.f32 %v1312_v18, %v1168_v61  ;;  %v171_v61 = vld [vmem:[%s8203_s0 + $0x4a8] sm:$0xff] }
 0x127   :  { %4908 = vtanh.f32 %v1376_v32  ;;  %v140_v32 = vld [vmem:[%s8203_s0 + $0x3b0] sm:$0xff] }
 0x128   :  { %566 = vxpose.xlu0.b32.start [1/16] (narrow) %v166_v37, 8  ;;  %4910 = vtanh.f32 %v1392_v35 }
 0x129   :  { %452 = vxpose.xlu1.b32.cont [15/16] (narrow) %v116_v38, 8 }
 0x12c   :  { %567 = vxpose.xlu0.b32.cont [2/16] (narrow) %v167_v41, 8  ;;  %v136_v41 = vld [vmem:[%s8203_s0 + $0x390] sm:$0xff] }
 0x12d   :  { %453 = vxpose.xlu1.b32.end [16/16] (narrow) %v117_v28, 8 }
 0x130   :  { %568 = vxpose.xlu0.b32.cont [3/16] (narrow) %v168_v47, 8 }
 0x131   :  { %502 = vxpose.xlu1.b32.start [1/16] (narrow) %v134_v49, 8  ;;  %v390_v2 = vpop.trf.xlu1 }
 0x132   :  { %v825_v10 = vrot.slane %v390_v2, %v5608_v46  ;;  %v1053_v11 = vrot.slane %v390_v2, %v5622_v56  ;;  %v1261_v25 = vrot.slane %v390_v2, %v5634_v0  ;;  %v1216_v2 = vadd.f32 %v1152_v17, %v1008_v15  ;;  %v172_v15 = vld [vmem:[%s8203_s0 + $0x4b0] sm:$0xff] }
 0x134   :  { %v877_v20 = vmul.f32 %v825_v10, %v5446_v45  ;;  %v893_v22 = vmul.f32 %v825_v10, %v5462_v51  ;;  %v909_v23 = vmul.f32 %v825_v10, %v5514_v6  ;;  %569 = vxpose.xlu0.b32.cont [4/16] (narrow) %v169_v4, 8  ;;  %v925_v27 = vmul.f32 %v825_v10, %v5528_v13 }
 0x135   :  { %503 = vxpose.xlu1.b32.cont [2/16] (narrow) %v135_v14, 8  ;;  %v1105_v39 = vmul.f32 %v1053_v11, %v5492_v62  ;;  %v1121_v12 = vmul.f32 %v1053_v11, %v5506_v3  ;;  %v1137_v34 = vmul.f32 %v1053_v11, %v5572_v29  ;;  %v1153_v43 = vmul.f32 %v1053_v11, %v5582_v33 }
 0x136   :  { %v961_v37 = vadd.f32 %v5470_v54, %v877_v20  ;;  %v977_v38 = vadd.f32 %v5484_v59, %v893_v22  ;;  %v993_v1 = vadd.f32 %v5574_v30, %v909_v23  ;;  %v1009_v28 = vadd.f32 %v5558_v24, %v925_v27  ;;  %v138_v22 = vld [vmem:[%s8203_s0 + $0x3a0] sm:$0xff]  ;;  %v139_v23 = vld [vmem:[%s8203_s0 + $0x3a8] sm:$0xff] }
 0x137   :  { %v1313_v44 = vmul.f32 %v1261_v25, %v5536_v16  ;;  %v1329_v47 = vmul.f32 %v1261_v25, %v5550_v21  ;;  %v1345_v49 = vmul.f32 %v1261_v25, %v5598_v40  ;;  %v1361_v60 = vmul.f32 %v1261_v25, %v5610_v48  ;;  %v4909_v25 = vpop.eup %4908  ;;  %v174_v27 = vld [vmem:[%s8203_s0 + $0x4c0] sm:$0xff] }
 0x138   :  { %570 = vxpose.xlu0.b32.cont [5/16] (narrow) %v170_v31, 8  ;;  %v1169_v52 = vadd.f32 %v1105_v39, %v961_v37  ;;  %v1201_v53 = vadd.f32 %v1137_v34, %v993_v1  ;;  %v1217_v55 = vadd.f32 %v1153_v43, %v1009_v28  ;;  %v1185_v63 = vadd.f32 %v1121_v12, %v977_v38  ;;  %v175_v1 = vld [vmem:[%s8203_s0 + $0x4c8] sm:$0xff] }
 0x139   :  { %504 = vxpose.xlu1.b32.cont [3/16] (narrow) %v136_v41, 8  ;;  %v1344_v4 = vmul.f32 %v1257_v57, %v5598_v40  ;;  %v1424_v17 = vadd.f32 %v1360_v19, %v1216_v2  ;;  %v173_v57 = vld [vmem:[%s8203_s0 + $0x4b8] sm:$0xff]  ;;  %v180_v2 = vld [vmem:[%s8203_s0 + $0x4f0] sm:$0xff] }
 0x13a   :  { %v1377_v10 = vadd.f32 %v1313_v44, %v1169_v52  ;;  %v1409_v11 = vadd.f32 %v1345_v49, %v1201_v53  ;;  %v1425_v14 = vadd.f32 %v1361_v60, %v1217_v55  ;;  %v1393_v18 = vadd.f32 %v1329_v47, %v1185_v63  ;;  %v141_v41 = vld [vmem:[%s8203_s0 + $0x3b8] sm:$0xff]  ;;  %v176_v44 = vld [vmem:[%s8203_s0 + $0x4d0] sm:$0xff]  ;;  %v142_v47 = vld [vmem:[%s8203_s0 + $0x3c0] sm:$0xff] }
 0x13b   :  { %v1408_v20 = vadd.f32 %v1344_v4, %v1200_v26  ;;  %v4911_v26 = vpop.eup %4910  ;;  %v177_v52 = vld [vmem:[%s8203_s0 + $0x4d8] sm:$0xff]  ;;  %v143_v53 = vld [vmem:[%s8203_s0 + $0x3c8] sm:$0xff]  ;;  %v178_v55 = vld [vmem:[%s8203_s0 + $0x4e0] sm:$0xff] }
 0x13c   :  { %571 = vxpose.xlu0.b32.cont [6/16] (narrow) %v171_v61, 8  ;;  %4912 = vtanh.f32 %v1377_v10  ;;  %v4691_v12 = vpack.c.bf16 %v4911_v26, %v4909_v25  ;;  %v144_v60 = vld [vmem:[%s8203_s0 + $0x3d0] sm:$0xff]  ;;  %v179_v61 = vld [vmem:[%s8203_s0 + $0x4e8] sm:$0xff]  ;;  %v145_v63 = vld [vmem:[%s8203_s0 + $0x3d8] sm:$0xff] }
 0x13d   :  { %4914 = vtanh.f32 %v1409_v11  ;;  %505 = vxpose.xlu1.b32.cont [4/16] (narrow) %v137_v5, 8  ;;  %v146_v4 = vld [vmem:[%s8203_s0 + $0x3e0] sm:$0xff]  ;;  %v422_v5 = vpop.trf.xlu0  ;;  %v181_v10 = vld [vmem:[%s8203_s0 + $0x4f8] sm:$0xff]  ;;  %v147_v11 = vld [vmem:[%s8203_s0 + $0x3e8] sm:$0xff] }
 0x13e   :  { %4916 = vtanh.f32 %v1425_v14  ;;  %v829_v14 = vrot.slane %v422_v5, %v5608_v46  ;;  %v148_v19 = vld [vmem:[%s8203_s0 + $0x3f0] sm:$0xff] }
 0x13f   :  { %4918 = vtanh.f32 %v1393_v18  ;;  %v150_v18 = vld [vmem:[%s8203_s0 + $0x400] sm:$0xff] }
 0x140   :  { %572 = vxpose.xlu0.b32.cont [7/16] (narrow) %v172_v15, 8  ;;  %4920 = vtanh.f32 %v1408_v20  ;;  %v878_v20 = vmul.f32 %v829_v14, %v5446_v45  ;;  %v894_v15 = vmul.f32 %v829_v14, %v5462_v51  ;;  %v926_v25 = vmul.f32 %v829_v14, %v5528_v13 }
 0x141   :  { %506 = vxpose.xlu1.b32.cont [5/16] (narrow) %v138_v22, 8  ;;  %4922 = vtanh.f32 %v1424_v17  ;;  %v910_v17 = vmul.f32 %v829_v14, %v5514_v6  ;;  %v1057_v22 = vrot.slane %v422_v5, %v5622_v56 }
 0x142   :  { %v962_v26 = vadd.f32 %v5470_v54, %v878_v20 }
 0x144   :  { %573 = vxpose.xlu0.b32.cont [8/16] (narrow) %v173_v57, 8  ;;  %v151_v57 = vld [vmem:[%s8203_s0 + $0x408] sm:$0xff] }
 0x145   :  { %507 = vxpose.xlu1.b32.cont [6/16] (narrow) %v139_v23, 8  ;;  %v149_v23 = vld [vmem:[%s8203_s0 + $0x3f8] sm:$0xff] }
 0x146   :  { %v4913_v31 = vpop.eup %4912 }
 0x147   :  { %v4915_v35 = vpop.eup %4914 }
 0x148   :  { %v4917_v37 = vpop.eup %4916  ;;  %574 = vxpose.xlu0.b32.cont [9/16] (narrow) %v174_v27, 8  ;;  %v978_v27 = vadd.f32 %v5484_v59, %v894_v15  ;;  %v154_v15 = vld [vmem:[%s8203_s0 + $0x420] sm:$0xff] }
 0x149   :  { %v4919_v38 = vpop.eup %4918  ;;  %508 = vxpose.xlu1.b32.cont [7/16] (narrow) %v140_v32, 8  ;;  %v4693_v43 = vpack.c.bf16 %v4917_v37, %v4915_v35  ;;  %v1106_v32 = vmul.f32 %v1057_v22, %v5492_v62  ;;  %v1265_v35 = vrot.slane %v422_v5, %v5634_v0  ;;  %v152_v37 = vld [vmem:[%s8203_s0 + $0x410] sm:$0xff] }
 0x14a   :  { %v4689_v39 = vpack.c.bf16 %v4919_v38, %v4913_v31  ;;  %v4921_v28 = vpop.eup %4920  ;;  %v994_v31 = vadd.f32 %v5574_v30, %v910_v17  ;;  %v198_v38 = vld [vmem:[%s8203_s0 + $0x580] sm:$0xff] }
 0x14b   :  { %v4923_v34 = vpop.eup %4922 }
 0x14c   :  { %4690 = vmatprep.subr.bf16.mxu1 %v4689_v39  ;;  %575 = vxpose.xlu0.b32.cont [10/16] (narrow) %v175_v1, 8  ;;  %v4695_v49 = vpack.c.bf16 %v4923_v34, %v4921_v28  ;;  %v1010_v1 = vadd.f32 %v5558_v24, %v926_v25  ;;  %v1122_v39 = vmul.f32 %v1057_v22, %v5506_v3  ;;  %v200_v25 = vld [vmem:[%s8203_s0 + $0x590] sm:$0xff] }
 0x14d   :  { %4692 = vmatpush1.bf16.msra.mxu1 %v4691_v12  ;;  %509 = vxpose.xlu1.b32.cont [8/16] (narrow) %v141_v41, 8  ;;  %v1138_v41 = vmul.f32 %v1057_v22, %v5572_v29  ;;  %v1170_v28 = vadd.f32 %v1106_v32, %v962_v26  ;;  %v1154_v12 = vmul.f32 %v1057_v22, %v5582_v33 }
 0x14e   :  { %4694 = vmatprep.subr.bf16.mxu1 %v4693_v43  ;;  %v1186_v34 = vadd.f32 %v1122_v39, %v978_v27 }
 0x14f   :  { %v1202_v43 = vadd.f32 %v1138_v41, %v994_v31 }
 0x150   :  { %576 = vxpose.xlu0.b32.cont [11/16] (narrow) %v176_v44, 8  ;;  %v1314_v44 = vmul.f32 %v1265_v35, %v5536_v16 }
 0x151   :  { %4696 = vmatpush1.bf16.msra.mxu1 %v4695_v49  ;;  %510 = vxpose.xlu1.b32.cont [9/16] (narrow) %v142_v47, 8  ;;  %v153_v49 = vld [vmem:[%s8203_s0 + $0x418] sm:$0xff] }
 0x154   :  { %4589 = vmatmul.mubr.msk.f32.vlgmr.msra.gmra.mrb[0].mxu1 %vm1526_vm0, %v5627_v58  ;;  %577 = vxpose.xlu0.b32.cont [12/16] (narrow) %v177_v52, 8 }
 0x155   :  { %1694 = vmatprep.mubr.f32.mxu1 %v8206_v50  ;;  %511 = vxpose.xlu1.b32.cont [10/16] (narrow) %v143_v53, 8 }
 0x158   :  { %4590 = vmatmul.mubr.msk.f32.gmra.mrb[2].mxu1 %vm1526_vm0, %v5642_v7  ;;  %578 = vxpose.xlu0.b32.cont [13/16] (narrow) %v178_v55, 8  ;;  %v199_v55 = vld [vmem:[%s8203_s0 + $0x588] sm:$0xff] }
 0x159   :  { %1700 = vmatprep.mubr.f32.mxu1 %v8206_v50  ;;  %512 = vxpose.xlu1.b32.cont [11/16] (narrow) %v144_v60, 8  ;;  %v1218_v60 = vadd.f32 %v1154_v12, %v1010_v1 }
 0x15c   :  { %4591 = vmatmul.mubr.msk.f32.gmra.mrb[4].mxu1 %vm1526_vm0, %v5590_v36  ;;  %579 = vxpose.xlu0.b32.cont [14/16] (narrow) %v179_v61, 8  ;;  %v1330_v61 = vmul.f32 %v1265_v35, %v5550_v21 }
 0x15d   :  { %1706 = vmatprep.mubr.f32.mxu1 %v8206_v50  ;;  %513 = vxpose.xlu1.b32.cont [12/16] (narrow) %v145_v63, 8  ;;  %v1346_v63 = vmul.f32 %v1265_v35, %v5598_v40 }
 0x15e   :  { %v1394_v14 = vadd.f32 %v1330_v61, %v1186_v34  ;;  %v155_v34 = vld [vmem:[%s8203_s0 + $0x428] sm:$0xff]  ;;  %v156_v61 = vld [vmem:[%s8203_s0 + $0x430] sm:$0xff] }
 0x160   :  { %4592 = vmatmul.mubr.msk.f32.gmra.mrb[6].mxu1 %vm1526_vm0, %v5600_v42  ;;  %580 = vxpose.xlu0.b32.cont [15/16] (narrow) %v180_v2, 8  ;;  %v1378_v2 = vadd.f32 %v1314_v44, %v1170_v28 }
 0x161   :  { %514 = vxpose.xlu1.b32.cont [13/16] (narrow) %v146_v4, 8  ;;  %1866 = vmatprep.mubr.f32.mxu1 %v8206_v50 }
 0x162   :  { %4924 = vtanh.f32 %v1378_v2  ;;  %v203_v2 = vld [vmem:[%s8203_s0 + $0x5a8] sm:$0xff] }
 0x163   :  { %4926 = vtanh.f32 %v1394_v14  ;;  %v204_v14 = vld [vmem:[%s8203_s0 + $0x5b0] sm:$0xff] }
 0x164   :  { %581 = vxpose.xlu0.b32.end [16/16] (narrow) %v181_v10, 8 }
 0x165   :  { %515 = vxpose.xlu1.b32.cont [14/16] (narrow) %v147_v11, 8 }
 0x168   :  { %534 = vxpose.xlu0.b32.start [1/16] (narrow) %v150_v18, 8  ;;  %v1410_v18 = vadd.f32 %v1346_v63, %v1202_v43  ;;  %v1362_v43 = vmul.f32 %v1265_v35, %v5610_v48  ;;  %v202_v35 = vld [vmem:[%s8203_s0 + $0x5a0] sm:$0xff] }
 0x169   :  { %516 = vxpose.xlu1.b32.cont [15/16] (narrow) %v148_v19, 8 }
 0x16a   :  { %4928 = vtanh.f32 %v1410_v18 }
 0x16c   :  { %535 = vxpose.xlu0.b32.cont [2/16] (narrow) %v151_v57, 8  ;;  %v4925_v63 = vpop.eup %4924 }
 0x16d   :  { %517 = vxpose.xlu1.b32.end [16/16] (narrow) %v149_v23, 8 }
 0x170   :  { %536 = vxpose.xlu0.b32.cont [3/16] (narrow) %v152_v37, 8 }
 0x171   :  { %630 = vxpose.xlu1.b32.start [1/16] (narrow) %v198_v38, 8  ;;  %v454_v47 = vpop.trf.xlu1 }
 0x172   :  { %v833_v52 = vrot.slane %v454_v47, %v5608_v46  ;;  %v1061_v53 = vrot.slane %v454_v47, %v5622_v56  ;;  %v1269_v11 = vrot.slane %v454_v47, %v5634_v0 }
 0x174   :  { %v879_v4 = vmul.f32 %v833_v52, %v5446_v45  ;;  %v895_v5 = vmul.f32 %v833_v52, %v5462_v51  ;;  %v911_v10 = vmul.f32 %v833_v52, %v5514_v6  ;;  %537 = vxpose.xlu0.b32.cont [4/16] (narrow) %v153_v49, 8  ;;  %v927_v19 = vmul.f32 %v833_v52, %v5528_v13  ;;  %v201_v49 = vld [vmem:[%s8203_s0 + $0x598] sm:$0xff] }
 0x175   :  { %v1107_v20 = vmul.f32 %v1061_v53, %v5492_v62  ;;  %631 = vxpose.xlu1.b32.cont [2/16] (narrow) %v199_v55, 8  ;;  %v1123_v23 = vmul.f32 %v1061_v53, %v5506_v3  ;;  %v1139_v27 = vmul.f32 %v1061_v53, %v5572_v29  ;;  %v1155_v31 = vmul.f32 %v1061_v53, %v5582_v33 }
 0x176   :  { %v963_v17 = vadd.f32 %v5470_v54, %v879_v4  ;;  %v979_v22 = vadd.f32 %v5484_v59, %v895_v5  ;;  %v995_v57 = vadd.f32 %v5574_v30, %v911_v10  ;;  %v1011_v26 = vadd.f32 %v5558_v24, %v927_v19  ;;  %v4927_v4 = vpop.eup %4926  ;;  %v158_v10 = vld [vmem:[%s8203_s0 + $0x440] sm:$0xff] }
 0x177   :  { %v1315_v38 = vmul.f32 %v1269_v11, %v5536_v16  ;;  %v1331_v1 = vmul.f32 %v1269_v11, %v5550_v21  ;;  %v1347_v28 = vmul.f32 %v1269_v11, %v5598_v40  ;;  %v1363_v12 = vmul.f32 %v1269_v11, %v5610_v48  ;;  %v4929_v5 = vpop.eup %4928 }
 0x178   :  { %v1171_v32 = vadd.f32 %v1107_v20, %v963_v17  ;;  %v1187_v37 = vadd.f32 %v1123_v23, %v979_v22  ;;  %538 = vxpose.xlu0.b32.cont [5/16] (narrow) %v154_v15, 8  ;;  %v1203_v39 = vadd.f32 %v1139_v27, %v995_v57  ;;  %v1219_v41 = vadd.f32 %v1155_v31, %v1011_v26  ;;  %v159_v22 = vld [vmem:[%s8203_s0 + $0x448] sm:$0xff]  ;;  %v160_v27 = vld [vmem:[%s8203_s0 + $0x450] sm:$0xff]  ;;  %v206_v31 = vld [vmem:[%s8203_s0 + $0x5c0] sm:$0xff] }
 0x179   :  { %632 = vxpose.xlu1.b32.cont [3/16] (narrow) %v200_v25, 8  ;;  %v1426_v55 = vadd.f32 %v1362_v43, %v1218_v60  ;;  %v157_v60 = vld [vmem:[%s8203_s0 + $0x438] sm:$0xff]  ;;  %v4699_v17 = vpack.c.bf16 %v4927_v4, %v4925_v63  ;;  %v210_v43 = vld [vmem:[%s8203_s0 + $0x5e0] sm:$0xff]  ;;  %v212_v4 = vld [vmem:[%s8203_s0 + $0x5f0] sm:$0xff] }
 0x17a   :  { %v1379_v44 = vadd.f32 %v1315_v38, %v1171_v32  ;;  %v1395_v47 = vadd.f32 %v1331_v1, %v1187_v37  ;;  %v1411_v52 = vadd.f32 %v1347_v28, %v1203_v39  ;;  %v1427_v53 = vadd.f32 %v1363_v12, %v1219_v41  ;;  %v205_v25 = vld [vmem:[%s8203_s0 + $0x5b8] sm:$0xff]  ;;  %v207_v37 = vld [vmem:[%s8203_s0 + $0x5c8] sm:$0xff]  ;;  %v162_v38 = vld [vmem:[%s8203_s0 + $0x460] sm:$0xff]  ;;  %v486_v28 = vpop.trf.xlu0 }
 0x17b   :  { %v161_v32 = vld [vmem:[%s8203_s0 + $0x458] sm:$0xff]  ;;  %v208_v1 = vld [vmem:[%s8203_s0 + $0x5d0] sm:$0xff]  ;;  %v163_v39 = vld [vmem:[%s8203_s0 + $0x468] sm:$0xff] }
 0x17c   :  { %4930 = vtanh.f32 %v1379_v44  ;;  %539 = vxpose.xlu0.b32.cont [6/16] (narrow) %v155_v34, 8  ;;  %v209_v41 = vld [vmem:[%s8203_s0 + $0x5d8] sm:$0xff]  ;;  %v164_v12 = vld [vmem:[%s8203_s0 + $0x470] sm:$0xff]  ;;  %v837_v34 = vrot.slane %v486_v28, %v5608_v46 }
 0x17d   :  { %4932 = vtanh.f32 %v1395_v47  ;;  %633 = vxpose.xlu1.b32.cont [4/16] (narrow) %v201_v49, 8  ;;  %v165_v44 = vld [vmem:[%s8203_s0 + $0x478] sm:$0xff] }
 0x17e   :  { %4934 = vtanh.f32 %v1411_v52  ;;  %v880_v47 = vmul.f32 %v837_v34, %v5446_v45  ;;  %v896_v49 = vmul.f32 %v837_v34, %v5462_v51  ;;  %v912_v52 = vmul.f32 %v837_v34, %v5514_v6 }
 0x17f   :  { %4936 = vtanh.f32 %v1427_v53  ;;  %v211_v53 = vld [vmem:[%s8203_s0 + $0x5e8] sm:$0xff] }
 0x180   :  { %4938 = vtanh.f32 %v1426_v55  ;;  %540 = vxpose.xlu0.b32.cont [7/16] (narrow) %v156_v61, 8  ;;  %v1065_v55 = vrot.slane %v486_v28, %v5622_v56  ;;  %v928_v61 = vmul.f32 %v837_v34, %v5528_v13  ;;  %v964_v63 = vadd.f32 %v5470_v54, %v880_v47 }
 0x181   :  { %634 = vxpose.xlu1.b32.cont [5/16] (narrow) %v202_v35, 8  ;;  %v230_v35 = vld [vmem:[%s8203_s0 + $0x680] sm:$0xff] }
 0x184   :  { %541 = vxpose.xlu0.b32.cont [8/16] (narrow) %v157_v60, 8  ;;  %v980_v60 = vadd.f32 %v5484_v59, %v896_v49 }
 0x185   :  { %635 = vxpose.xlu1.b32.cont [6/16] (narrow) %v203_v2, 8  ;;  %v996_v2 = vadd.f32 %v5574_v30, %v912_v52 }
 0x186   :  { %v4931_v11 = vpop.eup %4930 }
 0x187   :  { %v4933_v18 = vpop.eup %4932 }
 0x188   :  { %v4935_v19 = vpop.eup %4934  ;;  %542 = vxpose.xlu0.b32.cont [9/16] (narrow) %v158_v10, 8  ;;  %v4697_v20 = vpack.c.bf16 %v4933_v18, %v4931_v11  ;;  %v1124_v10 = vmul.f32 %v1065_v55, %v5506_v3  ;;  %v1140_v11 = vmul.f32 %v1065_v55, %v5572_v29  ;;  %v1012_v18 = vadd.f32 %v5558_v24, %v928_v61  ;;  %v182_v61 = vld [vmem:[%s8203_s0 + $0x500] sm:$0xff] }
 0x189   :  { %v4937_v15 = vpop.eup %4936  ;;  %636 = vxpose.xlu1.b32.cont [7/16] (narrow) %v204_v14, 8 }
 0x18a   :  { %v4939_v57 = vpop.eup %4938  ;;  %4698 = vmatprep.subr.bf16.mxu0 %v4697_v20  ;;  %v4701_v23 = vpack.c.bf16 %v4937_v15, %v4935_v19  ;;  %v6084_v19 = vrot.slane %v486_v28, %v5634_v0 }
 0x18b   :  { %4700 = vmatpush1.bf16.msra.mxu0 %v4699_v17  ;;  %v4703_v26 = vpack.c.bf16 %v4939_v57, %v4929_v5  ;;  %v1108_v5 = vmul.f32 %v1065_v55, %v5492_v62  ;;  %v231_v17 = vld [vmem:[%s8203_s0 + $0x688] sm:$0xff]  ;;  %v1188_v57 = vadd.f32 %v1124_v10, %v980_v60 }
 0x18c   :  { %4702 = vmatprep.subr.bf16.mxu0 %v4701_v23  ;;  %543 = vxpose.xlu0.b32.cont [10/16] (narrow) %v159_v22, 8  ;;  %v1204_v23 = vadd.f32 %v1140_v11, %v996_v2  ;;  %v1332_v10 = vmul.f32 %v6084_v19, %v5550_v21  ;;  %v1348_v11 = vmul.f32 %v6084_v19, %v5598_v40 }
 0x18d   :  { %637 = vxpose.xlu1.b32.cont [8/16] (narrow) %v205_v25, 8  ;;  %v1172_v22 = vadd.f32 %v1108_v5, %v964_v63  ;;  %v1316_v5 = vmul.f32 %v6084_v19, %v5536_v16 }
 0x18f   :  { %4704 = vmatpush1.bf16.msra.mxu0 %v4703_v26  ;;  %v213_v26 = vld [vmem:[%s8203_s0 + $0x5f8] sm:$0xff] }
 0x190   :  { %544 = vxpose.xlu0.b32.cont [11/16] (narrow) %v160_v27, 8 }
 0x191   :  { %638 = vxpose.xlu1.b32.cont [9/16] (narrow) %v206_v31, 8 }
 0x192   :  { %4593 = vmatmul.mubr.msk.f32.vlgmr.msra.gmra.mrb[8].mxu0 %vm1526_vm0, %v5627_v58 }
 0x193   :  { %1783 = vmatprep.mubr.f32.mxu0 %v8206_v50 }
 0x194   :  { %545 = vxpose.xlu0.b32.cont [12/16] (narrow) %v161_v32, 8 }
 0x195   :  { %639 = vxpose.xlu1.b32.cont [10/16] (narrow) %v207_v37, 8 }
 0x196   :  { %4594 = vmatmul.mubr.msk.f32.gmra.mrb[10].mxu0 %vm1526_vm0, %v5642_v7 }
 0x197   :  { %1789 = vmatprep.mubr.f32.mxu0 %v8206_v50 }
 0x198   :  { %546 = vxpose.xlu0.b32.cont [13/16] (narrow) %v162_v38, 8 }
 0x199   :  { %640 = vxpose.xlu1.b32.cont [11/16] (narrow) %v208_v1, 8 }
 0x19a   :  { %4595 = vmatmul.mubr.msk.f32.gmra.mrb[12].mxu0 %vm1526_vm0, %v5590_v36 }
 0x19b   :  { %1795 = vmatprep.mubr.f32.mxu0 %v8206_v50 }
 0x19c   :  { %547 = vxpose.xlu0.b32.cont [14/16] (narrow) %v163_v39, 8 }
 0x19d   :  { %641 = vxpose.xlu1.b32.cont [12/16] (narrow) %v209_v41, 8 }
 0x19e   :  { %4596 = vmatmul.mubr.msk.f32.gmra.mrb[14].mxu0 %vm1526_vm0, %v5600_v42 }
 0x19f   :  { %1955 = vmatprep.mubr.f32.mxu0 %v8206_v50 }
 0x1a0   :  { %548 = vxpose.xlu0.b32.cont [15/16] (narrow) %v164_v12, 8 }
 0x1a1   :  { %642 = vxpose.xlu1.b32.cont [13/16] (narrow) %v210_v43, 8 }
 0x1a4   :  { %549 = vxpose.xlu0.b32.end [16/16] (narrow) %v165_v44, 8  ;;  %v232_v44 = vld [vmem:[%s8203_s0 + $0x690] sm:$0xff] }
 0x1a5   :  { %643 = vxpose.xlu1.b32.cont [14/16] (narrow) %v211_v53, 8 }
 0x1a8   :  { %694 = vxpose.xlu0.b32.start [1/16] (narrow) %v230_v35, 8  ;;  %v582_v14 = vpop.trf.xlu0 }
 0x1a9   :  { %v849_v20 = vrot.slane %v582_v14, %v5608_v46  ;;  %v1077_v15 = vrot.slane %v582_v14, %v5622_v56  ;;  %644 = vxpose.xlu1.b32.cont [15/16] (narrow) %v212_v4, 8  ;;  %v1285_v25 = vrot.slane %v582_v14, %v5634_v0  ;;  %v1156_v4 = vmul.f32 %v1065_v55, %v5582_v33  ;;  %v233_v55 = vld [vmem:[%s8203_s0 + $0x698] sm:$0xff] }
 0x1ab   :  { %v883_v27 = vmul.f32 %v849_v20, %v5446_v45  ;;  %v899_v31 = vmul.f32 %v849_v20, %v5462_v51  ;;  %v915_v32 = vmul.f32 %v849_v20, %v5514_v6  ;;  %v931_v37 = vmul.f32 %v849_v20, %v5528_v13 }
 0x1ac   :  { %v1111_v38 = vmul.f32 %v1077_v15, %v5492_v62  ;;  %v1127_v1 = vmul.f32 %v1077_v15, %v5506_v3  ;;  %v1143_v39 = vmul.f32 %v1077_v15, %v5572_v29  ;;  %v1159_v41 = vmul.f32 %v1077_v15, %v5582_v33  ;;  %695 = vxpose.xlu0.b32.cont [2/16] (narrow) %v231_v17, 8 }
 0x1ad   :  { %v967_v28 = vadd.f32 %v5470_v54, %v883_v27  ;;  %v983_v12 = vadd.f32 %v5484_v59, %v899_v31  ;;  %v999_v34 = vadd.f32 %v5574_v30, %v915_v32  ;;  %v1015_v43 = vadd.f32 %v5558_v24, %v931_v37  ;;  %645 = vxpose.xlu1.b32.end [16/16] (narrow) %v213_v26, 8  ;;  %v183_v37 = vld [vmem:[%s8203_s0 + $0x508] sm:$0xff] }
 0x1ae   :  { %v1319_v47 = vmul.f32 %v1285_v25, %v5536_v16  ;;  %v1335_v49 = vmul.f32 %v1285_v25, %v5550_v21  ;;  %v1351_v52 = vmul.f32 %v1285_v25, %v5598_v40  ;;  %v1367_v53 = vmul.f32 %v1285_v25, %v5610_v48 }
 0x1af   :  { %v1175_v35 = vadd.f32 %v1111_v38, %v967_v28  ;;  %v1191_v63 = vadd.f32 %v1127_v1, %v983_v12  ;;  %v1207_v60 = vadd.f32 %v1143_v39, %v999_v34  ;;  %v1223_v2 = vadd.f32 %v1159_v41, %v1015_v43 }
 0x1b0   :  { %696 = vxpose.xlu0.b32.cont [3/16] (narrow) %v232_v44, 8  ;;  %v1220_v26 = vadd.f32 %v1156_v4, %v1012_v18  ;;  %v1380_v27 = vadd.f32 %v1316_v5, %v1172_v22  ;;  %v1396_v38 = vadd.f32 %v1332_v10, %v1188_v57  ;;  %v1412_v1 = vadd.f32 %v1348_v11, %v1204_v23  ;;  %v234_v57 = vld [vmem:[%s8203_s0 + $0x6a0] sm:$0xff]  ;;  %v235_v11 = vld [vmem:[%s8203_s0 + $0x6a8] sm:$0xff] }
 0x1b1   :  { %v1383_v14 = vadd.f32 %v1319_v47, %v1175_v35  ;;  %v1399_v20 = vadd.f32 %v1335_v49, %v1191_v63  ;;  %v1415_v15 = vadd.f32 %v1351_v52, %v1207_v60  ;;  %v1431_v17 = vadd.f32 %v1367_v53, %v1223_v2  ;;  %598 = vxpose.xlu1.b32.start [1/16] (narrow) %v182_v61, 8  ;;  %v518_v25 = vpop.trf.xlu1  ;;  %v184_v47 = vld [vmem:[%s8203_s0 + $0x510] sm:$0xff] }
 0x1b2   :  { %v841_v31 = vrot.slane %v518_v25, %v5608_v46  ;;  %v1069_v32 = vrot.slane %v518_v25, %v5622_v56  ;;  %v1277_v39 = vrot.slane %v518_v25, %v5634_v0 }
 0x1b3   :  { %4940 = vtanh.f32 %v1383_v14  ;;  %v1364_v14 = vmul.f32 %v6084_v19, %v5610_v48  ;;  %v236_v19 = vld [vmem:[%s8203_s0 + $0x6b0] sm:$0xff] }
 0x1b4   :  { %4942 = vtanh.f32 %v1399_v20  ;;  %v881_v41 = vmul.f32 %v841_v31, %v5446_v45  ;;  %v897_v28 = vmul.f32 %v841_v31, %v5462_v51  ;;  %v913_v18 = vmul.f32 %v841_v31, %v5514_v6  ;;  %697 = vxpose.xlu0.b32.cont [4/16] (narrow) %v233_v55, 8 }
 0x1b5   :  { %4944 = vtanh.f32 %v1415_v15  ;;  %v929_v22 = vmul.f32 %v841_v31, %v5528_v13  ;;  %v1109_v12 = vmul.f32 %v1069_v32, %v5492_v62  ;;  %v1125_v34 = vmul.f32 %v1069_v32, %v5506_v3  ;;  %599 = vxpose.xlu1.b32.cont [2/16] (narrow) %v183_v37, 8  ;;  %v186_v37 = vld [vmem:[%s8203_s0 + $0x520] sm:$0xff] }
 0x1b6   :  { %4946 = vtanh.f32 %v1431_v17  ;;  %v965_v23 = vadd.f32 %v5470_v54, %v881_v41  ;;  %v981_v43 = vadd.f32 %v5484_v59, %v897_v28  ;;  %v997_v44 = vadd.f32 %v5574_v30, %v913_v18  ;;  %v185_v17 = vld [vmem:[%s8203_s0 + $0x518] sm:$0xff]  ;;  %v187_v18 = vld [vmem:[%s8203_s0 + $0x528] sm:$0xff] }
 0x1b7   :  { %4948 = vtanh.f32 %v1380_v27  ;;  %v1013_v49 = vadd.f32 %v5558_v24, %v929_v22  ;;  %v1141_v52 = vmul.f32 %v1069_v32, %v5572_v29  ;;  %v1157_v53 = vmul.f32 %v1069_v32, %v5582_v33  ;;  %v237_v41 = vld [vmem:[%s8203_s0 + $0x6b8] sm:$0xff] }
 0x1b8   :  { %v1173_v61 = vadd.f32 %v1109_v12, %v965_v23  ;;  %v1189_v35 = vadd.f32 %v1125_v34, %v981_v43  ;;  %v1317_v63 = vmul.f32 %v1277_v39, %v5536_v16  ;;  %v1333_v60 = vmul.f32 %v1277_v39, %v5550_v21  ;;  %698 = vxpose.xlu0.b32.cont [5/16] (narrow) %v234_v57, 8  ;;  %v238_v34 = vld [vmem:[%s8203_s0 + $0x6c0] sm:$0xff]  ;;  %v188_v23 = vld [vmem:[%s8203_s0 + $0x530] sm:$0xff] }
 0x1b9   :  { %v1205_v2 = vadd.f32 %v1141_v52, %v997_v44  ;;  %v1221_v4 = vadd.f32 %v1157_v53, %v1013_v49  ;;  %v1349_v5 = vmul.f32 %v1277_v39, %v5598_v40  ;;  %v1365_v10 = vmul.f32 %v1277_v39, %v5610_v48  ;;  %600 = vxpose.xlu1.b32.cont [3/16] (narrow) %v184_v47, 8  ;;  %v239_v53 = vld [vmem:[%s8203_s0 + $0x6c8] sm:$0xff] }
 0x1ba   :  { %4950 = vtanh.f32 %v1396_v38  ;;  %v1381_v20 = vadd.f32 %v1317_v63, %v1173_v61  ;;  %v1397_v15 = vadd.f32 %v1333_v60, %v1189_v35  ;;  %v1428_v27 = vadd.f32 %v1364_v14, %v1220_v26  ;;  %v189_v63 = vld [vmem:[%s8203_s0 + $0x538] sm:$0xff]  ;;  %v192_v14 = vld [vmem:[%s8203_s0 + $0x550] sm:$0xff] }
 0x1bb   :  { %4952 = vtanh.f32 %v1412_v1  ;;  %v1413_v25 = vadd.f32 %v1349_v5, %v1205_v2  ;;  %v1429_v55 = vadd.f32 %v1365_v10, %v1221_v4  ;;  %v240_v2 = vld [vmem:[%s8203_s0 + $0x6d0] sm:$0xff]  ;;  %v190_v4 = vld [vmem:[%s8203_s0 + $0x540] sm:$0xff]  ;;  %v241_v5 = vld [vmem:[%s8203_s0 + $0x6d8] sm:$0xff] }
 0x1bc   :  { %4954 = vtanh.f32 %v1381_v20  ;;  %699 = vxpose.xlu0.b32.cont [6/16] (narrow) %v235_v11, 8  ;;  %v191_v10 = vld [vmem:[%s8203_s0 + $0x548] sm:$0xff]  ;;  %v242_v11 = vld [vmem:[%s8203_s0 + $0x6e0] sm:$0xff] }
 0x1bd   :  { %v4941_v31 = vpop.eup %4940  ;;  %4956 = vtanh.f32 %v1397_v15  ;;  %601 = vxpose.xlu1.b32.cont [4/16] (narrow) %v185_v17, 8  ;;  %v243_v20 = vld [vmem:[%s8203_s0 + $0x6e8] sm:$0xff]  ;;  %v193_v15 = vld [vmem:[%s8203_s0 + $0x558] sm:$0xff]  ;;  %v244_v17 = vld [vmem:[%s8203_s0 + $0x6f0] sm:$0xff] }
 0x1be   :  { %v4943_v32 = vpop.eup %4942  ;;  %4958 = vtanh.f32 %v1413_v25  ;;  %v194_v25 = vld [vmem:[%s8203_s0 + $0x560] sm:$0xff] }
 0x1bf   :  { %v6169_v38 = vpop.eup %4944  ;;  %4960 = vtanh.f32 %v1429_v55  ;;  %v4713_v1 = vpack.c.bf16 %v4943_v32, %v4941_v31  ;;  %v245_v55 = vld [vmem:[%s8203_s0 + $0x6f8] sm:$0xff]  ;;  %v214_v31 = vld [vmem:[%s8203_s0 + $0x600] sm:$0xff] }
 0x1c0   :  { %v6171_v26 = vpop.eup %4946  ;;  %4962 = vtanh.f32 %v1428_v27  ;;  %700 = vxpose.xlu0.b32.cont [7/16] (narrow) %v236_v19, 8  ;;  %v195_v27 = vld [vmem:[%s8203_s0 + $0x568] sm:$0xff]  ;;  %v196_v19 = vld [vmem:[%s8203_s0 + $0x570] sm:$0xff] }
 0x1c1   :  { %v4949_v39 = vpop.eup %4948  ;;  %4714 = vmatprep.subr.bf16.mxu0 %v4713_v1  ;;  %602 = vxpose.xlu1.b32.cont [5/16] (narrow) %v186_v37, 8  ;;  %v4717_v28 = vpack.c.bf16 %v6171_v26, %v6169_v38 }
 0x1c4   :  { %v4951_v22 = vpop.eup %4950  ;;  %701 = vxpose.xlu0.b32.cont [8/16] (narrow) %v237_v41, 8 }
 0x1c5   :  { %v4953_v12 = vpop.eup %4952  ;;  %603 = vxpose.xlu1.b32.cont [6/16] (narrow) %v187_v18, 8  ;;  %v4707_v52 = vpack.c.bf16 %v4951_v22, %v4949_v39  ;;  %v215_v18 = vld [vmem:[%s8203_s0 + $0x608] sm:$0xff] }
 0x1c6   :  { %v4955_v57 = vpop.eup %4954 }
 0x1c7   :  { %v4957_v43 = vpop.eup %4956 }
 0x1c8   :  { %v4959_v44 = vpop.eup %4958  ;;  %702 = vxpose.xlu0.b32.cont [9/16] (narrow) %v238_v34, 8  ;;  %v4705_v47 = vpack.c.bf16 %v4957_v43, %v4955_v57 }
 0x1c9   :  { %v4961_v49 = vpop.eup %4960  ;;  %604 = vxpose.xlu1.b32.cont [7/16] (narrow) %v188_v23, 8 }
 0x1ca   :  { %v4963_v61 = vpop.eup %4962  ;;  %4706 = vmatprep.subr.bf16.mxu1 %v4705_v47  ;;  %v4709_v35 = vpack.c.bf16 %v4961_v49, %v4959_v44 }
 0x1cb   :  { %4708 = vmatpush1.bf16.msra.mxu1 %v4707_v52  ;;  %v4711_v60 = vpack.c.bf16 %v4963_v61, %v4953_v12  ;;  %v197_v12 = vld [vmem:[%s8203_s0 + $0x578] sm:$0xff] }
 0x1cc   :  { %4710 = vmatprep.subr.bf16.mxu1 %v4709_v35  ;;  %703 = vxpose.xlu0.b32.cont [10/16] (narrow) %v239_v53, 8 }
 0x1cd   :  { %605 = vxpose.xlu1.b32.cont [8/16] (narrow) %v189_v63, 8 }
 0x1cf   :  { %4712 = vmatpush1.bf16.msra.mxu1 %v4711_v60 }
 0x1d0   :  { %704 = vxpose.xlu0.b32.cont [11/16] (narrow) %v240_v2, 8 }
 0x1d1   :  { %606 = vxpose.xlu1.b32.cont [9/16] (narrow) %v190_v4, 8  ;;  %v216_v4 = vld [vmem:[%s8203_s0 + $0x610] sm:$0xff] }
 0x1d2   :  { %4597 = vmatmul.mubr.msk.f32.vlgmr.msra.gmra.mrb[8].mxu1 %vm1526_vm0, %v5627_v58 }
 0x1d3   :  { %1872 = vmatprep.mubr.f32.mxu1 %v8206_v50 }
 0x1d4   :  { %705 = vxpose.xlu0.b32.cont [12/16] (narrow) %v241_v5, 8 }
 0x1d5   :  { %607 = vxpose.xlu1.b32.cont [10/16] (narrow) %v191_v10, 8 }
 0x1d6   :  { %4598 = vmatmul.mubr.msk.f32.gmra.mrb[10].mxu1 %vm1526_vm0, %v5642_v7 }
 0x1d7   :  { %1878 = vmatprep.mubr.f32.mxu1 %v8206_v50 }
 0x1d8   :  { %706 = vxpose.xlu0.b32.cont [13/16] (narrow) %v242_v11, 8 }
 0x1d9   :  { %608 = vxpose.xlu1.b32.cont [11/16] (narrow) %v192_v14, 8  ;;  %v262_v14 = vld [vmem:[%s8203_s0 + $0x780] sm:$0xff] }
 0x1da   :  { %4599 = vmatmul.mubr.msk.f32.gmra.mrb[12].mxu1 %vm1526_vm0, %v5590_v36 }
 0x1db   :  { %1884 = vmatprep.mubr.f32.mxu1 %v8206_v50 }
 0x1dc   :  { %707 = vxpose.xlu0.b32.cont [14/16] (narrow) %v243_v20, 8 }
 0x1dd   :  { %609 = vxpose.xlu1.b32.cont [12/16] (narrow) %v193_v15, 8 }
 0x1de   :  { %4600 = vmatmul.mubr.msk.f32.gmra.mrb[14].mxu1 %vm1526_vm0, %v5600_v42 }
 0x1df   :  { %2044 = vmatprep.mubr.f32.mxu1 %v8206_v50 }
 0x1e0   :  { %708 = vxpose.xlu0.b32.cont [15/16] (narrow) %v244_v17, 8 }
 0x1e1   :  { %610 = vxpose.xlu1.b32.cont [13/16] (narrow) %v194_v25, 8 }
 0x1e4   :  { %709 = vxpose.xlu0.b32.end [16/16] (narrow) %v245_v55, 8 }
 0x1e5   :  { %611 = vxpose.xlu1.b32.cont [14/16] (narrow) %v195_v27, 8 }
 0x1e7   :  { %v6247_v32 = vpop.f32.mrb[0].mxu0 }
 0x1e8   :  { %v6249_v37 = vpop.f32.mrb[1].mxu0  ;;  %662 = vxpose.xlu0.b32.start [1/16] (narrow) %v214_v31, 8  ;;  %v550_v1 = vpop.trf.xlu0 }
 0x1e9   :  { %v845_v39 = vrot.slane %v550_v1, %v5608_v46  ;;  %v1073_v41 = vrot.slane %v550_v1, %v5622_v56  ;;  %612 = vxpose.xlu1.b32.cont [15/16] (narrow) %v196_v19, 8  ;;  %v1281_v22 = vrot.slane %v550_v1, %v5634_v0 }
 0x1eb   :  { %v6260_v34 = vpop.f32.mrb[2].mxu0  ;;  %v882_v57 = vmul.f32 %v845_v39, %v5446_v45  ;;  %v898_v23 = vmul.f32 %v845_v39, %v5462_v51  ;;  %v914_v43 = vmul.f32 %v845_v39, %v5514_v6  ;;  %v930_v44 = vmul.f32 %v845_v39, %v5528_v13 }
 0x1ec   :  { %v1110_v47 = vmul.f32 %v1073_v41, %v5492_v62  ;;  %v1126_v49 = vmul.f32 %v1073_v41, %v5506_v3  ;;  %v1142_v52 = vmul.f32 %v1073_v41, %v5572_v29  ;;  %v1158_v53 = vmul.f32 %v1073_v41, %v5582_v33  ;;  %v6270_v61 = vpop.f32.mrb[3].mxu0  ;;  %663 = vxpose.xlu0.b32.cont [2/16] (narrow) %v215_v18, 8  ;;  %v217_v18 = vld [vmem:[%s8203_s0 + $0x618] sm:$0xff] }
 0x1ed   :  { %v966_v35 = vadd.f32 %v5470_v54, %v882_v57  ;;  %v982_v63 = vadd.f32 %v5484_v59, %v898_v23  ;;  %v998_v60 = vadd.f32 %v5574_v30, %v914_v43  ;;  %v1014_v2 = vadd.f32 %v5558_v24, %v930_v44  ;;  %613 = vxpose.xlu1.b32.end [16/16] (narrow) %v197_v12, 8 }
 0x1ee   :  { %v1318_v5 = vmul.f32 %v1281_v22, %v5536_v16  ;;  %v1334_v10 = vmul.f32 %v1281_v22, %v5550_v21  ;;  %v1350_v11 = vmul.f32 %v1281_v22, %v5598_v40  ;;  %v1366_v27 = vmul.f32 %v1281_v22, %v5610_v48  ;;  %v263_v22 = vld [vmem:[%s8203_s0 + $0x788] sm:$0xff] }
 0x1ef   :  { %v1174_v20 = vadd.f32 %v1110_v47, %v966_v35  ;;  %v1190_v15 = vadd.f32 %v1126_v49, %v982_v63  ;;  %v1206_v17 = vadd.f32 %v1142_v52, %v998_v60  ;;  %v1222_v25 = vadd.f32 %v1158_v53, %v1014_v2  ;;  %v6285_v55 = vpop.f32.mrb[4].mxu0  ;;  %v218_v2 = vld [vmem:[%s8203_s0 + $0x620] sm:$0xff] }
 0x1f0   :  { %8213 = vst [vmem:[#allocation2_spill] sm:$0xff] %v6285_v55  ;;  %v6288_v31 = vpop.f32.mrb[5].mxu0  ;;  %664 = vxpose.xlu0.b32.cont [3/16] (narrow) %v216_v4, 8 }
 0x1f1   :  { %8214 = vst [vmem:[#allocation3_spill] sm:$0xff] %v6288_v31  ;;  %v1382_v19 = vadd.f32 %v1318_v5, %v1174_v20  ;;  %v1398_v1 = vadd.f32 %v1334_v10, %v1190_v15  ;;  %v1414_v39 = vadd.f32 %v1350_v11, %v1206_v17  ;;  %758 = vxpose.xlu1.b32.start [1/16] (narrow) %v262_v14, 8  ;;  %v646_v41 = vpop.trf.xlu1  ;;  %v264_v11 = vld [vmem:[%s8203_s0 + $0x790] sm:$0xff] }
 0x1f2   :  { %v1430_v12 = vadd.f32 %v1366_v27, %v1222_v25  ;;  %v857_v57 = vrot.slane %v646_v41, %v5608_v46  ;;  %v1085_v23 = vrot.slane %v646_v41, %v5622_v56  ;;  %v1293_v44 = vrot.slane %v646_v41, %v5634_v0 }
 0x1f3   :  { %4964 = vtanh.f32 %v1382_v19  ;;  %v6298_v43 = vpop.f32.mrb[6].mxu0 }
 0x1f4   :  { %8215 = vst [vmem:[#allocation4_spill] sm:$0xff] %v6298_v43  ;;  %4966 = vtanh.f32 %v1398_v1  ;;  %v885_v47 = vmul.f32 %v857_v57, %v5446_v45  ;;  %v901_v49 = vmul.f32 %v857_v57, %v5462_v51  ;;  %v917_v52 = vmul.f32 %v857_v57, %v5514_v6  ;;  %v6304_v53 = vpop.f32.mrb[7].mxu0  ;;  %665 = vxpose.xlu0.b32.cont [4/16] (narrow) %v217_v18, 8 }
 0x1f5   :  { %8216 = vst [vmem:[#allocation5_spill] sm:$0xff] %v6304_v53  ;;  %4968 = vtanh.f32 %v1414_v39  ;;  %v933_v35 = vmul.f32 %v857_v57, %v5528_v13  ;;  %v1113_v63 = vmul.f32 %v1085_v23, %v5492_v62  ;;  %v1129_v60 = vmul.f32 %v1085_v23, %v5506_v3  ;;  %759 = vxpose.xlu1.b32.cont [2/16] (narrow) %v263_v22, 8  ;;  %v265_v22 = vld [vmem:[%s8203_s0 + $0x798] sm:$0xff] }
 0x1f6   :  { %4970 = vtanh.f32 %v1430_v12  ;;  %v969_v4 = vadd.f32 %v5470_v54, %v885_v47  ;;  %v985_v5 = vadd.f32 %v5484_v59, %v901_v49  ;;  %v1001_v10 = vadd.f32 %v5574_v30, %v917_v52  ;;  %v219_v12 = vld [vmem:[%s8203_s0 + $0x628] sm:$0xff] }
 0x1f7   :  { %v1017_v14 = vadd.f32 %v5558_v24, %v933_v35  ;;  %v1145_v20 = vmul.f32 %v1085_v23, %v5572_v29  ;;  %v1161_v15 = vmul.f32 %v1085_v23, %v5582_v33  ;;  %v1321_v27 = vmul.f32 %v1293_v44, %v5536_v16 }
 0x1f8   :  { %v1177_v17 = vadd.f32 %v1113_v63, %v969_v4  ;;  %v1193_v25 = vadd.f32 %v1129_v60, %v985_v5  ;;  %v1337_v19 = vmul.f32 %v1293_v44, %v5550_v21  ;;  %666 = vxpose.xlu0.b32.cont [5/16] (narrow) %v218_v2, 8  ;;  %v1353_v41 = vmul.f32 %v1293_v44, %v5598_v40  ;;  %v266_v63 = vld [vmem:[%s8203_s0 + $0x7a0] sm:$0xff]  ;;  %v221_v5 = vld [vmem:[%s8203_s0 + $0x638] sm:$0xff] }
 0x1f9   :  { %v1209_v1 = vadd.f32 %v1145_v20, %v1001_v10  ;;  %v1225_v39 = vadd.f32 %v1161_v15, %v1017_v14  ;;  %v1369_v18 = vmul.f32 %v1293_v44, %v5610_v48  ;;  %760 = vxpose.xlu1.b32.cont [3/16] (narrow) %v264_v11, 8  ;;  %v220_v44 = vld [vmem:[%s8203_s0 + $0x630] sm:$0xff]  ;;  %v267_v10 = vld [vmem:[%s8203_s0 + $0x7a8] sm:$0xff]  ;;  %v222_v14 = vld [vmem:[%s8203_s0 + $0x640] sm:$0xff] }
 0x1fa   :  { %v1385_v57 = vadd.f32 %v1321_v27, %v1177_v17  ;;  %v1401_v23 = vadd.f32 %v1337_v19, %v1193_v25  ;;  %v268_v15 = vld [vmem:[%s8203_s0 + $0x7b0] sm:$0xff]  ;;  %v223_v25 = vld [vmem:[%s8203_s0 + $0x648] sm:$0xff]  ;;  %v269_v27 = vld [vmem:[%s8203_s0 + $0x7b8] sm:$0xff] }
 0x1fb   :  { %v1417_v47 = vadd.f32 %v1353_v41, %v1209_v1  ;;  %v1433_v49 = vadd.f32 %v1369_v18, %v1225_v39  ;;  %v224_v1 = vld [vmem:[%s8203_s0 + $0x650] sm:$0xff]  ;;  %v270_v39 = vld [vmem:[%s8203_s0 + $0x7c0] sm:$0xff]  ;;  %v225_v41 = vld [vmem:[%s8203_s0 + $0x658] sm:$0xff] }
 0x1fc   :  { %4972 = vtanh.f32 %v1385_v57  ;;  %667 = vxpose.xlu0.b32.cont [6/16] (narrow) %v219_v12, 8  ;;  %v271_v18 = vld [vmem:[%s8203_s0 + $0x7c8] sm:$0xff]  ;;  %v226_v12 = vld [vmem:[%s8203_s0 + $0x660] sm:$0xff]  ;;  %v272_v57 = vld [vmem:[%s8203_s0 + $0x7d0] sm:$0xff] }
 0x1fd   :  { %v4965_v52 = vpop.eup %4964  ;;  %4974 = vtanh.f32 %v1401_v23  ;;  %761 = vxpose.xlu1.b32.cont [4/16] (narrow) %v265_v22, 8  ;;  %v227_v23 = vld [vmem:[%s8203_s0 + $0x668] sm:$0xff]  ;;  %v273_v22 = vld [vmem:[%s8203_s0 + $0x7d8] sm:$0xff] }
 0x1fe   :  { %v4967_v35 = vpop.eup %4966  ;;  %4976 = vtanh.f32 %v1417_v47  ;;  %v228_v47 = vld [vmem:[%s8203_s0 + $0x670] sm:$0xff] }
 0x1ff   :  { %v4969_v60 = vpop.eup %4968  ;;  %4978 = vtanh.f32 %v1433_v49  ;;  %v4715_v2 = vpack.c.bf16 %v4967_v35, %v4965_v52  ;;  %v274_v49 = vld [vmem:[%s8203_s0 + $0x7e0] sm:$0xff]  ;;  %v229_v52 = vld [vmem:[%s8203_s0 + $0x678] sm:$0xff]  ;;  %v276_v35 = vld [vmem:[%s8203_s0 + $0x7f0] sm:$0xff] }
 0x200   :  { %v4971_v4 = vpop.eup %4970  ;;  %668 = vxpose.xlu0.b32.cont [7/16] (narrow) %v220_v44, 8  ;;  %v275_v44 = vld [vmem:[%s8203_s0 + $0x7e8] sm:$0xff] }
 0x201   :  { %4716 = vmatpush1.bf16.msra.mxu0 %v4715_v2  ;;  %762 = vxpose.xlu1.b32.cont [5/16] (narrow) %v266_v63, 8  ;;  %v4719_v11 = vpack.c.bf16 %v4971_v4, %v4969_v60 }
 0x202   :  { %4718 = vmatprep.subr.bf16.mxu0 %v4717_v28 }
 0x204   :  { %669 = vxpose.xlu0.b32.cont [8/16] (narrow) %v221_v5, 8 }
 0x205   :  { %4720 = vmatpush1.bf16.msra.mxu0 %v4719_v11  ;;  %763 = vxpose.xlu1.b32.cont [6/16] (narrow) %v267_v10, 8  ;;  %v277_v11 = vld [vmem:[%s8203_s0 + $0x7f8] sm:$0xff] }
 0x206   :  { %v4973_v20 = vpop.eup %4972 }
 0x207   :  { %v4975_v17 = vpop.eup %4974 }
 0x208   :  { %v6352_v38 = vpop.eup %4976  ;;  %4601 = vmatmul.mubr.msk.f32.vlgmr.msra.gmra.mrb[16].mxu0 %vm1526_vm0, %v5627_v58  ;;  %670 = vxpose.xlu0.b32.cont [9/16] (narrow) %v222_v14, 8  ;;  %v4721_v26 = vpack.c.bf16 %v4975_v17, %v4973_v20 }
 0x209   :  { %v6356_v28 = vpop.eup %4978  ;;  %764 = vxpose.xlu1.b32.cont [7/16] (narrow) %v268_v15, 8  ;;  %1961 = vmatprep.mubr.f32.mxu0 %v8206_v50 }
 0x20a   :  { %4722 = vmatprep.subr.bf16.mxu1 %v4721_v26  ;;  %v4725_v19 = vpack.c.bf16 %v6356_v28, %v6352_v38  ;;  %v5277_v38 = vld [vmem:[%s8201_s2 + $0x8] sm:$0xff]  ;;  %v8223_v28 = vmov 0.0  }
 0x20c   :  { %4602 = vmatmul.mubr.msk.f32.gmra.mrb[18].mxu0 %vm1526_vm0, %v5642_v7  ;;  %671 = vxpose.xlu0.b32.cont [10/16] (narrow) %v223_v25, 8 }
 0x20d   :  { %765 = vxpose.xlu1.b32.cont [8/16] (narrow) %v269_v27, 8  ;;  %1967 = vmatprep.mubr.f32.mxu0 %v8206_v50 }
 0x210   :  { %4603 = vmatmul.mubr.msk.f32.gmra.mrb[20].mxu0 %vm1526_vm0, %v5590_v36  ;;  %672 = vxpose.xlu0.b32.cont [11/16] (narrow) %v224_v1, 8 }
 0x211   :  { %766 = vxpose.xlu1.b32.cont [9/16] (narrow) %v270_v39, 8  ;;  %1973 = vmatprep.mubr.f32.mxu0 %v8206_v50 }
 0x214   :  { %4604 = vmatmul.mubr.msk.f32.gmra.mrb[22].mxu0 %vm1526_vm0, %v5600_v42  ;;  %673 = vxpose.xlu0.b32.cont [12/16] (narrow) %v225_v41, 8 }
 0x215   :  { %767 = vxpose.xlu1.b32.cont [10/16] (narrow) %v271_v18, 8  ;;  %2133 = vmatprep.mubr.f32.mxu0 %v8206_v50 }
 0x218   :  { %674 = vxpose.xlu0.b32.cont [13/16] (narrow) %v226_v12, 8 }
 0x219   :  { %768 = vxpose.xlu1.b32.cont [11/16] (narrow) %v272_v57, 8 }
 0x21c   :  { %675 = vxpose.xlu0.b32.cont [14/16] (narrow) %v227_v23, 8 }
 0x21d   :  { %769 = vxpose.xlu1.b32.cont [12/16] (narrow) %v273_v22, 8 }
 0x220   :  { %676 = vxpose.xlu0.b32.cont [15/16] (narrow) %v228_v47, 8 }
 0x221   :  { %770 = vxpose.xlu1.b32.cont [13/16] (narrow) %v274_v49, 8 }
 0x224   :  { %677 = vxpose.xlu0.b32.end [16/16] (narrow) %v229_v52, 8 }
 0x225   :  { %771 = vxpose.xlu1.b32.cont [14/16] (narrow) %v275_v44, 8  ;;  %v246_v44 = vld [vmem:[%s8203_s0 + $0x700] sm:$0xff] }
 0x227   :  { %v6415_v63 = vpop.f32.mrb[0].mxu1 }
 0x228   :  { %v6417_v60 = vpop.f32.mrb[1].mxu1  ;;  %v710_v2 = vpop.trf.xlu0 }
 0x229   :  { %v865_v4 = vrot.slane %v710_v2, %v5608_v46  ;;  %v1093_v5 = vrot.slane %v710_v2, %v5622_v56  ;;  %772 = vxpose.xlu1.b32.cont [15/16] (narrow) %v276_v35, 8  ;;  %v1301_v10 = vrot.slane %v710_v2, %v5634_v0 }
 0x22b   :  { %v6425_v14 = vpop.f32.mrb[2].mxu1  ;;  %v887_v20 = vmul.f32 %v865_v4, %v5446_v45  ;;  %v903_v15 = vmul.f32 %v865_v4, %v5462_v51  ;;  %v919_v17 = vmul.f32 %v865_v4, %v5514_v6  ;;  %v935_v26 = vmul.f32 %v865_v4, %v5528_v13 }
 0x22c   :  { %v1115_v25 = vmul.f32 %v1093_v5, %v5492_v62  ;;  %v1131_v27 = vmul.f32 %v1093_v5, %v5506_v3  ;;  %v1147_v1 = vmul.f32 %v1093_v5, %v5572_v29  ;;  %v1163_v39 = vmul.f32 %v1093_v5, %v5582_v33  ;;  %v6435_v41 = vpop.f32.mrb[3].mxu1 }
 0x22d   :  { %v971_v18 = vadd.f32 %v5470_v54, %v887_v20  ;;  %v987_v12 = vadd.f32 %v5484_v59, %v903_v15  ;;  %v1003_v57 = vadd.f32 %v5574_v30, %v919_v17  ;;  %v1019_v23 = vadd.f32 %v5558_v24, %v935_v26  ;;  %773 = vxpose.xlu1.b32.end [16/16] (narrow) %v277_v11, 8 }
 0x22e   :  { %v1323_v22 = vmul.f32 %v1301_v10, %v5536_v16  ;;  %v1339_v47 = vmul.f32 %v1301_v10, %v5550_v21  ;;  %v1355_v49 = vmul.f32 %v1301_v10, %v5598_v40  ;;  %v1371_v52 = vmul.f32 %v1301_v10, %v5610_v48 }
 0x22f   :  { %v1179_v35 = vadd.f32 %v1115_v25, %v971_v18  ;;  %v1195_v2 = vadd.f32 %v1131_v27, %v987_v12  ;;  %v1211_v4 = vadd.f32 %v1147_v1, %v1003_v57  ;;  %v1227_v5 = vadd.f32 %v1163_v39, %v1019_v23  ;;  %v6448_v20 = vpop.f32.mrb[4].mxu1  ;;  %v247_v25 = vld [vmem:[%s8203_s0 + $0x708] sm:$0xff] }
 0x230   :  { %8217 = vst [vmem:[#allocation6_spill] sm:$0xff] %v6448_v20  ;;  %v6450_v15 = vpop.f32.mrb[5].mxu1 }
 0x231   :  { %8218 = vst [vmem:[#allocation7_spill] sm:$0xff] %v6450_v15  ;;  %v1387_v11 = vadd.f32 %v1323_v22, %v1179_v35  ;;  %v1403_v17 = vadd.f32 %v1339_v47, %v1195_v2  ;;  %v1419_v26 = vadd.f32 %v1355_v49, %v1211_v4  ;;  %v1435_v9 = vadd.f32 %v1371_v52, %v1227_v5  ;;  %v614_v50 = vpop.trf.xlu1 }
 0x232   :  { %726 = vxpose.xlu1.b32.start [1/16] (narrow) %v246_v44, 8  ;;  %v853_v10 = vrot.slane %v614_v50, %v5608_v46  ;;  %v1081_v8 = vrot.slane %v614_v50, %v5622_v56  ;;  %v1289_v1 = vrot.slane %v614_v50, %v5634_v0  ;;  %v248_v44 = vld [vmem:[%s8203_s0 + $0x710] sm:$0xff] }
 0x233   :  { %4980 = vtanh.f32 %v1387_v11  ;;  %v6457_v27 = vpop.f32.mrb[6].mxu1 }
 0x234   :  { %8219 = vst [vmem:[#allocation8_spill] sm:$0xff] %v6457_v27  ;;  %4982 = vtanh.f32 %v1403_v17  ;;  %v884_v39 = vmul.f32 %v853_v10, %v5446_v45  ;;  %v900_v18 = vmul.f32 %v853_v10, %v5462_v51  ;;  %v916_v12 = vmul.f32 %v853_v10, %v5514_v6  ;;  %v6463_v57 = vpop.f32.mrb[7].mxu1 }
 0x235   :  { %8220 = vst [vmem:[#allocation9_spill] sm:$0xff] %v6463_v57  ;;  %4984 = vtanh.f32 %v1419_v26  ;;  %v932_v23 = vmul.f32 %v853_v10, %v5528_v13  ;;  %v1112_v22 = vmul.f32 %v1081_v8, %v5492_v62  ;;  %v1128_v47 = vmul.f32 %v1081_v8, %v5506_v3 }
 0x236   :  { %727 = vxpose.xlu1.b32.cont [2/16] (narrow) %v247_v25, 8  ;;  %4986 = vtanh.f32 %v1435_v9  ;;  %v968_v50 = vadd.f32 %v5470_v54, %v884_v39  ;;  %v984_v49 = vadd.f32 %v5484_v59, %v900_v18  ;;  %v1000_v52 = vadd.f32 %v5574_v30, %v916_v12 }
 0x237   :  { %v1016_v35 = vadd.f32 %v5558_v24, %v932_v23  ;;  %v1144_v2 = vmul.f32 %v1081_v8, %v5572_v29  ;;  %v1160_v4 = vmul.f32 %v1081_v8, %v5582_v33  ;;  %v1320_v9 = vmul.f32 %v1289_v1, %v5536_v16  ;;  %v249_v23 = vld [vmem:[%s8203_s0 + $0x718] sm:$0xff] }
 0x238   :  { %v1176_v5 = vadd.f32 %v1112_v22, %v968_v50  ;;  %v1192_v11 = vadd.f32 %v1128_v47, %v984_v49  ;;  %v1336_v17 = vmul.f32 %v1289_v1, %v5550_v21  ;;  %v1352_v25 = vmul.f32 %v1289_v1, %v5598_v40  ;;  %v250_v49 = vld [vmem:[%s8203_s0 + $0x720] sm:$0xff] }
 0x239   :  { %v1208_v26 = vadd.f32 %v1144_v2, %v1000_v52  ;;  %v1224_v10 = vadd.f32 %v1160_v4, %v1016_v35  ;;  %v1368_v39 = vmul.f32 %v1289_v1, %v5610_v48  ;;  %v251_v2 = vld [vmem:[%s8203_s0 + $0x728] sm:$0xff] }
 0x23a   :  { %728 = vxpose.xlu1.b32.cont [3/16] (narrow) %v248_v44, 8  ;;  %v1384_v18 = vadd.f32 %v1320_v9, %v1176_v5  ;;  %v1400_v12 = vadd.f32 %v1336_v17, %v1192_v11  ;;  %v252_v5 = vld [vmem:[%s8203_s0 + $0x730] sm:$0xff] }
 0x23b   :  { %v1416_v8 = vadd.f32 %v1352_v25, %v1208_v26  ;;  %v1432_v22 = vadd.f32 %v1368_v39, %v1224_v10  ;;  %v253_v10 = vld [vmem:[%s8203_s0 + $0x738] sm:$0xff]  ;;  %v8221_v39 = vmov 1  }
 0x23c   :  { %4988 = vtanh.f32 %v1384_v18  ;;  %v6509_v18 = vld [vmem:[%s8201_s2] sm:$0xff] }
 0x23d   :  { %v4981_v47 = vpop.eup %4980  ;;  %4990 = vtanh.f32 %v1400_v12  ;;  %8222 = vst [vmem:[#allocation10_spill] sm:$0xff] %v6509_v18  ;;  %v254_v12 = vld [vmem:[%s8203_s0 + $0x740] sm:$0xff] }
 0x23e   :  { %729 = vxpose.xlu1.b32.cont [4/16] (narrow) %v249_v23, 8  ;;  %v4983_v50 = vpop.eup %4982  ;;  %4992 = vtanh.f32 %v1416_v8  ;;  %v6529_v23 = vld [vmem:[%s8201_s2 + $0x10] sm:$0xff] }
 0x23f   :  { %v6487_v1 = vpop.eup %4984  ;;  %4994 = vtanh.f32 %v1432_v22  ;;  %v4729_v52 = vpack.c.bf16 %v4983_v50, %v4981_v47  ;;  %v256_v8 = vld [vmem:[%s8203_s0 + $0x750] sm:$0xff]  ;;  %v6541_v22 = vld [vmem:[%s8201_s2 + $0x18] sm:$0xff]  ;;  %v258_v50 = vld [vmem:[%s8203_s0 + $0x760] sm:$0xff]  ;;  %s5289_s2 = smov 64  }
 0x240   :  { %v6489_v44 = vpop.eup %4986  ;;  %v257_v47 = vld [vmem:[%s8203_s0 + $0x758] sm:$0xff] }
 0x241   :  { %4730 = vmatprep.subr.bf16.mxu0 %v4729_v52  ;;  %v8225_v52 = vmov 2  }
 0x242   :  { %730 = vxpose.xlu1.b32.cont [5/16] (narrow) %v250_v49, 8  ;;  %v6556_v49 = vld [vmem:[%s8202_s1] sm:$0xff] }
 0x243   :  { %8224 = vst [vmem:[#allocation11_spill] sm:$0xff] %v6556_v49 }
 0x246   :  { %731 = vxpose.xlu1.b32.cont [6/16] (narrow) %v251_v2, 8  ;;  %v4989_v4 = vpop.eup %4988  ;;  %v259_v2 = vld [vmem:[%s8203_s0 + $0x768] sm:$0xff] }
 0x247   :  { %v4991_v11 = vpop.eup %4990 }
 0x248   :  { %v4993_v9 = vpop.eup %4992  ;;  %v4723_v17 = vpack.c.bf16 %v4991_v11, %v4989_v4  ;;  %v6568_v4 = vld [vmem:[%s8202_s1 + $0x10] sm:$0xff] }
 0x249   :  { %v4995_v26 = vpop.eup %4994  ;;  %8226 = vst [vmem:[#allocation12_spill] sm:$0xff] %v6568_v4 }
 0x24a   :  { %732 = vxpose.xlu1.b32.cont [7/16] (narrow) %v252_v5, 8  ;;  %4724 = vmatpush1.bf16.msra.mxu1 %v4723_v17  ;;  %v4727_v25 = vpack.c.bf16 %v4995_v26, %v4993_v9  ;;  %v260_v9 = vld [vmem:[%s8203_s0 + $0x770] sm:$0xff]  ;;  %v6582_v17 = vld [vmem:[%s8202_s1 + $0x18] sm:$0xff] }
 0x24b   :  { %4726 = vmatprep.subr.bf16.mxu1 %v4725_v19  ;;  %v255_v19 = vld [vmem:[%s8203_s0 + $0x748] sm:$0xff]  ;;  %8229 = vst [vmem:[#allocation15_spill] sm:$0xff] %v6582_v17 }
 0x24d   :  { %4889 = vset.pattern.permute.xlu0 %v8221_v39 }
 0x24e   :  { %733 = vxpose.xlu1.b32.cont [8/16] (narrow) %v253_v10, 8  ;;  %4728 = vmatpush1.bf16.msra.mxu1 %v4727_v25 }
 0x24f   :  { %1503 = vperm.xlu0 %4889, %v6509_v18  }
 0x251   :  { %4605 = vmatmul.mubr.msk.f32.vlgmr.msra.gmra.mrb[16].mxu1 %vm1526_vm0, %v5627_v58 }
 0x252   :  { %734 = vxpose.xlu1.b32.cont [9/16] (narrow) %v254_v12, 8  ;;  %2050 = vmatprep.mubr.f32.mxu1 %v8223_v28 }
 0x253   :  { %1507 = vperm.xlu0 %4889, %v5277_v38  }
 0x255   :  { %4606 = vmatmul.mubr.msk.f32.gmra.mrb[18].mxu1 %vm1526_vm0, %v5642_v7 }
 0x256   :  { %735 = vxpose.xlu1.b32.cont [10/16] (narrow) %v255_v19, 8  ;;  %2056 = vmatprep.mubr.f32.mxu1 %v8223_v28 }
 0x257   :  { %1511 = vperm.xlu0 %4889, %v6529_v23  }
 0x259   :  { %4607 = vmatmul.mubr.msk.f32.gmra.mrb[20].mxu1 %vm1526_vm0, %v5590_v36 }
 0x25a   :  { %736 = vxpose.xlu1.b32.cont [11/16] (narrow) %v256_v8, 8  ;;  %2062 = vmatprep.mubr.f32.mxu1 %v8223_v28  ;;  %v261_v8 = vld [vmem:[%s8203_s0 + $0x778] sm:$0xff] }
 0x25b   :  { %1515 = vperm.xlu0 %4889, %v6541_v22  }
 0x25d   :  { %4608 = vmatmul.mubr.msk.f32.gmra.mrb[22].mxu1 %vm1526_vm0, %v5600_v42 }
 0x25e   :  { %737 = vxpose.xlu1.b32.cont [12/16] (narrow) %v257_v47, 8  ;;  %2222 = vmatprep.mubr.f32.mxu1 %v8223_v28 }
 0x25f   :  { %2327 = vrot.lane.b32.xlu0 %v6556_v49, %s5289_s2 }
 0x260   :  { %4890 = vset.pattern.permute.xlu0 %v8225_v52 }
 0x262   :  { %738 = vxpose.xlu1.b32.cont [13/16] (narrow) %v258_v50, 8 }
 0x263   :  { %2331 = vrot.lane.b32.xlu0 %v6568_v4, %s5289_s2 }
 0x265   :  { %v6572_v5 = vpop.f32.mrb[8].mxu0 }
 0x266   :  { %8227 = vst [vmem:[#allocation13_spill] sm:$0xff] %v6572_v5  ;;  %739 = vxpose.xlu1.b32.cont [14/16] (narrow) %v259_v2, 8  ;;  %v6574_v11 = vpop.f32.mrb[9].mxu0 }
 0x267   :  { %8228 = vst [vmem:[#allocation14_spill] sm:$0xff] %v6574_v11  ;;  %2333 = vrot.lane.b32.xlu0 %v6582_v17, %s5289_s2 }
 0x268   :  { %v678_v26 = vpop.trf.xlu0 }
 0x269   :  { %v6586_v10 = vpop.f32.mrb[10].mxu0  ;;  %v861_v25 = vrot.slane %v678_v26, %v5608_v46  ;;  %v1089_v39 = vrot.slane %v678_v26, %v5622_v56  ;;  %v1297_v12 = vrot.slane %v678_v26, %v5634_v0 }
 0x26a   :  { %8230 = vst [vmem:[#allocation16_spill] sm:$0xff] %v6586_v10  ;;  %740 = vxpose.xlu1.b32.cont [15/16] (narrow) %v260_v9, 8  ;;  %v6591_v19 = vpop.f32.mrb[11].mxu0 }
 0x26b   :  { %8231 = vst [vmem:[#allocation17_spill] sm:$0xff] %v6591_v19  ;;  %2312 = vperm.xlu0 %4890, %v6509_v18   ;;  %v886_v47 = vmul.f32 %v861_v25, %v5446_v45  ;;  %v902_v50 = vmul.f32 %v861_v25, %v5462_v51  ;;  %v918_v52 = vmul.f32 %v861_v25, %v5514_v6 }
 0x26c   :  { %v934_v2 = vmul.f32 %v861_v25, %v5528_v13  ;;  %v1114_v9 = vmul.f32 %v1089_v39, %v5492_v62  ;;  %v1130_v26 = vmul.f32 %v1089_v39, %v5506_v3  ;;  %v1146_v35 = vmul.f32 %v1089_v39, %v5572_v29 }
 0x26d   :  { %v1162_v17 = vmul.f32 %v1089_v39, %v5582_v33  ;;  %v970_v4 = vadd.f32 %v5470_v54, %v886_v47  ;;  %v986_v49 = vadd.f32 %v5484_v59, %v902_v50  ;;  %v1002_v18 = vadd.f32 %v5574_v30, %v918_v52  ;;  %v6609_v5 = vpop.f32.mrb[12].mxu0 }
 0x26e   :  { %v1018_v10 = vadd.f32 %v5558_v24, %v934_v2  ;;  %8232 = vst [vmem:[#allocation18_spill] sm:$0xff] %v6609_v5  ;;  %741 = vxpose.xlu1.b32.end [16/16] (narrow) %v261_v8, 8  ;;  %v1322_v25 = vmul.f32 %v1297_v12, %v5536_v16  ;;  %v1338_v19 = vmul.f32 %v1297_v12, %v5550_v21  ;;  %v6614_v27 = vpop.f32.mrb[13].mxu0 }
 0x26f   :  { %v1354_v11 = vmul.f32 %v1297_v12, %v5598_v40  ;;  %2316 = vperm.xlu0 %4890, %v5277_v38   ;;  %v1178_v39 = vadd.f32 %v1114_v9, %v970_v4  ;;  %v1194_v47 = vadd.f32 %v1130_v26, %v986_v49  ;;  %v1210_v43 = vadd.f32 %v1146_v35, %v1002_v18 }
 0x270   :  { %v1226_v50 = vadd.f32 %v1162_v17, %v1018_v10  ;;  %v1370_v52 = vmul.f32 %v1297_v12, %v5610_v48 }
 0x271   :  { %v1386_v57 = vadd.f32 %v1322_v25, %v1178_v39  ;;  %v1402_v2 = vadd.f32 %v1338_v19, %v1194_v47  ;;  %v1418_v53 = vadd.f32 %v1354_v11, %v1210_v43  ;;  %v6617_v5 = vpop.f32.mrb[14].mxu0  ;;  %v774_v8 = vpop.trf.xlu1 }
 0x272   :  { %v1434_v20 = vadd.f32 %v1370_v52, %v1226_v50  ;;  %v873_v55 = vrot.slane %v774_v8, %v5608_v46  ;;  %v1101_v15 = vrot.slane %v774_v8, %v5622_v56  ;;  %v6621_v31 = vpop.f32.mrb[15].mxu0  ;;  %v1309_v35 = vrot.slane %v774_v8, %v5634_v0 }
 0x273   :  { %2320 = vperm.xlu0 %4890, %v6529_v23   ;;  %4996 = vtanh.f32 %v1386_v57 }
 0x274   :  { %4998 = vtanh.f32 %v1402_v2  ;;  %v889_v18 = vmul.f32 %v873_v55, %v5446_v45  ;;  %v905_v43 = vmul.f32 %v873_v55, %v5462_v51  ;;  %v921_v38 = vmul.f32 %v873_v55, %v5514_v6 }
 0x275   :  { %5000 = vtanh.f32 %v1418_v53  ;;  %v937_v49 = vmul.f32 %v873_v55, %v5528_v13  ;;  %v1117_v4 = vmul.f32 %v1101_v15, %v5492_v62  ;;  %v1133_v11 = vmul.f32 %v1101_v15, %v5506_v3 }
 0x276   :  { %5002 = vtanh.f32 %v1434_v20  ;;  %v973_v23 = vadd.f32 %v5470_v54, %v889_v18  ;;  %v989_v57 = vadd.f32 %v5484_v59, %v905_v43  ;;  %v1005_v17 = vadd.f32 %v5574_v30, %v921_v38 }
 0x277   :  { %2324 = vperm.xlu0 %4890, %v6541_v22   ;;  %v1021_v10 = vadd.f32 %v5558_v24, %v937_v49  ;;  %v1149_v12 = vmul.f32 %v1101_v15, %v5572_v29  ;;  %v1165_v53 = vmul.f32 %v1101_v15, %v5582_v33  ;;  %v1325_v9 = vmul.f32 %v1309_v35, %v5536_v16 }
 0x278   :  { %v1181_v55 = vadd.f32 %v1117_v4, %v973_v23  ;;  %v1197_v19 = vadd.f32 %v1133_v11, %v989_v57  ;;  %v1341_v20 = vmul.f32 %v1309_v35, %v5550_v21  ;;  %v1357_v39 = vmul.f32 %v1309_v35, %v5598_v40 }
 0x279   :  { %v1213_v26 = vadd.f32 %v1149_v12, %v1005_v17  ;;  %v1229_v25 = vadd.f32 %v1165_v53, %v1021_v10  ;;  %v1373_v47 = vmul.f32 %v1309_v35, %v5610_v48  ;;  %v8233_v49 = vpack.c.bf16 %v6489_v44, %v6487_v1  ;;  %v6651_v12 = vld [vmem:[%s8202_s1 + $0x8] sm:$0xff]  ;;  %s5291_s1 = smov 32  }
 0x27a   :  { %v1389_v50 = vadd.f32 %v1325_v9, %v1181_v55  ;;  %v1405_v22 = vadd.f32 %v1341_v20, %v1197_v19 }
 0x27b   :  { %v1421_v52 = vadd.f32 %v1357_v39, %v1213_v26  ;;  %v1437_v2 = vadd.f32 %v1373_v47, %v1229_v25 }
 0x27c   :  { %5004 = vtanh.f32 %v1389_v50 }
 0x27d   :  { %v4997_v8 = vpop.eup %4996  ;;  %5006 = vtanh.f32 %v1405_v22 }
 0x27e   :  { %v4999_v15 = vpop.eup %4998  ;;  %5008 = vtanh.f32 %v1421_v52 }
 0x27f   :  { %v5001_v18 = vpop.eup %5000  ;;  %5010 = vtanh.f32 %v1437_v2  ;;  %v4731_v43 = vpack.c.bf16 %v4999_v15, %v4997_v8 }
 0x280   :  { %v5003_v38 = vpop.eup %5002 }
 0x281   :  { %4732 = vmatpush1.bf16.msra.mxu0 %v4731_v43  ;;  %v4735_v4 = vpack.c.bf16 %v5003_v38, %v5001_v18 }
 0x282   :  { %4734 = vmatprep.subr.bf16.mxu0 %v8233_v49 }
 0x285   :  { %4736 = vmatpush1.bf16.msra.mxu0 %v4735_v4 }
 0x286   :  { %v5005_v35 = vpop.eup %5004 }
 0x287   :  { %v5007_v11 = vpop.eup %5006 }
 0x288   :  { %v5009_v23 = vpop.eup %5008  ;;  %4609 = vmatmul.mubr.msk.f32.vlgmr.msra.gmra.mrb[24].mxu0 %vm1526_vm0, %v5627_v58  ;;  %v4737_v57 = vpack.c.bf16 %v5007_v11, %v5005_v35 }
 0x289   :  { %v5011_v17 = vpop.eup %5010  ;;  %2139 = vmatprep.mubr.f32.mxu0 %v8223_v28 }
 0x28a   :  { %4738 = vmatprep.subr.bf16.mxu1 %v4737_v57  ;;  %v4741_v10 = vpack.c.bf16 %v5011_v17, %v5009_v23 }
 0x28c   :  { %2329 = vrot.lane.b32.xlu1 %v6651_v12, %s5289_s2  ;;  %4610 = vmatmul.mubr.msk.f32.gmra.mrb[26].mxu0 %vm1526_vm0, %v5642_v7 }
 0x28d   :  { %2145 = vmatprep.mubr.f32.mxu0 %v8223_v28 }
 0x290   :  { %4611 = vmatmul.mubr.msk.f32.gmra.mrb[28].mxu0 %vm1526_vm0, %v5590_v36 }
 0x291   :  { %2151 = vmatprep.mubr.f32.mxu0 %v8223_v28 }
 0x294   :  { %4612 = vmatmul.mubr.msk.f32.gmra.mrb[30].mxu0 %vm1526_vm0, %v5600_v42 }
 0x295   :  { %2407 = vmatprep.mubr.f32.mxu0 %v8223_v28 }
 0x2a5   :  { %v6664_v1 = vpop.f32.mrb[8].mxu1 }
 0x2a6   :  { %v6666_v44 = vpop.f32.mrb[9].mxu1 }
 0x2a9   :  { %v6668_v53 = vpop.f32.mrb[10].mxu1 }
 0x2aa   :  { %v6670_v55 = vpop.f32.mrb[11].mxu1 }
 0x2ad   :  { %v6672_v19 = vpop.f32.mrb[12].mxu1 }
 0x2ae   :  { %v6674_v9 = vpop.f32.mrb[13].mxu1 }
 0x2b1   :  { %v6676_v20 = vpop.f32.mrb[14].mxu1 }
 0x2b2   :  { %v742_v26 = vpop.trf.xlu1  ;;  %v6680_v47 = vpop.f32.mrb[15].mxu1 }
 0x2b3   :  { %v869_v25 = vrot.slane %v742_v26, %v5608_v46  ;;  %v1097_v39 = vrot.slane %v742_v26, %v5622_v56  ;;  %v1305_v50 = vrot.slane %v742_v26, %v5634_v0 }
 0x2b5   :  { %v888_v22 = vmul.f32 %v869_v25, %v5446_v45  ;;  %v904_v52 = vmul.f32 %v869_v25, %v5462_v51  ;;  %v920_v2 = vmul.f32 %v869_v25, %v5514_v6  ;;  %v936_v8 = vmul.f32 %v869_v25, %v5528_v13 }
 0x2b6   :  { %v1116_v15 = vmul.f32 %v1097_v39, %v5492_v62  ;;  %v1132_v18 = vmul.f32 %v1097_v39, %v5506_v3  ;;  %v1148_v46 = vmul.f32 %v1097_v39, %v5572_v29  ;;  %v1164_v56 = vmul.f32 %v1097_v39, %v5582_v33  ;;  %v8236_v39 = vld [vmem:[#allocation2_spill] sm:$0xff] }
 0x2b7   :  { %v972_v43 = vadd.f32 %v5470_v54, %v888_v22  ;;  %v988_v0 = vadd.f32 %v5484_v59, %v904_v52  ;;  %v1004_v45 = vadd.f32 %v5574_v30, %v920_v2  ;;  %v1020_v51 = vadd.f32 %v5558_v24, %v936_v8  ;;  %v8238_v2 = vld [vmem:[#allocation5_spill] sm:$0xff] }
 0x2b8   :  { %v1324_v6 = vmul.f32 %v1305_v50, %v5536_v16  ;;  %v1340_v13 = vmul.f32 %v1305_v50, %v5550_v21  ;;  %v1356_v62 = vmul.f32 %v1305_v50, %v5598_v40  ;;  %v1372_v33 = vmul.f32 %v1305_v50, %v5610_v48  ;;  %v8237_v50 = vld [vmem:[#allocation6_spill] sm:$0xff] }
 0x2b9   :  { %v1180_v38 = vadd.f32 %v1116_v15, %v972_v43  ;;  %v1196_v3 = vadd.f32 %v1132_v18, %v988_v0  ;;  %v1212_v49 = vadd.f32 %v1148_v46, %v1004_v45  ;;  %v1228_v29 = vadd.f32 %v1164_v56, %v1020_v51  ;;  %v8239_v15 = vld [vmem:[#allocation9_spill] sm:$0xff]  ;;  %v8240_v45 = vld [vmem:[#allocation4_spill] sm:$0xff] }
 0x2bb   :  { %v1388_v4 = vadd.f32 %v1324_v6, %v1180_v38  ;;  %v1404_v54 = vadd.f32 %v1340_v13, %v1196_v3  ;;  %v1420_v35 = vadd.f32 %v1356_v62, %v1212_v49  ;;  %v1436_v59 = vadd.f32 %v1372_v33, %v1228_v29  ;;  %v8241_v62 = vld [vmem:[#allocation8_spill] sm:$0xff] }
 0x2bd   :  { %5012 = vtanh.f32 %v1388_v4 }
 0x2be   :  { %5014 = vtanh.f32 %v1404_v54 }
 0x2bf   :  { %5016 = vtanh.f32 %v1420_v35 }
 0x2c0   :  { %5018 = vtanh.f32 %v1436_v59 }
 0x2c7   :  { %v5013_v24 = vpop.eup %5012 }
 0x2c8   :  { %v5015_v16 = vpop.eup %5014 }
 0x2c9   :  { %v5017_v30 = vpop.eup %5016  ;;  %v4739_v21 = vpack.c.bf16 %v5015_v16, %v5013_v24 }
 0x2ca   :  { %v5019_v11 = vpop.eup %5018 }
 0x2cb   :  { %4740 = vmatpush1.bf16.msra.mxu1 %v4739_v21  ;;  %v4743_v40 = vpack.c.bf16 %v5019_v11, %v5017_v30  ;;  %v8243_v11 = vld [vmem:[#allocation17_spill] sm:$0xff] }
 0x2cc   :  { %4742 = vmatprep.subr.bf16.mxu1 %v4741_v10 }
 0x2ce   :  { %v6699_v23 = vpop.permute.xlu0 %1503 }
 0x2cf   :  { %4744 = vmatpush1.bf16.msra.mxu1 %v4743_v40  ;;  %v1604_v48 = vadd.f32 %v6249_v37, %v6699_v23  ;;  %v1693_v57 = vadd.f32 %v6417_v60, %v6699_v23  ;;  %v1602_v17 = vadd.f32 %v6247_v32, %v6699_v23  ;;  %v1691_v26 = vadd.f32 %v6415_v63, %v6699_v23 }
 0x2d1   :  { %5020 = vtanh.f32 %v1604_v48 }
 0x2d2   :  { %4613 = vmatmul.mubr.msk.f32.vlgmr.msra.gmra.mrb[24].mxu1 %vm1526_vm0, %v5627_v58  ;;  %v6711_v10 = vpop.permute.xlu0 %1507  ;;  %5022 = vtanh.f32 %v1693_v57 }
 0x2d3   :  { %2228 = vmatprep.mubr.f32.mxu1 %v8223_v28  ;;  %v1610_v37 = vadd.f32 %v6270_v61, %v6711_v10  ;;  %v1699_v60 = vadd.f32 %v6435_v41, %v6711_v10  ;;  %v1608_v32 = vadd.f32 %v6260_v34, %v6711_v10  ;;  %5024 = vtanh.f32 %v1602_v17  ;;  %v8234_v61 = vld [vmem:[#allocation3_spill] sm:$0xff] }
 0x2d4   :  { %v1697_v63 = vadd.f32 %v6425_v14, %v6711_v10  ;;  %5026 = vtanh.f32 %v1691_v26  ;;  %v8235_v34 = vld [vmem:[#allocation7_spill] sm:$0xff]  ;;  %v1788_v40 = vadd.f32 %v8243_v11, %v6711_v10 }
 0x2d5   :  { %5028 = vtanh.f32 %v1610_v37 }
 0x2d6   :  { %4614 = vmatmul.mubr.msk.f32.gmra.mrb[26].mxu1 %vm1526_vm0, %v5642_v7  ;;  %v6724_v58 = vpop.permute.xlu0 %1511  ;;  %5030 = vtanh.f32 %v1699_v60 }
 0x2d7   :  { %2234 = vmatprep.mubr.f32.mxu1 %v8223_v28  ;;  %5032 = vtanh.f32 %v1608_v32  ;;  %v1616_v41 = vadd.f32 %v8234_v61, %v6724_v58  ;;  %v1705_v25 = vadd.f32 %v8235_v34, %v6724_v58  ;;  %v1614_v14 = vadd.f32 %v8236_v39, %v6724_v58 }
 0x2d8   :  { %5034 = vtanh.f32 %v1697_v63  ;;  %v1703_v22 = vadd.f32 %v8237_v50, %v6724_v58  ;;  %v1871_v63 = vadd.f32 %v6666_v44, %v6699_v23  ;;  %v1877_v34 = vadd.f32 %v6670_v55, %v6711_v10  ;;  %v8244_v44 = vld [vmem:[#allocation13_spill] sm:$0xff] }
 0x2d9   :  { %5036 = vtanh.f32 %v1616_v41 }
 0x2da   :  { %4615 = vmatmul.mubr.msk.f32.gmra.mrb[28].mxu1 %vm1526_vm0, %v5590_v36  ;;  %v6737_v7 = vpop.permute.xlu0 %1515  ;;  %5038 = vtanh.f32 %v1705_v25 }
 0x2db   :  { %v5021_v52 = vpop.eup %5020  ;;  %2240 = vmatprep.mubr.f32.mxu1 %v8223_v28  ;;  %v1622_v8 = vadd.f32 %v8238_v2, %v6737_v7  ;;  %v1711_v18 = vadd.f32 %v8239_v15, %v6737_v7  ;;  %5040 = vtanh.f32 %v1614_v14  ;;  %v1957_v56 = vpop.f32.mrb[16].mxu0  ;;  %v1620_v51 = vadd.f32 %v8240_v45, %v6737_v7 }
 0x2dc   :  { %v5023_v46 = vpop.eup %5022  ;;  %5042 = vtanh.f32 %v1703_v22  ;;  %v1958_v0 = vadd.f32 %v1957_v56, %v6699_v23  ;;  %v1959_v36 = vpop.f32.mrb[17].mxu0  ;;  %v1709_v38 = vadd.f32 %v8241_v62, %v6737_v7  ;;  %v1780_v15 = vadd.f32 %v8244_v44, %v6699_v23 }
 0x2dd   :  { %v5025_v43 = vpop.eup %5024  ;;  %5044 = vtanh.f32 %v1622_v8  ;;  %v1960_v13 = vadd.f32 %v1959_v36, %v6699_v23  ;;  %v1794_v62 = vadd.f32 %v6614_v27, %v6724_v58 }
 0x2de   :  { %v5027_v6 = vpop.eup %5026  ;;  %4616 = vmatmul.mubr.msk.f32.gmra.mrb[30].mxu1 %vm1526_vm0, %v5600_v42  ;;  %5046 = vtanh.f32 %v1711_v18  ;;  %v8242_v42 = vld [vmem:[#allocation14_spill] sm:$0xff] }
 0x2df   :  { %v5029_v3 = vpop.eup %5028  ;;  %5048 = vtanh.f32 %v1958_v0  ;;  %2496 = vmatprep.mubr.f32.mxu1 %v8223_v28  ;;  %v1963_v29 = vpop.f32.mrb[18].mxu0  ;;  %v1782_v24 = vadd.f32 %v8242_v42, %v6699_v23  ;;  %v1869_v0 = vadd.f32 %v6664_v1, %v6699_v23  ;;  %v1800_v1 = vadd.f32 %v6621_v31, %v6737_v7 }
 0x2e0   :  { %v5031_v49 = vpop.eup %5030  ;;  %5050 = vtanh.f32 %v1960_v13  ;;  %v4745_v33 = vpack.c.bf16 %v5029_v3, %v5021_v52  ;;  %v1964_v54 = vadd.f32 %v1963_v29, %v6711_v10  ;;  %v1965_v35 = vpop.f32.mrb[19].mxu0  ;;  %v1883_v29 = vadd.f32 %v6674_v9, %v6724_v58 }
 0x2e1   :  { %v5033_v4 = vpop.eup %5032  ;;  %v4753_v59 = vpack.c.bf16 %v5031_v49, %v5023_v46  ;;  %5052 = vtanh.f32 %v1620_v51  ;;  %v1966_v30 = vadd.f32 %v1965_v35, %v6711_v10  ;;  %v8245_v46 = vld [vmem:[#allocation16_spill] sm:$0xff]  ;;  %v1875_v51 = vadd.f32 %v6668_v53, %v6711_v10  ;;  %v6785_v3 = vpop.permute.xlu0 %2327  ;;  %v8246_v35 = vld [vmem:[#allocation18_spill] sm:$0xff] }
 0x2e2   :  { %v5035_v16 = vpop.eup %5034  ;;  %4746 = vmatprep.subr.bf16.mxu0 %v4745_v33  ;;  %v4747_v21 = vpack.c.bf16 %v5033_v4, %v5025_v43  ;;  %5054 = vtanh.f32 %v1709_v38  ;;  %v1786_v56 = vadd.f32 %v8245_v46, %v6711_v10  ;;  %v1889_v4 = vadd.f32 %v6680_v47, %v6737_v7 }
 0x2e3   :  { %v5037_v48 = vpop.eup %5036  ;;  %5056 = vtanh.f32 %v1964_v54  ;;  %4754 = vmatprep.subr.bf16.mxu1 %v4753_v59  ;;  %v4755_v57 = vpack.c.bf16 %v5035_v16, %v5027_v6  ;;  %v1969_v26 = vpop.f32.mrb[20].mxu0  ;;  %v1792_v59 = vadd.f32 %v8246_v35, %v6724_v58  ;;  %v1798_v9 = vadd.f32 %v6617_v5, %v6737_v7 }
 0x2e4   :  { %v5039_v17 = vpop.eup %5038  ;;  %5058 = vtanh.f32 %v1966_v30  ;;  %4748 = vmatpush1.bf16.msra.mxu0 %v4747_v21  ;;  %v1970_v60 = vadd.f32 %v1969_v26, %v6724_v58  ;;  %v1971_v32 = vpop.f32.mrb[21].mxu0  ;;  %v1887_v30 = vadd.f32 %v6676_v20, %v6737_v7  ;;  %v5290_v21 = vmov 3  }
 0x2e5   :  { %v5041_v37 = vpop.eup %5040  ;;  %4756 = vmatpush1.bf16.msra.mxu1 %v4755_v57  ;;  %5060 = vtanh.f32 %v1782_v24  ;;  %v1972_v41 = vadd.f32 %v1971_v32, %v6724_v58  ;;  %v1881_v24 = vadd.f32 %v6672_v19, %v6724_v58  ;;  %4891 = vset.pattern.permute.xlu0 %v5290_v21 }
 0x2e6   :  { %v5043_v61 = vpop.eup %5042  ;;  %5062 = vtanh.f32 %v1788_v40  ;;  %v8247_v40 = vld [vmem:[#allocation10_spill] sm:$0xff] }
 0x2e7   :  { %v5045_v25 = vpop.eup %5044  ;;  %5064 = vtanh.f32 %v1970_v60  ;;  %v1975_v14 = vpop.f32.mrb[22].mxu0  ;;  %3120 = vperm.xlu0 %4891, %v8247_v40  }
 0x2e8   :  { %v5047_v39 = vpop.eup %5046  ;;  %5066 = vtanh.f32 %v1972_v41  ;;  %v4749_v50 = vpack.c.bf16 %v5045_v25, %v5037_v48  ;;  %v1976_v52 = vadd.f32 %v1975_v14, %v6737_v7  ;;  %v1977_v2 = vpop.f32.mrb[23].mxu0 }
 0x2e9   :  { %v6765_v22 = vpop.eup %5048  ;;  %v4757_v8 = vpack.c.bf16 %v5047_v39, %v5039_v17  ;;  %5068 = vtanh.f32 %v1871_v63  ;;  %v1978_v55 = vadd.f32 %v1977_v2, %v6737_v7 }
 0x2ea   :  { %v6770_v18 = vpop.eup %5050  ;;  %4750 = vmatprep.subr.bf16.mxu0 %v4749_v50  ;;  %5070 = vtanh.f32 %v1877_v34  ;;  %v8249_v34 = vld [vmem:[#allocation12_spill] sm:$0xff] }
 0x2eb   :  { %v5053_v43 = vpop.eup %5052  ;;  %5072 = vtanh.f32 %v1976_v52  ;;  %4758 = vmatprep.subr.bf16.mxu1 %v4757_v8  ;;  %3136 = vrot.lane.b32.xlu0 %v8249_v34, %s5291_s1  ;;  %v6829_v8 = vpop.permute.xlu0 %2331 }
 0x2ec   :  { %v5055_v36 = vpop.eup %5054  ;;  %5074 = vtanh.f32 %v1978_v55  ;;  %v4751_v45 = vpack.c.bf16 %v5053_v43, %v5041_v37 }
 0x2ed   :  { %v6779_v6 = vpop.eup %5056  ;;  %v4759_v13 = vpack.c.bf16 %v5055_v36, %v5043_v61  ;;  %5076 = vtanh.f32 %v1780_v15  ;;  %v8248_v61 = vld [vmem:[#allocation11_spill] sm:$0xff] }
 0x2ee   :  { %v6783_v38 = vpop.eup %5058  ;;  %4752 = vmatpush1.bf16.msra.mxu0 %v4751_v45  ;;  %5078 = vtanh.f32 %v1786_v56  ;;  %v4779_v49 = vpack.c.bf16 %v6779_v6, %v6765_v22  ;;  %3132 = vrot.lane.b32.xlu1 %v8248_v61, %s5291_s1 }
 0x2ef   :  { %v5061_v53 = vpop.eup %5060  ;;  %4760 = vmatpush1.bf16.msra.mxu1 %v4759_v13  ;;  %5080 = vtanh.f32 %v1869_v0  ;;  %v4777_v27 = vpack.c.bf16 %v6783_v38, %v6770_v18  ;;  %v6843_v43 = vpop.permute.xlu0 %2333  ;;  %v8250_v0 = vld [vmem:[#allocation15_spill] sm:$0xff] }
 0x2f0   :  { %v5063_v33 = vpop.eup %5062  ;;  %5082 = vtanh.f32 %v1875_v51 }
 0x2f1   :  { %v6797_v54 = vpop.eup %5064  ;;  %v4761_v31 = vpack.c.bf16 %v5063_v33, %v5061_v53  ;;  %4617 = vmatmul.mubr.msk.f32.vlgmr.msra.gmra.mrb[32].mxu0 %vm1526_vm0, %v6785_v3  ;;  %5084 = vtanh.f32 %v1794_v62 }
 0x2f2   :  { %v6803_v42 = vpop.eup %5066  ;;  %4621 = vmatmul.mubr.msk.f32.vlgmr.msra.gmra.mrb[32].mxu1 %vm1526_vm0, %v6785_v3  ;;  %5086 = vtanh.f32 %v1800_v1  ;;  %2413 = vmatprep.mubr.f32.mxu0 %v8223_v28 }
 0x2f3   :  { %v5069_v47 = vpop.eup %5068  ;;  %4762 = vmatprep.subr.bf16.mxu0 %v4761_v31  ;;  %5088 = vtanh.f32 %v1883_v29  ;;  %2502 = vmatprep.mubr.f32.mxu1 %v8223_v28 }
 0x2f4   :  { %v5071_v16 = vpop.eup %5070  ;;  %5090 = vtanh.f32 %v1889_v4  ;;  %3134 = vrot.lane.b32.xlu1 %v6651_v12, %s5291_s1 }
 0x2f5   :  { %v6815_v11 = vpop.eup %5072  ;;  %v4769_v5 = vpack.c.bf16 %v5071_v16, %v5069_v47  ;;  %5092 = vtanh.f32 %v1792_v59 }
 0x2f6   :  { %v5075_v48 = vpop.eup %5074  ;;  %5094 = vtanh.f32 %v1798_v9  ;;  %v4783_v19 = vpack.c.bf16 %v6815_v11, %v6797_v54 }
 0x2f7   :  { %v5077_v57 = vpop.eup %5076  ;;  %4770 = vmatprep.subr.bf16.mxu1 %v4769_v5  ;;  %5096 = vtanh.f32 %v1881_v24  ;;  %v4781_v17 = vpack.c.bf16 %v5075_v48, %v6803_v42 }
 0x2f8   :  { %v5079_v26 = vpop.eup %5078  ;;  %5098 = vtanh.f32 %v1887_v30  ;;  %3138 = vrot.lane.b32.xlu1 %v8250_v0, %s5291_s1 }
 0x2f9   :  { %v5081_v20 = vpop.eup %5080  ;;  %v4763_v37 = vpack.c.bf16 %v5079_v26, %v5077_v57 }
 0x2fa   :  { %v5083_v60 = vpop.eup %5082 }
 0x2fb   :  { %v5085_v32 = vpop.eup %5084  ;;  %4764 = vmatpush1.bf16.msra.mxu0 %v4763_v37  ;;  %v4771_v63 = vpack.c.bf16 %v5083_v60, %v5081_v20 }
 0x2fc   :  { %v5087_v41 = vpop.eup %5086 }
 0x2fd   :  { %v5089_v25 = vpop.eup %5088  ;;  %4772 = vmatpush1.bf16.msra.mxu1 %v4771_v63  ;;  %v4765_v39 = vpack.c.bf16 %v5087_v41, %v5085_v32 }
 0x2fe   :  { %v5091_v14 = vpop.eup %5090  ;;  %v6825_v50 = vpop.permute.xlu1 %2329 }
 0x2ff   :  { %v5093_v52 = vpop.eup %5092  ;;  %4766 = vmatprep.subr.bf16.mxu0 %v4765_v39  ;;  %v4773_v2 = vpack.c.bf16 %v5091_v14, %v5089_v25  ;;  %4618 = vmatmul.mubr.msk.f32.gmra.mrb[34].mxu0 %vm1526_vm0, %v6825_v50 }
 0x300   :  { %v5095_v44 = vpop.eup %5094  ;;  %4622 = vmatmul.mubr.msk.f32.gmra.mrb[34].mxu1 %vm1526_vm0, %v6825_v50  ;;  %2419 = vmatprep.mubr.f32.mxu0 %v8223_v28 }
 0x301   :  { %v5097_v15 = vpop.eup %5096  ;;  %4774 = vmatprep.subr.bf16.mxu1 %v4773_v2  ;;  %v4767_v55 = vpack.c.bf16 %v5095_v44, %v5093_v52  ;;  %2508 = vmatprep.mubr.f32.mxu1 %v8223_v28 }
 0x302   :  { %v5099_v46 = vpop.eup %5098 }
 0x303   :  { %4768 = vmatpush1.bf16.msra.mxu0 %v4767_v55  ;;  %v4775_v56 = vpack.c.bf16 %v5099_v46, %v5097_v15 }
 0x304   :  { %4778 = vmatprep.subr.bf16.mxu0 %v4777_v27  ;;  %4619 = vmatmul.mubr.msk.f32.gmra.mrb[36].mxu0 %vm1526_vm0, %v6829_v8 }
 0x305   :  { %4776 = vmatpush1.bf16.msra.mxu1 %v4775_v56  ;;  %2425 = vmatprep.mubr.f32.mxu0 %v8223_v28 }
 0x306   :  { %4623 = vmatmul.mubr.msk.f32.gmra.mrb[36].mxu1 %vm1526_vm0, %v6829_v8 }
 0x307   :  { %2514 = vmatprep.mubr.f32.mxu1 %v8223_v28 }
 0x308   :  { %4620 = vmatmul.mubr.msk.f32.gmra.mrb[38].mxu0 %vm1526_vm0, %v6843_v43 }
 0x309   :  { %2585 = vmatprep.mubr.f32.mxu0 %v8223_v28 }
 0x30a   :  { %4624 = vmatmul.mubr.msk.f32.gmra.mrb[38].mxu1 %vm1526_vm0, %v6843_v43 }
 0x30b   :  { %2674 = vmatprep.mubr.f32.mxu1 %v8223_v28 }
 0x30c   :  { %4625 = vmatmul.mubr.msk.f32.vlgmr.msra.gmra.mrb[40].mxu0 %vm1526_vm0, %v6785_v3 }
 0x30d   :  { %4780 = vmatpush1.bf16.msra.mxu0 %v4779_v49  ;;  %2591 = vmatprep.mubr.f32.mxu0 %v8223_v28 }
 0x30e   :  { %4629 = vmatmul.mubr.msk.f32.vlgmr.msra.gmra.mrb[40].mxu1 %vm1526_vm0, %v6785_v3  ;;  %4782 = vmatprep.subr.bf16.mxu0 %v4781_v17 }
 0x30f   :  { %2680 = vmatprep.mubr.f32.mxu1 %v8223_v28 }
 0x310   :  { %4626 = vmatmul.mubr.msk.f32.gmra.mrb[42].mxu0 %vm1526_vm0, %v6825_v50 }
 0x311   :  { %4784 = vmatpush1.bf16.msra.mxu0 %v4783_v19  ;;  %2597 = vmatprep.mubr.f32.mxu0 %v8223_v28 }
 0x312   :  { %4630 = vmatmul.mubr.msk.f32.gmra.mrb[42].mxu1 %vm1526_vm0, %v6825_v50 }
 0x313   :  { %2686 = vmatprep.mubr.f32.mxu1 %v8223_v28 }
 0x314   :  { %4627 = vmatmul.mubr.msk.f32.gmra.mrb[44].mxu0 %vm1526_vm0, %v6829_v8 }
 0x315   :  { %2603 = vmatprep.mubr.f32.mxu0 %v8223_v28 }
 0x316   :  { %4631 = vmatmul.mubr.msk.f32.gmra.mrb[44].mxu1 %vm1526_vm0, %v6829_v8 }
 0x317   :  { %2692 = vmatprep.mubr.f32.mxu1 %v8223_v28 }
 0x318   :  { %4628 = vmatmul.mubr.msk.f32.gmra.mrb[46].mxu0 %vm1526_vm0, %v6843_v43 }
 0x319   :  { %2763 = vmatprep.mubr.f32.mxu0 %v8223_v28 }
 0x31a   :  { %4632 = vmatmul.mubr.msk.f32.gmra.mrb[46].mxu1 %vm1526_vm0, %v6843_v43 }
 0x31b   :  { %2852 = vmatprep.mubr.f32.mxu1 %v8223_v28 }
 0x31c   :  { %4633 = vmatmul.mubr.msk.f32.vlgmr.msra.gmra.mrb[48].mxu0 %vm1526_vm0, %v6785_v3 }
 0x31d   :  { %2769 = vmatprep.mubr.f32.mxu0 %v8223_v28 }
 0x320   :  { %4634 = vmatmul.mubr.msk.f32.gmra.mrb[50].mxu0 %vm1526_vm0, %v6825_v50 }
 0x321   :  { %2775 = vmatprep.mubr.f32.mxu0 %v8223_v28 }
 0x324   :  { %4635 = vmatmul.mubr.msk.f32.gmra.mrb[52].mxu0 %vm1526_vm0, %v6829_v8  ;;  %v2046_v12 = vpop.f32.mrb[16].mxu1 }
 0x325   :  { %2781 = vmatprep.mubr.f32.mxu0 %v8223_v28  ;;  %v2047_v22 = vadd.f32 %v2046_v12, %v6699_v23  ;;  %v2048_v18 = vpop.f32.mrb[17].mxu1 }
 0x326   :  { %v2049_v36 = vadd.f32 %v2048_v18, %v6699_v23 }
 0x327   :  { %5100 = vtanh.f32 %v2047_v22 }
 0x328   :  { %4636 = vmatmul.mubr.msk.f32.gmra.mrb[54].mxu0 %vm1526_vm0, %v6843_v43  ;;  %v2052_v45 = vpop.f32.mrb[18].mxu1  ;;  %5102 = vtanh.f32 %v2049_v36 }
 0x329   :  { %2941 = vmatprep.mubr.f32.mxu0 %v8223_v28  ;;  %v2053_v51 = vadd.f32 %v2052_v45, %v6711_v10  ;;  %v2054_v6 = vpop.f32.mrb[19].mxu1 }
 0x32a   :  { %v2055_v13 = vadd.f32 %v2054_v6, %v6711_v10 }
 0x32b   :  { %5104 = vtanh.f32 %v2053_v51 }
 0x32c   :  { %5106 = vtanh.f32 %v2055_v13  ;;  %v2058_v62 = vpop.f32.mrb[20].mxu1 }
 0x32d   :  { %v2059_v38 = vadd.f32 %v2058_v62, %v6724_v58  ;;  %v2060_v1 = vpop.f32.mrb[21].mxu1 }
 0x32e   :  { %v2061_v49 = vadd.f32 %v2060_v1, %v6724_v58 }
 0x32f   :  { %5108 = vtanh.f32 %v2059_v38 }
 0x330   :  { %v2064_v53 = vpop.f32.mrb[22].mxu1  ;;  %5110 = vtanh.f32 %v2061_v49 }
 0x331   :  { %v2065_v29 = vadd.f32 %v2064_v53, %v6737_v7  ;;  %v2066_v27 = vpop.f32.mrb[23].mxu1  ;;  %v5101_v4 = vpop.eup %5100 }
 0x332   :  { %v2067_v33 = vadd.f32 %v2066_v27, %v6737_v7  ;;  %v5103_v54 = vpop.eup %5102 }
 0x333   :  { %5112 = vtanh.f32 %v2065_v29 }
 0x334   :  { %5114 = vtanh.f32 %v2067_v33 }
 0x335   :  { %v5105_v31 = vpop.eup %5104 }
 0x336   :  { %v5107_v35 = vpop.eup %5106  ;;  %v4787_v59 = vpack.c.bf16 %v5105_v31, %v5101_v4 }
 0x337   :  { %v4785_v42 = vpack.c.bf16 %v5107_v35, %v5103_v54 }
 0x339   :  { %4786 = vmatprep.subr.bf16.mxu1 %v4785_v42  ;;  %v5109_v9 = vpop.eup %5108 }
 0x33a   :  { %4788 = vmatpush1.bf16.msra.mxu1 %v4787_v59  ;;  %v5111_v47 = vpop.eup %5110 }
 0x33d   :  { %v5113_v24 = vpop.eup %5112 }
 0x33e   :  { %v5115_v16 = vpop.eup %5114  ;;  %v4791_v30 = vpack.c.bf16 %v5113_v24, %v5109_v9 }
 0x33f   :  { %v4789_v21 = vpack.c.bf16 %v5115_v16, %v5111_v47 }
 0x341   :  { %4790 = vmatprep.subr.bf16.mxu1 %v4789_v21 }
 0x342   :  { %4792 = vmatpush1.bf16.msra.mxu1 %v4791_v30 }
 0x345   :  { %4637 = vmatmul.mubr.msk.f32.vlgmr.msra.gmra.mrb[48].mxu1 %vm1526_vm0, %v6785_v3 }
 0x346   :  { %2858 = vmatprep.mubr.f32.mxu1 %v8223_v28 }
 0x349   :  { %4638 = vmatmul.mubr.msk.f32.gmra.mrb[50].mxu1 %vm1526_vm0, %v6825_v50 }
 0x34a   :  { %2864 = vmatprep.mubr.f32.mxu1 %v8223_v28 }
 0x34d   :  { %4639 = vmatmul.mubr.msk.f32.gmra.mrb[52].mxu1 %vm1526_vm0, %v6829_v8 }
 0x34e   :  { %2870 = vmatprep.mubr.f32.mxu1 %v8223_v28 }
 0x351   :  { %4640 = vmatmul.mubr.msk.f32.gmra.mrb[54].mxu1 %vm1526_vm0, %v6843_v43 }
 0x352   :  { %3030 = vmatprep.mubr.f32.mxu1 %v8223_v28 }
 0x35b   :  { %v2135_v11 = vpop.f32.mrb[24].mxu0 }
 0x35c   :  { %v2136_v5 = vadd.f32 %v2135_v11, %v6699_v23  ;;  %v2137_v40 = vpop.f32.mrb[25].mxu0 }
 0x35d   :  { %v2138_v48 = vadd.f32 %v2137_v40, %v6699_v23 }
 0x35e   :  { %5116 = vtanh.f32 %v2136_v5  ;;  %v6946_v5 = vpop.permute.xlu0 %2312 }
 0x35f   :  { %v2141_v19 = vpop.f32.mrb[26].mxu0  ;;  %5118 = vtanh.f32 %v2138_v48 }
 0x360   :  { %v2142_v57 = vadd.f32 %v2141_v19, %v6711_v10  ;;  %v2143_v17 = vpop.f32.mrb[27].mxu0 }
 0x361   :  { %v2144_v26 = vadd.f32 %v2143_v17, %v6711_v10 }
 0x362   :  { %5120 = vtanh.f32 %v2142_v57  ;;  %v6955_v19 = vpop.permute.xlu0 %2316 }
 0x363   :  { %5122 = vtanh.f32 %v2144_v26  ;;  %v2147_v20 = vpop.f32.mrb[28].mxu0 }
 0x364   :  { %v2148_v37 = vadd.f32 %v2147_v20, %v6724_v58  ;;  %v2149_v60 = vpop.f32.mrb[29].mxu0 }
 0x365   :  { %v2150_v32 = vadd.f32 %v2149_v60, %v6724_v58 }
 0x366   :  { %5124 = vtanh.f32 %v2148_v37 }
 0x367   :  { %v2153_v63 = vpop.f32.mrb[30].mxu0  ;;  %5126 = vtanh.f32 %v2150_v32  ;;  %v6966_v32 = vpop.permute.xlu0 %2320 }
 0x368   :  { %v2154_v61 = vadd.f32 %v2153_v63, %v6737_v7  ;;  %v2155_v41 = vpop.f32.mrb[31].mxu0  ;;  %v5117_v25 = vpop.eup %5116 }
 0x369   :  { %v2156_v34 = vadd.f32 %v2155_v41, %v6737_v7  ;;  %v5119_v39 = vpop.eup %5118 }
 0x36a   :  { %5128 = vtanh.f32 %v2154_v61 }
 0x36b   :  { %5130 = vtanh.f32 %v2156_v34 }
 0x36c   :  { %v5121_v14 = vpop.eup %5120 }
 0x36d   :  { %v5123_v52 = vpop.eup %5122  ;;  %v4795_v2 = vpack.c.bf16 %v5121_v14, %v5117_v25 }
 0x36e   :  { %v4793_v44 = vpack.c.bf16 %v5123_v52, %v5119_v39 }
 0x370   :  { %4794 = vmatprep.subr.bf16.mxu0 %v4793_v44  ;;  %v5125_v15 = vpop.eup %5124 }
 0x371   :  { %4796 = vmatpush1.bf16.msra.mxu0 %v4795_v2  ;;  %v5127_v55 = vpop.eup %5126  ;;  %v6972_v2 = vpop.permute.xlu0 %2324 }
 0x374   :  { %v5129_v46 = vpop.eup %5128 }
 0x375   :  { %v5131_v56 = vpop.eup %5130  ;;  %v4799_v0 = vpack.c.bf16 %v5129_v46, %v5125_v15 }
 0x376   :  { %v4797_v12 = vpack.c.bf16 %v5131_v56, %v5127_v55 }
 0x378   :  { %4798 = vmatprep.subr.bf16.mxu0 %v4797_v12 }
 0x379   :  { %4800 = vmatpush1.bf16.msra.mxu0 %v4799_v0 }
 0x37c   :  { %4641 = vmatmul.mubr.msk.f32.vlgmr.msra.gmra.mrb[56].mxu0 %vm1526_vm0, %v6785_v3 }
 0x37d   :  { %2947 = vmatprep.mubr.f32.mxu0 %v8223_v28 }
 0x380   :  { %4642 = vmatmul.mubr.msk.f32.gmra.mrb[58].mxu0 %vm1526_vm0, %v6825_v50 }
 0x381   :  { %2953 = vmatprep.mubr.f32.mxu0 %v8223_v28 }
 0x384   :  { %4643 = vmatmul.mubr.msk.f32.gmra.mrb[60].mxu0 %vm1526_vm0, %v6829_v8 }
 0x385   :  { %2959 = vmatprep.mubr.f32.mxu0 %v8223_v28 }
 0x388   :  { %4644 = vmatmul.mubr.msk.f32.gmra.mrb[62].mxu0 %vm1526_vm0, %v6843_v43 }
 0x389   :  { %3212 = vmatprep.mubr.f32.mxu0 %v8223_v28 }
 0x3a5   :  { %v2224_v22 = vpop.f32.mrb[24].mxu1 }
 0x3a6   :  { %v2225_v18 = vadd.f32 %v2224_v22, %v6699_v23  ;;  %v2226_v36 = vpop.f32.mrb[25].mxu1 }
 0x3a7   :  { %v2227_v45 = vadd.f32 %v2226_v36, %v6699_v23 }
 0x3a8   :  { %5132 = vtanh.f32 %v2225_v18 }
 0x3a9   :  { %v2230_v51 = vpop.f32.mrb[26].mxu1  ;;  %5134 = vtanh.f32 %v2227_v45 }
 0x3aa   :  { %v2231_v6 = vadd.f32 %v2230_v51, %v6711_v10  ;;  %v2232_v13 = vpop.f32.mrb[27].mxu1 }
 0x3ab   :  { %v2233_v62 = vadd.f32 %v2232_v13, %v6711_v10 }
 0x3ac   :  { %5136 = vtanh.f32 %v2231_v6 }
 0x3ad   :  { %5138 = vtanh.f32 %v2233_v62  ;;  %v2236_v38 = vpop.f32.mrb[28].mxu1 }
 0x3ae   :  { %v2237_v1 = vadd.f32 %v2236_v38, %v6724_v58  ;;  %v2238_v49 = vpop.f32.mrb[29].mxu1 }
 0x3af   :  { %v2239_v53 = vadd.f32 %v2238_v49, %v6724_v58 }
 0x3b0   :  { %5140 = vtanh.f32 %v2237_v1 }
 0x3b1   :  { %v2242_v29 = vpop.f32.mrb[30].mxu1  ;;  %5142 = vtanh.f32 %v2239_v53 }
 0x3b2   :  { %v2243_v23 = vadd.f32 %v2242_v29, %v6737_v7  ;;  %v2244_v27 = vpop.f32.mrb[31].mxu1  ;;  %v5133_v4 = vpop.eup %5132 }
 0x3b3   :  { %v2245_v33 = vadd.f32 %v2244_v27, %v6737_v7  ;;  %v5135_v54 = vpop.eup %5134 }
 0x3b4   :  { %5144 = vtanh.f32 %v2243_v23 }
 0x3b5   :  { %5146 = vtanh.f32 %v2245_v33 }
 0x3b6   :  { %v5137_v10 = vpop.eup %5136 }
 0x3b7   :  { %v5139_v31 = vpop.eup %5138  ;;  %v4803_v35 = vpack.c.bf16 %v5137_v10, %v5133_v4 }
 0x3b8   :  { %v4801_v59 = vpack.c.bf16 %v5139_v31, %v5135_v54 }
 0x3ba   :  { %4802 = vmatprep.subr.bf16.mxu1 %v4801_v59  ;;  %v5141_v42 = vpop.eup %5140 }
 0x3bb   :  { %4804 = vmatpush1.bf16.msra.mxu1 %v4803_v35  ;;  %v5143_v58 = vpop.eup %5142 }
 0x3be   :  { %v5145_v9 = vpop.eup %5144 }
 0x3bf   :  { %v5147_v47 = vpop.eup %5146  ;;  %v4807_v24 = vpack.c.bf16 %v5145_v9, %v5141_v42 }
 0x3c0   :  { %v4805_v16 = vpack.c.bf16 %v5147_v47, %v5143_v58 }
 0x3c2   :  { %4806 = vmatprep.subr.bf16.mxu1 %v4805_v16 }
 0x3c3   :  { %4808 = vmatpush1.bf16.msra.mxu1 %v4807_v24 }
 0x3c4   :  { %v2409_v30 = vpop.f32.mrb[32].mxu0 }
 0x3c5   :  { %v2498_v7 = vpop.f32.mrb[32].mxu1  ;;  %v2411_v21 = vpop.f32.mrb[33].mxu0  ;;  %v2410_v40 = vadd.f32 %v2409_v30, %v6946_v5 }
 0x3c6   :  { %4645 = vmatmul.mubr.msk.f32.vlgmr.msra.gmra.mrb[56].mxu1 %vm1526_vm0, %v6785_v3  ;;  %v2500_v11 = vpop.f32.mrb[33].mxu1  ;;  %v2499_v48 = vadd.f32 %v2498_v7, %v6946_v5  ;;  %v2412_v3 = vadd.f32 %v2411_v21, %v6946_v5 }
 0x3c7   :  { %3036 = vmatprep.mubr.f32.mxu1 %v8223_v28  ;;  %v2501_v57 = vadd.f32 %v2500_v11, %v6946_v5  ;;  %5148 = vtanh.f32 %v2410_v40 }
 0x3c8   :  { %5150 = vtanh.f32 %v2499_v48 }
 0x3c9   :  { %5152 = vtanh.f32 %v2412_v3 }
 0x3ca   :  { %4646 = vmatmul.mubr.msk.f32.gmra.mrb[58].mxu1 %vm1526_vm0, %v6825_v50  ;;  %5154 = vtanh.f32 %v2501_v57 }
 0x3cb   :  { %3042 = vmatprep.mubr.f32.mxu1 %v8223_v28 }
 0x3ce   :  { %4647 = vmatmul.mubr.msk.f32.gmra.mrb[60].mxu1 %vm1526_vm0, %v6829_v8 }
 0x3cf   :  { %3048 = vmatprep.mubr.f32.mxu1 %v8223_v28 }
 0x3d1   :  { %v5149_v52 = vpop.eup %5148 }
 0x3d2   :  { %4648 = vmatmul.mubr.msk.f32.gmra.mrb[62].mxu1 %vm1526_vm0, %v6843_v43  ;;  %v2415_v50 = vpop.f32.mrb[34].mxu0  ;;  %v5151_v55 = vpop.eup %5150 }
 0x3d3   :  { %v2416_v17 = vadd.f32 %v2415_v50, %v6955_v19  ;;  %v2504_v26 = vpop.f32.mrb[34].mxu1  ;;  %v2417_v20 = vpop.f32.mrb[35].mxu0  ;;  %3295 = vmatprep.mubr.f32.mxu1 %v8223_v28 }
 0x3d4   :  { %v2505_v8 = vadd.f32 %v2504_v26, %v6955_v19  ;;  %v2418_v37 = vadd.f32 %v2417_v20, %v6955_v19  ;;  %v2506_v60 = vpop.f32.mrb[35].mxu1  ;;  %v5153_v0 = vpop.eup %5152 }
 0x3d5   :  { %5156 = vtanh.f32 %v2416_v17  ;;  %v2507_v63 = vadd.f32 %v2506_v60, %v6955_v19  ;;  %v5155_v18 = vpop.eup %5154 }
 0x3d6   :  { %5158 = vtanh.f32 %v2505_v8 }
 0x3d7   :  { %5160 = vtanh.f32 %v2418_v37  ;;  %v2421_v43 = vpop.f32.mrb[36].mxu0 }
 0x3d8   :  { %5162 = vtanh.f32 %v2507_v63  ;;  %v2422_v61 = vadd.f32 %v2421_v43, %v6966_v32  ;;  %v2423_v41 = vpop.f32.mrb[37].mxu0 }
 0x3d9   :  { %v2510_v34 = vpop.f32.mrb[36].mxu1  ;;  %v2424_v25 = vadd.f32 %v2423_v41, %v6966_v32 }
 0x3da   :  { %5164 = vtanh.f32 %v2422_v61  ;;  %v2511_v39 = vadd.f32 %v2510_v34, %v6966_v32  ;;  %v2512_v14 = vpop.f32.mrb[37].mxu1 }
 0x3db   :  { %5166 = vtanh.f32 %v2424_v25  ;;  %v2513_v44 = vadd.f32 %v2512_v14, %v6966_v32  ;;  %v2427_v15 = vpop.f32.mrb[38].mxu0 }
 0x3dc   :  { %5168 = vtanh.f32 %v2511_v39  ;;  %v2428_v46 = vadd.f32 %v2427_v15, %v6972_v2  ;;  %v2429_v56 = vpop.f32.mrb[39].mxu0  ;;  %v6991_v39 = vpop.permute.xlu1 %3132 }
 0x3dd   :  { %5170 = vtanh.f32 %v2513_v44  ;;  %v2516_v12 = vpop.f32.mrb[38].mxu1  ;;  %v2430_v22 = vadd.f32 %v2429_v56, %v6972_v2 }
 0x3de   :  { %5172 = vtanh.f32 %v2428_v46  ;;  %v2517_v36 = vadd.f32 %v2516_v12, %v6972_v2  ;;  %v2518_v45 = vpop.f32.mrb[39].mxu1 }
 0x3df   :  { %v5157_v51 = vpop.eup %5156  ;;  %5174 = vtanh.f32 %v2430_v22  ;;  %v2519_v6 = vadd.f32 %v2518_v45, %v6972_v2  ;;  %v2587_v13 = vpop.f32.mrb[40].mxu0 }
 0x3e0   :  { %v5159_v62 = vpop.eup %5158  ;;  %5176 = vtanh.f32 %v2517_v36  ;;  %v2588_v38 = vadd.f32 %v2587_v13, %v6946_v5  ;;  %v2589_v1 = vpop.f32.mrb[41].mxu0  ;;  %v4811_v49 = vpack.c.bf16 %v5157_v51, %v5149_v52 }
 0x3e1   :  { %v5161_v53 = vpop.eup %5160  ;;  %5178 = vtanh.f32 %v2519_v6  ;;  %v2676_v29 = vpop.f32.mrb[40].mxu1  ;;  %v2590_v23 = vadd.f32 %v2589_v1, %v6946_v5  ;;  %v4819_v27 = vpack.c.bf16 %v5159_v62, %v5151_v55 }
 0x3e2   :  { %v5163_v33 = vpop.eup %5162  ;;  %5180 = vtanh.f32 %v2588_v38  ;;  %v2677_v4 = vadd.f32 %v2676_v29, %v6946_v5  ;;  %v2678_v54 = vpop.f32.mrb[41].mxu1  ;;  %v4809_v10 = vpack.c.bf16 %v5161_v53, %v5153_v0 }
 0x3e3   :  { %5182 = vtanh.f32 %v2590_v23  ;;  %v2679_v31 = vadd.f32 %v2678_v54, %v6946_v5  ;;  %v2593_v35 = vpop.f32.mrb[42].mxu0  ;;  %v4817_v59 = vpack.c.bf16 %v5163_v33, %v5155_v18  ;;  %v6997_v51 = vpop.permute.xlu0 %3120 }
 0x3e4   :  { %v5165_v42 = vpop.eup %5164  ;;  %5184 = vtanh.f32 %v2677_v4  ;;  %v2594_v58 = vadd.f32 %v2593_v35, %v6955_v19  ;;  %v2595_v9 = vpop.f32.mrb[43].mxu0  ;;  %4810 = vmatprep.subr.bf16.mxu0 %v4809_v10 }
 0x3e5   :  { %v5167_v47 = vpop.eup %5166  ;;  %5186 = vtanh.f32 %v2679_v31  ;;  %v2682_v24 = vpop.f32.mrb[42].mxu1  ;;  %v2596_v16 = vadd.f32 %v2595_v9, %v6955_v19  ;;  %4818 = vmatprep.subr.bf16.mxu1 %v4817_v59  ;;  %4812 = vmatpush1.bf16.msra.mxu0 %v4811_v49 }
 0x3e6   :  { %v5169_v30 = vpop.eup %5168  ;;  %5188 = vtanh.f32 %v2594_v58  ;;  %v2683_v7 = vadd.f32 %v2682_v24, %v6955_v19  ;;  %v2684_v21 = vpop.f32.mrb[43].mxu1  ;;  %4820 = vmatpush1.bf16.msra.mxu1 %v4819_v27 }
 0x3e7   :  { %v5171_v11 = vpop.eup %5170  ;;  %5190 = vtanh.f32 %v2596_v16  ;;  %v2685_v40 = vadd.f32 %v2684_v21, %v6955_v19  ;;  %v2599_v48 = vpop.f32.mrb[44].mxu0 }
 0x3e8   :  { %v5173_v3 = vpop.eup %5172  ;;  %5192 = vtanh.f32 %v2683_v7  ;;  %v2600_v57 = vadd.f32 %v2599_v48, %v6966_v32  ;;  %v2601_v50 = vpop.f32.mrb[45].mxu0 }
 0x3e9   :  { %v5175_v17 = vpop.eup %5174  ;;  %5194 = vtanh.f32 %v2685_v40  ;;  %v2688_v26 = vpop.f32.mrb[44].mxu1  ;;  %v2602_v20 = vadd.f32 %v2601_v50, %v6966_v32  ;;  %v4815_v8 = vpack.c.bf16 %v5173_v3, %v5165_v42 }
 0x3ea   :  { %v5177_v37 = vpop.eup %5176  ;;  %5196 = vtanh.f32 %v2600_v57  ;;  %v2689_v60 = vadd.f32 %v2688_v26, %v6966_v32  ;;  %v2690_v63 = vpop.f32.mrb[45].mxu1  ;;  %v4813_v43 = vpack.c.bf16 %v5175_v17, %v5167_v47 }
 0x3eb   :  { %v5179_v61 = vpop.eup %5178  ;;  %5198 = vtanh.f32 %v2602_v20  ;;  %v2691_v41 = vadd.f32 %v2690_v63, %v6966_v32  ;;  %v2605_v34 = vpop.f32.mrb[46].mxu0  ;;  %v4823_v25 = vpack.c.bf16 %v5177_v37, %v5169_v30 }
 0x3ec   :  { %v5181_v14 = vpop.eup %5180  ;;  %5200 = vtanh.f32 %v2689_v60  ;;  %v2606_v52 = vadd.f32 %v2605_v34, %v6972_v2  ;;  %v2607_v44 = vpop.f32.mrb[47].mxu0  ;;  %4814 = vmatprep.subr.bf16.mxu0 %v4813_v43  ;;  %v4821_v15 = vpack.c.bf16 %v5179_v61, %v5171_v11 }
 0x3ed   :  { %v5183_v55 = vpop.eup %5182  ;;  %5202 = vtanh.f32 %v2691_v41  ;;  %v2694_v46 = vpop.f32.mrb[46].mxu1  ;;  %v2608_v56 = vadd.f32 %v2607_v44, %v6972_v2  ;;  %4816 = vmatpush1.bf16.msra.mxu0 %v4815_v8 }
 0x3ee   :  { %v5185_v0 = vpop.eup %5184  ;;  %5204 = vtanh.f32 %v2606_v52  ;;  %v2695_v12 = vadd.f32 %v2694_v46, %v6972_v2  ;;  %v2696_v22 = vpop.f32.mrb[47].mxu1  ;;  %4822 = vmatprep.subr.bf16.mxu1 %v4821_v15 }
 0x3ef   :  { %v5187_v18 = vpop.eup %5186  ;;  %5206 = vtanh.f32 %v2608_v56  ;;  %v2697_v36 = vadd.f32 %v2696_v22, %v6972_v2  ;;  %4824 = vmatpush1.bf16.msra.mxu1 %v4823_v25  ;;  %v2765_v45 = vpop.f32.mrb[48].mxu0 }
 0x3f0   :  { %v5189_v6 = vpop.eup %5188  ;;  %5208 = vtanh.f32 %v2695_v12  ;;  %v2766_v13 = vadd.f32 %v2765_v45, %v6946_v5  ;;  %v2767_v62 = vpop.f32.mrb[49].mxu0  ;;  %4649 = vmatmul.mubr.msk.f32.vlgmr.msra.gmra.mrb[64].mxu0 %vm1526_vm0, %v6991_v39 }
 0x3f1   :  { %v5191_v38 = vpop.eup %5190  ;;  %5210 = vtanh.f32 %v2697_v36  ;;  %v2768_v1 = vadd.f32 %v2767_v62, %v6946_v5  ;;  %v7003_v49 = vpop.permute.xlu1 %3134  ;;  %3218 = vmatprep.mubr.f32.mxu0 %v8223_v28  ;;  %v4827_v53 = vpack.c.bf16 %v5189_v6, %v5181_v14 }
 0x3f2   :  { %v5193_v29 = vpop.eup %5192  ;;  %4653 = vmatmul.mubr.msk.f32.vlgmr.msra.gmra.mrb[64].mxu1 %vm1526_vm0, %v6991_v39  ;;  %v4825_v23 = vpack.c.bf16 %v5191_v38, %v5183_v55  ;;  %5212 = vtanh.f32 %v2766_v13  ;;  %v7014_v58 = vpop.permute.xlu0 %3136 }
 0x3f3   :  { %v5195_v27 = vpop.eup %5194  ;;  %v2771_v33 = vpop.f32.mrb[50].mxu0  ;;  %3301 = vmatprep.mubr.f32.mxu1 %v8223_v28  ;;  %v4835_v4 = vpack.c.bf16 %v5193_v29, %v5185_v0  ;;  %5214 = vtanh.f32 %v2768_v1 }
 0x3f4   :  { %v5197_v54 = vpop.eup %5196  ;;  %v2772_v10 = vadd.f32 %v2771_v33, %v6955_v19  ;;  %v2773_v31 = vpop.f32.mrb[51].mxu0  ;;  %4650 = vmatmul.mubr.msk.f32.gmra.mrb[66].mxu0 %vm1526_vm0, %v7003_v49  ;;  %4826 = vmatprep.subr.bf16.mxu0 %v4825_v23  ;;  %v4833_v35 = vpack.c.bf16 %v5195_v27, %v5187_v18 }
 0x3f5   :  { %v5199_v59 = vpop.eup %5198  ;;  %v2774_v42 = vadd.f32 %v2773_v31, %v6955_v19  ;;  %4828 = vmatpush1.bf16.msra.mxu0 %v4827_v53  ;;  %3222 = vmatprep.mubr.f32.mxu0 %v8223_v28  ;;  %v7023_v40 = vpop.permute.xlu1 %3138 }
 0x3f6   :  { %v5201_v9 = vpop.eup %5200  ;;  %5216 = vtanh.f32 %v2772_v10  ;;  %4654 = vmatmul.mubr.msk.f32.gmra.mrb[66].mxu1 %vm1526_vm0, %v7003_v49  ;;  %4834 = vmatprep.subr.bf16.mxu1 %v4833_v35 }
 0x3f7   :  { %v5203_v47 = vpop.eup %5202  ;;  %5218 = vtanh.f32 %v2774_v42  ;;  %4836 = vmatpush1.bf16.msra.mxu1 %v4835_v4  ;;  %v2777_v24 = vpop.f32.mrb[52].mxu0  ;;  %3305 = vmatprep.mubr.f32.mxu1 %v8223_v28 }
 0x3f8   :  { %v5205_v16 = vpop.eup %5204  ;;  %v2778_v30 = vadd.f32 %v2777_v24, %v6966_v32  ;;  %v2779_v7 = vpop.f32.mrb[53].mxu0  ;;  %4651 = vmatmul.mubr.msk.f32.gmra.mrb[68].mxu0 %vm1526_vm0, %v7014_v58 }
 0x3f9   :  { %v5207_v21 = vpop.eup %5206  ;;  %v2780_v11 = vadd.f32 %v2779_v7, %v6966_v32  ;;  %3226 = vmatprep.mubr.f32.mxu0 %v8223_v28  ;;  %v4831_v48 = vpack.c.bf16 %v5205_v16, %v5197_v54 }
 0x3fa   :  { %v5209_v3 = vpop.eup %5208  ;;  %4655 = vmatmul.mubr.msk.f32.gmra.mrb[68].mxu1 %vm1526_vm0, %v7014_v58  ;;  %v4829_v57 = vpack.c.bf16 %v5207_v21, %v5199_v59  ;;  %5220 = vtanh.f32 %v2778_v30 }
 0x3fb   :  { %v5211_v50 = vpop.eup %5210  ;;  %v2783_v17 = vpop.f32.mrb[54].mxu0  ;;  %3309 = vmatprep.mubr.f32.mxu1 %v8223_v28  ;;  %v4839_v26 = vpack.c.bf16 %v5209_v3, %v5201_v9  ;;  %5222 = vtanh.f32 %v2780_v11 }
 0x3fc   :  { %v2784_v20 = vadd.f32 %v2783_v17, %v6972_v2  ;;  %v2785_v8 = vpop.f32.mrb[55].mxu0  ;;  %4652 = vmatmul.mubr.msk.f32.gmra.mrb[70].mxu0 %vm1526_vm0, %v7023_v40  ;;  %4830 = vmatprep.subr.bf16.mxu0 %v4829_v57  ;;  %v4837_v37 = vpack.c.bf16 %v5211_v50, %v5203_v47  ;;  %v5213_v63 = vpop.eup %5212 }
 0x3fd   :  { %v2786_v60 = vadd.f32 %v2785_v8, %v6972_v2  ;;  %4832 = vmatpush1.bf16.msra.mxu0 %v4831_v48  ;;  %3378 = vmatprep.mubr.f32.mxu0 %v8223_v28  ;;  %v5215_v43 = vpop.eup %5214 }
 0x3fe   :  { %5224 = vtanh.f32 %v2784_v20  ;;  %4656 = vmatmul.mubr.msk.f32.gmra.mrb[70].mxu1 %vm1526_vm0, %v7023_v40  ;;  %4838 = vmatprep.subr.bf16.mxu1 %v4837_v37 }
 0x3ff   :  { %5226 = vtanh.f32 %v2786_v60  ;;  %4840 = vmatpush1.bf16.msra.mxu1 %v4839_v26  ;;  %3461 = vmatprep.mubr.f32.mxu1 %v8223_v28 }
 0x400   :  { %v5217_v61 = vpop.eup %5216  ;;  %4657 = vmatmul.mubr.msk.f32.vlgmr.msra.gmra.mrb[72].mxu0 %vm1526_vm0, %v6991_v39 }
 0x401   :  { %v5219_v41 = vpop.eup %5218  ;;  %3384 = vmatprep.mubr.f32.mxu0 %v8223_v28  ;;  %v4843_v34 = vpack.c.bf16 %v5217_v61, %v5213_v63 }
 0x402   :  { %4661 = vmatmul.mubr.msk.f32.vlgmr.msra.gmra.mrb[72].mxu1 %vm1526_vm0, %v6991_v39  ;;  %v4841_v25 = vpack.c.bf16 %v5219_v41, %v5215_v43 }
 0x403   :  { %3467 = vmatprep.mubr.f32.mxu1 %v8223_v28 }
 0x404   :  { %4658 = vmatmul.mubr.msk.f32.gmra.mrb[74].mxu0 %vm1526_vm0, %v7003_v49  ;;  %4842 = vmatprep.subr.bf16.mxu0 %v4841_v25  ;;  %v5221_v14 = vpop.eup %5220 }
 0x405   :  { %4844 = vmatpush1.bf16.msra.mxu0 %v4843_v34  ;;  %3388 = vmatprep.mubr.f32.mxu0 %v8223_v28  ;;  %v5223_v52 = vpop.eup %5222 }
 0x406   :  { %4662 = vmatmul.mubr.msk.f32.gmra.mrb[74].mxu1 %vm1526_vm0, %v7003_v49 }
 0x407   :  { %3471 = vmatprep.mubr.f32.mxu1 %v8223_v28 }
 0x408   :  { %v5225_v44 = vpop.eup %5224  ;;  %4659 = vmatmul.mubr.msk.f32.gmra.mrb[76].mxu0 %vm1526_vm0, %v7014_v58 }
 0x409   :  { %v5227_v15 = vpop.eup %5226  ;;  %3392 = vmatprep.mubr.f32.mxu0 %v8223_v28  ;;  %v4847_v55 = vpack.c.bf16 %v5225_v44, %v5221_v14 }
 0x40a   :  { %v4845_v46 = vpack.c.bf16 %v5227_v15, %v5223_v52  ;;  %4663 = vmatmul.mubr.msk.f32.gmra.mrb[76].mxu1 %vm1526_vm0, %v7014_v58 }
 0x40b   :  { %3475 = vmatprep.mubr.f32.mxu1 %v8223_v28 }
 0x40c   :  { %4660 = vmatmul.mubr.msk.f32.gmra.mrb[78].mxu0 %vm1526_vm0, %v7023_v40  ;;  %4846 = vmatprep.subr.bf16.mxu0 %v4845_v46 }
 0x40d   :  { %4848 = vmatpush1.bf16.msra.mxu0 %v4847_v55  ;;  %3544 = vmatprep.mubr.f32.mxu0 %v8223_v28 }
 0x40e   :  { %4664 = vmatmul.mubr.msk.f32.gmra.mrb[78].mxu1 %vm1526_vm0, %v7023_v40 }
 0x40f   :  { %3627 = vmatprep.mubr.f32.mxu1 %v8223_v28 }
 0x410   :  { %4665 = vmatmul.mubr.msk.f32.vlgmr.msra.gmra.mrb[80].mxu0 %vm1526_vm0, %v6991_v39 }
 0x411   :  { %3550 = vmatprep.mubr.f32.mxu0 %v8223_v28 }
 0x414   :  { %4666 = vmatmul.mubr.msk.f32.gmra.mrb[82].mxu0 %vm1526_vm0, %v7003_v49 }
 0x415   :  { %3554 = vmatprep.mubr.f32.mxu0 %v8223_v28 }
 0x418   :  { %4667 = vmatmul.mubr.msk.f32.gmra.mrb[84].mxu0 %vm1526_vm0, %v7014_v58  ;;  %v2854_v56 = vpop.f32.mrb[48].mxu1 }
 0x419   :  { %3558 = vmatprep.mubr.f32.mxu0 %v8223_v28  ;;  %v2855_v0 = vadd.f32 %v2854_v56, %v6946_v5  ;;  %v2856_v12 = vpop.f32.mrb[49].mxu1 }
 0x41a   :  { %v2857_v22 = vadd.f32 %v2856_v12, %v6946_v5 }
 0x41b   :  { %5228 = vtanh.f32 %v2855_v0 }
 0x41c   :  { %4668 = vmatmul.mubr.msk.f32.gmra.mrb[86].mxu0 %vm1526_vm0, %v7023_v40  ;;  %v2860_v18 = vpop.f32.mrb[50].mxu1  ;;  %5230 = vtanh.f32 %v2857_v22 }
 0x41d   :  { %3710 = vmatprep.mubr.f32.mxu0 %v8223_v28  ;;  %v2861_v36 = vadd.f32 %v2860_v18, %v6955_v19  ;;  %v2862_v45 = vpop.f32.mrb[51].mxu1 }
 0x41e   :  { %v2863_v6 = vadd.f32 %v2862_v45, %v6955_v19 }
 0x41f   :  { %5232 = vtanh.f32 %v2861_v36 }
 0x420   :  { %5234 = vtanh.f32 %v2863_v6  ;;  %v2866_v13 = vpop.f32.mrb[52].mxu1 }
 0x421   :  { %v2867_v62 = vadd.f32 %v2866_v13, %v6966_v32  ;;  %v2868_v38 = vpop.f32.mrb[53].mxu1 }
 0x422   :  { %v2869_v1 = vadd.f32 %v2868_v38, %v6966_v32 }
 0x423   :  { %5236 = vtanh.f32 %v2867_v62 }
 0x424   :  { %v2872_v53 = vpop.f32.mrb[54].mxu1  ;;  %5238 = vtanh.f32 %v2869_v1 }
 0x425   :  { %v2873_v29 = vadd.f32 %v2872_v53, %v6972_v2  ;;  %v2874_v23 = vpop.f32.mrb[55].mxu1  ;;  %v5229_v33 = vpop.eup %5228 }
 0x426   :  { %v2875_v27 = vadd.f32 %v2874_v23, %v6972_v2  ;;  %v5231_v4 = vpop.eup %5230 }
 0x427   :  { %5240 = vtanh.f32 %v2873_v29 }
 0x428   :  { %5242 = vtanh.f32 %v2875_v27 }
 0x429   :  { %v5233_v54 = vpop.eup %5232 }
 0x42a   :  { %v5235_v10 = vpop.eup %5234  ;;  %v4851_v31 = vpack.c.bf16 %v5233_v54, %v5229_v33 }
 0x42b   :  { %v4849_v35 = vpack.c.bf16 %v5235_v10, %v5231_v4 }
 0x42d   :  { %4850 = vmatprep.subr.bf16.mxu1 %v4849_v35  ;;  %v5237_v59 = vpop.eup %5236 }
 0x42e   :  { %4852 = vmatpush1.bf16.msra.mxu1 %v4851_v31  ;;  %v5239_v42 = vpop.eup %5238 }
 0x431   :  { %v5241_v9 = vpop.eup %5240 }
 0x432   :  { %v5243_v47 = vpop.eup %5242  ;;  %v4855_v24 = vpack.c.bf16 %v5241_v9, %v5237_v59 }
 0x433   :  { %v4853_v16 = vpack.c.bf16 %v5243_v47, %v5239_v42 }
 0x435   :  { %4854 = vmatprep.subr.bf16.mxu1 %v4853_v16 }
 0x436   :  { %4856 = vmatpush1.bf16.msra.mxu1 %v4855_v24 }
 0x439   :  { %4669 = vmatmul.mubr.msk.f32.vlgmr.msra.gmra.mrb[80].mxu1 %vm1526_vm0, %v6991_v39 }
 0x43a   :  { %3633 = vmatprep.mubr.f32.mxu1 %v8223_v28 }
 0x43d   :  { %4670 = vmatmul.mubr.msk.f32.gmra.mrb[82].mxu1 %vm1526_vm0, %v7003_v49 }
 0x43e   :  { %3637 = vmatprep.mubr.f32.mxu1 %v8223_v28 }
 0x441   :  { %4671 = vmatmul.mubr.msk.f32.gmra.mrb[84].mxu1 %vm1526_vm0, %v7014_v58 }
 0x442   :  { %3641 = vmatprep.mubr.f32.mxu1 %v8223_v28 }
 0x445   :  { %4672 = vmatmul.mubr.msk.f32.gmra.mrb[86].mxu1 %vm1526_vm0, %v7023_v40 }
 0x446   :  { %3793 = vmatprep.mubr.f32.mxu1 %v8223_v28 }
 0x44f   :  { %v2943_v30 = vpop.f32.mrb[56].mxu0 }
 0x450   :  { %v2944_v7 = vadd.f32 %v2943_v30, %v6946_v5  ;;  %v2945_v21 = vpop.f32.mrb[57].mxu0 }
 0x451   :  { %v2946_v11 = vadd.f32 %v2945_v21, %v6946_v5 }
 0x452   :  { %5244 = vtanh.f32 %v2944_v7 }
 0x453   :  { %v2949_v48 = vpop.f32.mrb[58].mxu0  ;;  %5246 = vtanh.f32 %v2946_v11 }
 0x454   :  { %v2950_v3 = vadd.f32 %v2949_v48, %v6955_v19  ;;  %v2951_v57 = vpop.f32.mrb[59].mxu0 }
 0x455   :  { %v2952_v50 = vadd.f32 %v2951_v57, %v6955_v19 }
 0x456   :  { %5248 = vtanh.f32 %v2950_v3 }
 0x457   :  { %5250 = vtanh.f32 %v2952_v50  ;;  %v2955_v17 = vpop.f32.mrb[60].mxu0 }
 0x458   :  { %v2956_v26 = vadd.f32 %v2955_v17, %v6966_v32  ;;  %v2957_v20 = vpop.f32.mrb[61].mxu0 }
 0x459   :  { %v2958_v8 = vadd.f32 %v2957_v20, %v6966_v32 }
 0x45a   :  { %5252 = vtanh.f32 %v2956_v26 }
 0x45b   :  { %v2961_v37 = vpop.f32.mrb[62].mxu0  ;;  %5254 = vtanh.f32 %v2958_v8 }
 0x45c   :  { %v2962_v60 = vadd.f32 %v2961_v37, %v6972_v2  ;;  %v2963_v63 = vpop.f32.mrb[63].mxu0  ;;  %v5245_v61 = vpop.eup %5244 }
 0x45d   :  { %v2964_v43 = vadd.f32 %v2963_v63, %v6972_v2  ;;  %v5247_v41 = vpop.eup %5246 }
 0x45e   :  { %5256 = vtanh.f32 %v2962_v60 }
 0x45f   :  { %5258 = vtanh.f32 %v2964_v43 }
 0x460   :  { %v5249_v34 = vpop.eup %5248 }
 0x461   :  { %v5251_v25 = vpop.eup %5250  ;;  %v4859_v14 = vpack.c.bf16 %v5249_v34, %v5245_v61 }
 0x462   :  { %v4857_v52 = vpack.c.bf16 %v5251_v25, %v5247_v41 }
 0x464   :  { %4858 = vmatprep.subr.bf16.mxu0 %v4857_v52  ;;  %v5253_v44 = vpop.eup %5252 }
 0x465   :  { %4860 = vmatpush1.bf16.msra.mxu0 %v4859_v14  ;;  %v5255_v15 = vpop.eup %5254 }
 0x468   :  { %v5257_v55 = vpop.eup %5256 }
 0x469   :  { %v5259_v46 = vpop.eup %5258  ;;  %v4863_v56 = vpack.c.bf16 %v5257_v55, %v5253_v44 }
 0x46a   :  { %v4861_v0 = vpack.c.bf16 %v5259_v46, %v5255_v15 }
 0x46c   :  { %4862 = vmatprep.subr.bf16.mxu0 %v4861_v0 }
 0x46d   :  { %4864 = vmatpush1.bf16.msra.mxu0 %v4863_v56 }
 0x470   :  { %4673 = vmatmul.mubr.msk.f32.vlgmr.msra.gmra.mrb[88].mxu0 %vm1526_vm0, %v6991_v39 }
 0x471   :  { %3716 = vmatprep.mubr.f32.mxu0 %v8223_v28 }
 0x474   :  { %4674 = vmatmul.mubr.msk.f32.gmra.mrb[90].mxu0 %vm1526_vm0, %v7003_v49 }
 0x475   :  { %3720 = vmatprep.mubr.f32.mxu0 %v8223_v28 }
 0x478   :  { %4675 = vmatmul.mubr.msk.f32.gmra.mrb[92].mxu0 %vm1526_vm0, %v7014_v58 }
 0x479   :  { %3724 = vmatprep.mubr.f32.mxu0 %v8223_v28 }
 0x47c   :  { %4676 = vmatmul.mubr.msk.f32.gmra.mrb[94].mxu0 %vm1526_vm0, %v7023_v40 }
 0x499   :  { %v3032_v12 = vpop.f32.mrb[56].mxu1 }
 0x49a   :  { %v3033_v22 = vadd.f32 %v3032_v12, %v6946_v5  ;;  %v3034_v18 = vpop.f32.mrb[57].mxu1 }
 0x49b   :  { %v3035_v36 = vadd.f32 %v3034_v18, %v6946_v5 }
 0x49c   :  { %5260 = vtanh.f32 %v3033_v22 }
 0x49d   :  { %v3038_v45 = vpop.f32.mrb[58].mxu1  ;;  %5262 = vtanh.f32 %v3035_v36 }
 0x49e   :  { %v3039_v6 = vadd.f32 %v3038_v45, %v6955_v19  ;;  %v3040_v13 = vpop.f32.mrb[59].mxu1 }
 0x49f   :  { %v3041_v62 = vadd.f32 %v3040_v13, %v6955_v19 }
 0x4a0   :  { %5264 = vtanh.f32 %v3039_v6 }
 0x4a1   :  { %5266 = vtanh.f32 %v3041_v62  ;;  %v3044_v38 = vpop.f32.mrb[60].mxu1 }
 0x4a2   :  { %v3045_v1 = vadd.f32 %v3044_v38, %v6966_v32  ;;  %v3046_v53 = vpop.f32.mrb[61].mxu1 }
 0x4a3   :  { %v3047_v29 = vadd.f32 %v3046_v53, %v6966_v32 }
 0x4a4   :  { %5268 = vtanh.f32 %v3045_v1 }
 0x4a5   :  { %v3050_v23 = vpop.f32.mrb[62].mxu1  ;;  %5270 = vtanh.f32 %v3047_v29 }
 0x4a6   :  { %v3051_v5 = vadd.f32 %v3050_v23, %v6972_v2  ;;  %v3052_v27 = vpop.f32.mrb[63].mxu1  ;;  %v5261_v4 = vpop.eup %5260 }
 0x4a7   :  { %v3053_v33 = vadd.f32 %v3052_v27, %v6972_v2  ;;  %v5263_v54 = vpop.eup %5262 }
 0x4a8   :  { %5272 = vtanh.f32 %v3051_v5 }
 0x4a9   :  { %5274 = vtanh.f32 %v3053_v33 }
 0x4aa   :  { %v5265_v19 = vpop.eup %5264 }
 0x4ab   :  { %v5267_v10 = vpop.eup %5266  ;;  %v4867_v31 = vpack.c.bf16 %v5265_v19, %v5261_v4 }
 0x4ac   :  { %v4865_v35 = vpack.c.bf16 %v5267_v10, %v5263_v54 }
 0x4ae   :  { %4866 = vmatprep.subr.bf16.mxu1 %v4865_v35  ;;  %v5269_v59 = vpop.eup %5268 }
 0x4af   :  { %4868 = vmatpush1.bf16.msra.mxu1 %v4867_v31  ;;  %v5271_v32 = vpop.eup %5270 }
 0x4b2   :  { %v5273_v42 = vpop.eup %5272 }
 0x4b3   :  { %v5275_v9 = vpop.eup %5274  ;;  %v4871_v47 = vpack.c.bf16 %v5273_v42, %v5269_v59 }
 0x4b4   :  { %v4869_v24 = vpack.c.bf16 %v5275_v9, %v5271_v32 }
 0x4b6   :  { %4870 = vmatprep.subr.bf16.mxu1 %v4869_v24 }
 0x4b7   :  { %4872 = vmatpush1.bf16.msra.mxu1 %v4871_v47 }
 0x4ba   :  { %4677 = vmatmul.mubr.msk.f32.vlgmr.msra.gmra.mrb[88].mxu1 %vm1526_vm0, %v6991_v39 }
 0x4bb   :  { %3799 = vmatprep.mubr.f32.mxu1 %v8223_v28 }
 0x4be   :  { %4678 = vmatmul.mubr.msk.f32.gmra.mrb[90].mxu1 %vm1526_vm0, %v7003_v49 }
 0x4bf   :  { %3803 = vmatprep.mubr.f32.mxu1 %v8223_v28 }
 0x4c2   :  { %4679 = vmatmul.mubr.msk.f32.gmra.mrb[92].mxu1 %vm1526_vm0, %v7014_v58 }
 0x4c3   :  { %v3214_v2 = vpop.f32.mrb[64].mxu0  ;;  %3807 = vmatprep.mubr.f32.mxu1 %v8223_v28 }
 0x4c4   :  { %v3215_v16 = vadd.f32 %v3214_v2, %v6997_v51  ;;  %v3216_v30 = vpop.f32.mrb[65].mxu0 }
 0x4c5   :  { %v3297_v7 = vpop.f32.mrb[64].mxu1  ;;  %v3217_v21 = vadd.f32 %v3216_v30, %v6997_v51 }
 0x4c6   :  { %v3299_v39 = vpop.f32.mrb[65].mxu1  ;;  %3812 = vxpose.xlu0.b32.start.end [1/1] (short) %v3215_v16, 128  ;;  %4680 = vmatmul.mubr.msk.f32.gmra.mrb[94].mxu1 %vm1526_vm0, %v7023_v40  ;;  %v3298_v62 = vadd.f32 %v3297_v7, %v6997_v51 }
 0x4c7   :  { %3844 = vxpose.xlu1.b32.start.end [1/1] (short) %v3217_v21, 128  ;;  %v3220_v49 = vpop.f32.mrb[66].mxu0  ;;  %v3300_v38 = vadd.f32 %v3299_v39, %v6997_v51 }
 0x4c8   :  { %v3221_v11 = vpop.f32.mrb[67].mxu0 }
 0x4c9   :  { %v3303_v48 = vpop.f32.mrb[66].mxu1 }
 0x4ca   :  { %v3304_v3 = vpop.f32.mrb[67].mxu1 }
 0x4cb   :  { %v3224_v58 = vpop.f32.mrb[68].mxu0 }
 0x4cc   :  { %v3225_v57 = vpop.f32.mrb[69].mxu0 }
 0x4cd   :  { %v3307_v50 = vpop.f32.mrb[68].mxu1 }
 0x4ce   :  { %v3308_v28 = vpop.f32.mrb[69].mxu1 }
 0x4cf   :  { %v3228_v17 = vpop.f32.mrb[70].mxu0 }
 0x4d0   :  { %v3229_v26 = vpop.f32.mrb[71].mxu0 }
 0x4d1   :  { %v3311_v20 = vpop.f32.mrb[70].mxu1 }
 0x4d2   :  { %v3312_v8 = vpop.f32.mrb[71].mxu1 }
 0x4d3   :  { %v3380_v37 = vpop.f32.mrb[72].mxu0 }
 0x4d4   :  { %v3382_v60 = vpop.f32.mrb[73].mxu0  ;;  %v3381_v54 = vadd.f32 %v3380_v37, %v6997_v51 }
 0x4d5   :  { %v7133_v63 = vpop.f32.mrb[72].mxu1  ;;  %v3383_v19 = vadd.f32 %v3382_v60, %v6997_v51 }
 0x4d6   :  { %v7135_v43 = vpop.f32.mrb[73].mxu1 }
 0x4d7   :  { %v3386_v40 = vpop.f32.mrb[74].mxu0 }
 0x4d8   :  { %v3387_v61 = vpop.f32.mrb[75].mxu0 }
 0x4d9   :  { %v3469_v41 = vpop.f32.mrb[74].mxu1 }
 0x4da   :  { %v3470_v34 = vpop.f32.mrb[75].mxu1 }
 0x4db   :  { %v3390_v25 = vpop.f32.mrb[76].mxu0 }
 0x4dc   :  { %v3391_v14 = vpop.f32.mrb[77].mxu0 }
 0x4dd   :  { %v3473_v52 = vpop.f32.mrb[76].mxu1 }
 0x4de   :  { %v3474_v44 = vpop.f32.mrb[77].mxu1 }
 0x4df   :  { %v3394_v15 = vpop.f32.mrb[78].mxu0  ;;  %v3464_v44 = vadd.f32 %v7133_v63, %v6997_v51 }
 0x4e0   :  { %v3395_v55 = vpop.f32.mrb[79].mxu0  ;;  %v3466_v15 = vadd.f32 %v7135_v43, %v6997_v51 }
 0x4e1   :  { %v3477_v46 = vpop.f32.mrb[78].mxu1 }
 0x4e2   :  { %v3478_v56 = vpop.f32.mrb[79].mxu1 }
 0x4e3   :  { %v7137_v0 = vpop.f32.mrb[80].mxu0 }
 0x4e4   :  { %v7139_v12 = vpop.f32.mrb[81].mxu0 }
 0x4e7   :  { %v3552_v22 = vpop.f32.mrb[82].mxu0 }
 0x4e8   :  { %v3553_v18 = vpop.f32.mrb[83].mxu0 }
 0x4eb   :  { %v3556_v36 = vpop.f32.mrb[84].mxu0 }
 0x4ec   :  { %v3557_v45 = vpop.f32.mrb[85].mxu0 }
 0x4ef   :  { %v3560_v6 = vpop.f32.mrb[86].mxu0 }
 0x4f0   :  { %v3561_v13 = vpop.f32.mrb[87].mxu0 }
 0x503   :  { %3876 = vxpose.xlu0.b32.start.end [1/1] (short) %v3298_v62, 128 }
 0x504   :  { %3908 = vxpose.xlu1.b32.start.end [1/1] (short) %v3300_v38, 128 }
 0x50c   :  { %v7143_v1 = vpop.f32.mrb[80].mxu1 }
 0x50d   :  { %v7145_v53 = vpop.f32.mrb[81].mxu1 }
 0x510   :  { %v3635_v29 = vpop.f32.mrb[82].mxu1 }
 0x511   :  { %v3636_v23 = vpop.f32.mrb[83].mxu1 }
 0x514   :  { %v3639_v5 = vpop.f32.mrb[84].mxu1 }
 0x515   :  { %v3640_v27 = vpop.f32.mrb[85].mxu1 }
 0x518   :  { %v3643_v33 = vpop.f32.mrb[86].mxu1 }
 0x519   :  { %v3644_v4 = vpop.f32.mrb[87].mxu1 }
 0x540   :  { %3940 = vxpose.xlu0.b32.start.end [1/1] (short) %v3381_v54, 128 }
 0x541   :  { %3972 = vxpose.xlu1.b32.start.end [1/1] (short) %v3383_v19, 128 }
 0x543   :  { %v7149_v10 = vpop.f32.mrb[88].mxu0 }
 0x544   :  { %v7151_v31 = vpop.f32.mrb[89].mxu0 }
 0x546   :  { %v3828_v35 = vpop.trf.xlu0 }
 0x547   :  { %4325 = vst.msk [vmem:[%s8204_s3] sm:$0xff] %vm4324_vm1, %v3828_v35  ;;  %v3860_v59 = vpop.trf.xlu1  ;;  %v3718_v32 = vpop.f32.mrb[90].mxu0 }
 0x548   :  { %4341 = vst.msk [vmem:[%s8204_s3 + $0x80] sm:$0xff] %vm4324_vm1, %v3860_v59  ;;  %v3719_v42 = vpop.f32.mrb[91].mxu0 }
 0x54a   :  { %v3829_v9 = vpop.trf.xlu0 }
 0x54b   :  { %4326 = vst.msk [vmem:[%s8204_s3 + $0x8] sm:$0xff] %vm4324_vm1, %v3829_v9  ;;  %v3861_v47 = vpop.trf.xlu1  ;;  %v3722_v24 = vpop.f32.mrb[92].mxu0 }
 0x54c   :  { %4342 = vst.msk [vmem:[%s8204_s3 + $0x88] sm:$0xff] %vm4324_vm1, %v3861_v47  ;;  %v3723_v2 = vpop.f32.mrb[93].mxu0 }
 0x54e   :  { %v3830_v16 = vpop.trf.xlu0 }
 0x54f   :  { %4327 = vst.msk [vmem:[%s8204_s3 + $0x10] sm:$0xff] %vm4324_vm1, %v3830_v16  ;;  %v3862_v30 = vpop.trf.xlu1  ;;  %v3726_v7 = vpop.f32.mrb[94].mxu0 }
 0x550   :  { %4343 = vst.msk [vmem:[%s8204_s3 + $0x90] sm:$0xff] %vm4324_vm1, %v3862_v30  ;;  %v3727_v21 = vpop.f32.mrb[95].mxu0 }
 0x552   :  { %v3831_v39 = vpop.trf.xlu0 }
 0x553   :  { %4328 = vst.msk [vmem:[%s8204_s3 + $0x18] sm:$0xff] %vm4324_vm1, %v3831_v39  ;;  %v3863_v49 = vpop.trf.xlu1 }
 0x554   :  { %4344 = vst.msk [vmem:[%s8204_s3 + $0x98] sm:$0xff] %vm4324_vm1, %v3863_v49 }
 0x556   :  { %v3832_v11 = vpop.trf.xlu0 }
 0x557   :  { %4329 = vst.msk [vmem:[%s8204_s3 + $0x20] sm:$0xff] %vm4324_vm1, %v3832_v11  ;;  %v3864_v48 = vpop.trf.xlu1 }
 0x558   :  { %4345 = vst.msk [vmem:[%s8204_s3 + $0xa0] sm:$0xff] %vm4324_vm1, %v3864_v48 }
 0x55a   :  { %v3833_v3 = vpop.trf.xlu0 }
 0x55b   :  { %4330 = vst.msk [vmem:[%s8204_s3 + $0x28] sm:$0xff] %vm4324_vm1, %v3833_v3  ;;  %v3865_v58 = vpop.trf.xlu1 }
 0x55c   :  { %4346 = vst.msk [vmem:[%s8204_s3 + $0xa8] sm:$0xff] %vm4324_vm1, %v3865_v58 }
 0x55e   :  { %v3834_v57 = vpop.trf.xlu0 }
 0x55f   :  { %4331 = vst.msk [vmem:[%s8204_s3 + $0x30] sm:$0xff] %vm4324_vm1, %v3834_v57  ;;  %v3866_v50 = vpop.trf.xlu1 }
 0x560   :  { %4347 = vst.msk [vmem:[%s8204_s3 + $0xb0] sm:$0xff] %vm4324_vm1, %v3866_v50  ;;  %v3547_v50 = vadd.f32 %v7137_v0, %v6997_v51 }
 0x562   :  { %v3835_v28 = vpop.trf.xlu0 }
 0x563   :  { %4332 = vst.msk [vmem:[%s8204_s3 + $0x38] sm:$0xff] %vm4324_vm1, %v3835_v28  ;;  %v3867_v17 = vpop.trf.xlu1  ;;  %v3549_v28 = vadd.f32 %v7139_v12, %v6997_v51 }
 0x564   :  { %4348 = vst.msk [vmem:[%s8204_s3 + $0xb8] sm:$0xff] %vm4324_vm1, %v3867_v17 }
 0x566   :  { %v3836_v26 = vpop.trf.xlu0 }
 0x567   :  { %4333 = vst.msk [vmem:[%s8204_s3 + $0x40] sm:$0xff] %vm4324_vm1, %v3836_v26  ;;  %v3868_v20 = vpop.trf.xlu1 }
 0x568   :  { %4349 = vst.msk [vmem:[%s8204_s3 + $0xc0] sm:$0xff] %vm4324_vm1, %v3868_v20 }
 0x56a   :  { %v3837_v8 = vpop.trf.xlu0 }
 0x56b   :  { %4334 = vst.msk [vmem:[%s8204_s3 + $0x48] sm:$0xff] %vm4324_vm1, %v3837_v8  ;;  %v3869_v37 = vpop.trf.xlu1 }
 0x56c   :  { %4350 = vst.msk [vmem:[%s8204_s3 + $0xc8] sm:$0xff] %vm4324_vm1, %v3869_v37 }
 0x56e   :  { %v3838_v60 = vpop.trf.xlu0 }
 0x56f   :  { %4335 = vst.msk [vmem:[%s8204_s3 + $0x50] sm:$0xff] %vm4324_vm1, %v3838_v60  ;;  %v3870_v40 = vpop.trf.xlu1 }
 0x570   :  { %4351 = vst.msk [vmem:[%s8204_s3 + $0xd0] sm:$0xff] %vm4324_vm1, %v3870_v40 }
 0x572   :  { %v3839_v61 = vpop.trf.xlu0 }
 0x573   :  { %4336 = vst.msk [vmem:[%s8204_s3 + $0x58] sm:$0xff] %vm4324_vm1, %v3839_v61  ;;  %v3871_v41 = vpop.trf.xlu1 }
 0x574   :  { %4352 = vst.msk [vmem:[%s8204_s3 + $0xd8] sm:$0xff] %vm4324_vm1, %v3871_v41 }
 0x576   :  { %v3840_v34 = vpop.trf.xlu0 }
 0x577   :  { %4337 = vst.msk [vmem:[%s8204_s3 + $0x60] sm:$0xff] %vm4324_vm1, %v3840_v34  ;;  %v3872_v25 = vpop.trf.xlu1 }
 0x578   :  { %4353 = vst.msk [vmem:[%s8204_s3 + $0xe0] sm:$0xff] %vm4324_vm1, %v3872_v25 }
 0x57a   :  { %v3841_v14 = vpop.trf.xlu0 }
 0x57b   :  { %4338 = vst.msk [vmem:[%s8204_s3 + $0x68] sm:$0xff] %vm4324_vm1, %v3841_v14  ;;  %v3873_v52 = vpop.trf.xlu1 }
 0x57c   :  { %4354 = vst.msk [vmem:[%s8204_s3 + $0xe8] sm:$0xff] %vm4324_vm1, %v3873_v52 }
 0x57e   :  { %v3842_v55 = vpop.trf.xlu0  ;;  %4004 = vxpose.xlu0.b32.start.end [1/1] (short) %v3464_v44, 128 }
 0x57f   :  { %4339 = vst.msk [vmem:[%s8204_s3 + $0x70] sm:$0xff] %vm4324_vm1, %v3842_v55  ;;  %v3874_v46 = vpop.trf.xlu1  ;;  %4036 = vxpose.xlu1.b32.start.end [1/1] (short) %v3466_v15, 128 }
 0x580   :  { %4355 = vst.msk [vmem:[%s8204_s3 + $0xf0] sm:$0xff] %vm4324_vm1, %v3874_v46 }
 0x582   :  { %v3843_v63 = vpop.trf.xlu0 }
 0x583   :  { %4340 = vst.msk [vmem:[%s8204_s3 + $0x78] sm:$0xff] %vm4324_vm1, %v3843_v63  ;;  %v3875_v43 = vpop.trf.xlu1 }
 0x584   :  { %4356 = vst.msk [vmem:[%s8204_s3 + $0xf8] sm:$0xff] %vm4324_vm1, %v3875_v43 }
 0x586   :  { %v3892_v56 = vpop.trf.xlu0 }
 0x587   :  { %4357 = vst.msk [vmem:[%s8204_s3 + $0x100] sm:$0xff] %vm4324_vm1, %v3892_v56  ;;  %v3924_v22 = vpop.trf.xlu1 }
 0x588   :  { %4373 = vst.msk [vmem:[%s8204_s3 + $0x180] sm:$0xff] %vm4324_vm1, %v3924_v22 }
 0x58a   :  { %v3893_v18 = vpop.trf.xlu0 }
 0x58b   :  { %4358 = vst.msk [vmem:[%s8204_s3 + $0x108] sm:$0xff] %vm4324_vm1, %v3893_v18  ;;  %v3925_v36 = vpop.trf.xlu1 }
 0x58c   :  { %4374 = vst.msk [vmem:[%s8204_s3 + $0x188] sm:$0xff] %vm4324_vm1, %v3925_v36 }
 0x58d   :  { %v7301_v45 = vpop.f32.mrb[88].mxu1 }
 0x58e   :  { %v7303_v6 = vpop.f32.mrb[89].mxu1  ;;  %v3894_v13 = vpop.trf.xlu0 }
 0x58f   :  { %4359 = vst.msk [vmem:[%s8204_s3 + $0x110] sm:$0xff] %vm4324_vm1, %v3894_v13  ;;  %v3926_v62 = vpop.trf.xlu1 }
 0x590   :  { %4375 = vst.msk [vmem:[%s8204_s3 + $0x190] sm:$0xff] %vm4324_vm1, %v3926_v62 }
 0x591   :  { %v3801_v38 = vpop.f32.mrb[90].mxu1 }
 0x592   :  { %v3802_v29 = vpop.f32.mrb[91].mxu1  ;;  %v3895_v23 = vpop.trf.xlu0 }
 0x593   :  { %4360 = vst.msk [vmem:[%s8204_s3 + $0x118] sm:$0xff] %vm4324_vm1, %v3895_v23  ;;  %v3927_v5 = vpop.trf.xlu1 }
 0x594   :  { %4376 = vst.msk [vmem:[%s8204_s3 + $0x198] sm:$0xff] %vm4324_vm1, %v3927_v5 }
 0x595   :  { %v3805_v27 = vpop.f32.mrb[92].mxu1 }
 0x596   :  { %v3806_v33 = vpop.f32.mrb[93].mxu1  ;;  %v3896_v4 = vpop.trf.xlu0 }
 0x597   :  { %4361 = vst.msk [vmem:[%s8204_s3 + $0x120] sm:$0xff] %vm4324_vm1, %v3896_v4  ;;  %v3928_v54 = vpop.trf.xlu1  ;;  %v3630_v33 = vadd.f32 %v7143_v1, %v6997_v51  ;;  %v3632_v4 = vadd.f32 %v7145_v53, %v6997_v51 }
 0x598   :  { %4377 = vst.msk [vmem:[%s8204_s3 + $0x1a0] sm:$0xff] %vm4324_vm1, %v3928_v54 }
 0x599   :  { %v3809_v19 = vpop.f32.mrb[94].mxu1 }
 0x59a   :  { %v3810_v35 = vpop.f32.mrb[95].mxu1  ;;  %v3897_v59 = vpop.trf.xlu0 }
 0x59b   :  { %4362 = vst.msk [vmem:[%s8204_s3 + $0x128] sm:$0xff] %vm4324_vm1, %v3897_v59  ;;  %v3929_v32 = vpop.trf.xlu1 }
 0x59c   :  { %4378 = vst.msk [vmem:[%s8204_s3 + $0x1a8] sm:$0xff] %vm4324_vm1, %v3929_v32 }
 0x59e   :  { %v3898_v42 = vpop.trf.xlu0 }
 0x59f   :  { %4363 = vst.msk [vmem:[%s8204_s3 + $0x130] sm:$0xff] %vm4324_vm1, %v3898_v42  ;;  %v3930_v9 = vpop.trf.xlu1 }
 0x5a0   :  { %4379 = vst.msk [vmem:[%s8204_s3 + $0x1b0] sm:$0xff] %vm4324_vm1, %v3930_v9 }
 0x5a2   :  { %v3899_v47 = vpop.trf.xlu0 }
 0x5a3   :  { %4364 = vst.msk [vmem:[%s8204_s3 + $0x138] sm:$0xff] %vm4324_vm1, %v3899_v47  ;;  %v3931_v24 = vpop.trf.xlu1 }
 0x5a4   :  { %4380 = vst.msk [vmem:[%s8204_s3 + $0x1b8] sm:$0xff] %vm4324_vm1, %v3931_v24 }
 0x5a6   :  { %v3900_v2 = vpop.trf.xlu0 }
 0x5a7   :  { %4365 = vst.msk [vmem:[%s8204_s3 + $0x140] sm:$0xff] %vm4324_vm1, %v3900_v2  ;;  %v3932_v16 = vpop.trf.xlu1 }
 0x5a8   :  { %4381 = vst.msk [vmem:[%s8204_s3 + $0x1c0] sm:$0xff] %vm4324_vm1, %v3932_v16 }
 0x5aa   :  { %v3901_v30 = vpop.trf.xlu0 }
 0x5ab   :  { %4366 = vst.msk [vmem:[%s8204_s3 + $0x148] sm:$0xff] %vm4324_vm1, %v3901_v30  ;;  %v3933_v7 = vpop.trf.xlu1 }
 0x5ac   :  { %4382 = vst.msk [vmem:[%s8204_s3 + $0x1c8] sm:$0xff] %vm4324_vm1, %v3933_v7 }
 0x5ae   :  { %v3902_v21 = vpop.trf.xlu0 }
 0x5af   :  { %4367 = vst.msk [vmem:[%s8204_s3 + $0x150] sm:$0xff] %vm4324_vm1, %v3902_v21  ;;  %v3934_v39 = vpop.trf.xlu1 }
 0x5b0   :  { %4383 = vst.msk [vmem:[%s8204_s3 + $0x1d0] sm:$0xff] %vm4324_vm1, %v3934_v39 }
 0x5b2   :  { %v3903_v49 = vpop.trf.xlu0 }
 0x5b3   :  { %4368 = vst.msk [vmem:[%s8204_s3 + $0x158] sm:$0xff] %vm4324_vm1, %v3903_v49  ;;  %v3935_v11 = vpop.trf.xlu1 }
 0x5b4   :  { %4384 = vst.msk [vmem:[%s8204_s3 + $0x1d8] sm:$0xff] %vm4324_vm1, %v3935_v11 }
 0x5b6   :  { %v3904_v48 = vpop.trf.xlu0 }
 0x5b7   :  { %4369 = vst.msk [vmem:[%s8204_s3 + $0x160] sm:$0xff] %vm4324_vm1, %v3904_v48  ;;  %v3936_v3 = vpop.trf.xlu1 }
 0x5b8   :  { %4385 = vst.msk [vmem:[%s8204_s3 + $0x1e0] sm:$0xff] %vm4324_vm1, %v3936_v3 }
 0x5ba   :  { %v3905_v58 = vpop.trf.xlu0 }
 0x5bb   :  { %4370 = vst.msk [vmem:[%s8204_s3 + $0x168] sm:$0xff] %vm4324_vm1, %v3905_v58  ;;  %v3937_v57 = vpop.trf.xlu1 }
 0x5bc   :  { %4386 = vst.msk [vmem:[%s8204_s3 + $0x1e8] sm:$0xff] %vm4324_vm1, %v3937_v57 }
 0x5be   :  { %v3906_v17 = vpop.trf.xlu0  ;;  %4068 = vxpose.xlu0.b32.start.end [1/1] (short) %v3547_v50, 128 }
 0x5bf   :  { %4371 = vst.msk [vmem:[%s8204_s3 + $0x170] sm:$0xff] %vm4324_vm1, %v3906_v17  ;;  %v3938_v26 = vpop.trf.xlu1  ;;  %4100 = vxpose.xlu1.b32.start.end [1/1] (short) %v3549_v28, 128 }
 0x5c0   :  { %4387 = vst.msk [vmem:[%s8204_s3 + $0x1f0] sm:$0xff] %vm4324_vm1, %v3938_v26 }
 0x5c2   :  { %v3907_v0 = vpop.trf.xlu0 }
 0x5c3   :  { %4372 = vst.msk [vmem:[%s8204_s3 + $0x178] sm:$0xff] %vm4324_vm1, %v3907_v0  ;;  %v3939_v12 = vpop.trf.xlu1 }
 0x5c4   :  { %4388 = vst.msk [vmem:[%s8204_s3 + $0x1f8] sm:$0xff] %vm4324_vm1, %v3939_v12 }
 0x5c6   :  { %v3956_v20 = vpop.trf.xlu0 }
 0x5c7   :  { %4389 = vst.msk [vmem:[%s8204_s3 + $0x200] sm:$0xff] %vm4324_vm1, %v3956_v20  ;;  %v3988_v8 = vpop.trf.xlu1 }
 0x5c8   :  { %4405 = vst.msk [vmem:[%s8204_s3 + $0x280] sm:$0xff] %vm4324_vm1, %v3988_v8 }
 0x5ca   :  { %v3957_v37 = vpop.trf.xlu0 }
 0x5cb   :  { %4390 = vst.msk [vmem:[%s8204_s3 + $0x208] sm:$0xff] %vm4324_vm1, %v3957_v37  ;;  %v3989_v60 = vpop.trf.xlu1 }
 0x5cc   :  { %4406 = vst.msk [vmem:[%s8204_s3 + $0x288] sm:$0xff] %vm4324_vm1, %v3989_v60  ;;  %v3713_v60 = vadd.f32 %v7149_v10, %v6997_v51 }
 0x5ce   :  { %v3958_v40 = vpop.trf.xlu0 }
 0x5cf   :  { %4391 = vst.msk [vmem:[%s8204_s3 + $0x210] sm:$0xff] %vm4324_vm1, %v3958_v40  ;;  %v3990_v61 = vpop.trf.xlu1  ;;  %v3715_v40 = vadd.f32 %v7151_v31, %v6997_v51 }
 0x5d0   :  { %4407 = vst.msk [vmem:[%s8204_s3 + $0x290] sm:$0xff] %vm4324_vm1, %v3990_v61 }
 0x5d2   :  { %v3959_v41 = vpop.trf.xlu0 }
 0x5d3   :  { %4392 = vst.msk [vmem:[%s8204_s3 + $0x218] sm:$0xff] %vm4324_vm1, %v3959_v41  ;;  %v3991_v34 = vpop.trf.xlu1 }
 0x5d4   :  { %4408 = vst.msk [vmem:[%s8204_s3 + $0x298] sm:$0xff] %vm4324_vm1, %v3991_v34 }
 0x5d6   :  { %v3960_v25 = vpop.trf.xlu0 }
 0x5d7   :  { %4393 = vst.msk [vmem:[%s8204_s3 + $0x220] sm:$0xff] %vm4324_vm1, %v3960_v25  ;;  %v3992_v14 = vpop.trf.xlu1 }
 0x5d8   :  { %4409 = vst.msk [vmem:[%s8204_s3 + $0x2a0] sm:$0xff] %vm4324_vm1, %v3992_v14 }
 0x5da   :  { %v3961_v52 = vpop.trf.xlu0 }
 0x5db   :  { %4394 = vst.msk [vmem:[%s8204_s3 + $0x228] sm:$0xff] %vm4324_vm1, %v3961_v52  ;;  %v3993_v44 = vpop.trf.xlu1 }
 0x5dc   :  { %4410 = vst.msk [vmem:[%s8204_s3 + $0x2a8] sm:$0xff] %vm4324_vm1, %v3993_v44 }
 0x5de   :  { %v3962_v15 = vpop.trf.xlu0 }
 0x5df   :  { %4395 = vst.msk [vmem:[%s8204_s3 + $0x230] sm:$0xff] %vm4324_vm1, %v3962_v15  ;;  %v3994_v55 = vpop.trf.xlu1 }
 0x5e0   :  { %4411 = vst.msk [vmem:[%s8204_s3 + $0x2b0] sm:$0xff] %vm4324_vm1, %v3994_v55 }
 0x5e2   :  { %v3963_v46 = vpop.trf.xlu0 }
 0x5e3   :  { %4396 = vst.msk [vmem:[%s8204_s3 + $0x238] sm:$0xff] %vm4324_vm1, %v3963_v46  ;;  %v3995_v63 = vpop.trf.xlu1 }
 0x5e4   :  { %4412 = vst.msk [vmem:[%s8204_s3 + $0x2b8] sm:$0xff] %vm4324_vm1, %v3995_v63 }
 0x5e6   :  { %v3964_v43 = vpop.trf.xlu0 }
 0x5e7   :  { %4397 = vst.msk [vmem:[%s8204_s3 + $0x240] sm:$0xff] %vm4324_vm1, %v3964_v43  ;;  %v3996_v56 = vpop.trf.xlu1 }
 0x5e8   :  { %4413 = vst.msk [vmem:[%s8204_s3 + $0x2c0] sm:$0xff] %vm4324_vm1, %v3996_v56 }
 0x5ea   :  { %v3965_v22 = vpop.trf.xlu0 }
 0x5eb   :  { %4398 = vst.msk [vmem:[%s8204_s3 + $0x248] sm:$0xff] %vm4324_vm1, %v3965_v22  ;;  %v3997_v18 = vpop.trf.xlu1 }
 0x5ec   :  { %4414 = vst.msk [vmem:[%s8204_s3 + $0x2c8] sm:$0xff] %vm4324_vm1, %v3997_v18 }
 0x5ee   :  { %v3966_v36 = vpop.trf.xlu0 }
 0x5ef   :  { %4399 = vst.msk [vmem:[%s8204_s3 + $0x250] sm:$0xff] %vm4324_vm1, %v3966_v36  ;;  %v3998_v13 = vpop.trf.xlu1 }
 0x5f0   :  { %4415 = vst.msk [vmem:[%s8204_s3 + $0x2d0] sm:$0xff] %vm4324_vm1, %v3998_v13 }
 0x5f2   :  { %v3967_v62 = vpop.trf.xlu0 }
 0x5f3   :  { %4400 = vst.msk [vmem:[%s8204_s3 + $0x258] sm:$0xff] %vm4324_vm1, %v3967_v62  ;;  %v3999_v38 = vpop.trf.xlu1 }
 0x5f4   :  { %4416 = vst.msk [vmem:[%s8204_s3 + $0x2d8] sm:$0xff] %vm4324_vm1, %v3999_v38 }
 0x5f6   :  { %v3968_v29 = vpop.trf.xlu0 }
 0x5f7   :  { %4401 = vst.msk [vmem:[%s8204_s3 + $0x260] sm:$0xff] %vm4324_vm1, %v3968_v29  ;;  %v4000_v23 = vpop.trf.xlu1 }
 0x5f8   :  { %4417 = vst.msk [vmem:[%s8204_s3 + $0x2e0] sm:$0xff] %vm4324_vm1, %v4000_v23 }
 0x5fa   :  { %v3969_v5 = vpop.trf.xlu0 }
 0x5fb   :  { %4402 = vst.msk [vmem:[%s8204_s3 + $0x268] sm:$0xff] %vm4324_vm1, %v3969_v5  ;;  %v4001_v27 = vpop.trf.xlu1 }
 0x5fc   :  { %4418 = vst.msk [vmem:[%s8204_s3 + $0x2e8] sm:$0xff] %vm4324_vm1, %v4001_v27 }
 0x5fe   :  { %v3970_v54 = vpop.trf.xlu0  ;;  %4132 = vxpose.xlu0.b32.start.end [1/1] (short) %v3630_v33, 128 }
 0x5ff   :  { %4403 = vst.msk [vmem:[%s8204_s3 + $0x270] sm:$0xff] %vm4324_vm1, %v3970_v54  ;;  %v4002_v19 = vpop.trf.xlu1  ;;  %4164 = vxpose.xlu1.b32.start.end [1/1] (short) %v3632_v4, 128 }
 0x600   :  { %4419 = vst.msk [vmem:[%s8204_s3 + $0x2f0] sm:$0xff] %vm4324_vm1, %v4002_v19 }
 0x602   :  { %v3971_v1 = vpop.trf.xlu0 }
 0x603   :  { %4404 = vst.msk [vmem:[%s8204_s3 + $0x278] sm:$0xff] %vm4324_vm1, %v3971_v1  ;;  %v4003_v53 = vpop.trf.xlu1 }
 0x604   :  { %4420 = vst.msk [vmem:[%s8204_s3 + $0x2f8] sm:$0xff] %vm4324_vm1, %v4003_v53 }
 0x606   :  { %v4020_v35 = vpop.trf.xlu0 }
 0x607   :  { %4421 = vst.msk [vmem:[%s8204_s3 + $0x300] sm:$0xff] %vm4324_vm1, %v4020_v35  ;;  %v4052_v59 = vpop.trf.xlu1 }
 0x608   :  { %4437 = vst.msk [vmem:[%s8204_s3 + $0x380] sm:$0xff] %vm4324_vm1, %v4052_v59  ;;  %v3796_v59 = vadd.f32 %v7301_v45, %v6997_v51 }
 0x60a   :  { %v4021_v32 = vpop.trf.xlu0 }
 0x60b   :  { %4422 = vst.msk [vmem:[%s8204_s3 + $0x308] sm:$0xff] %vm4324_vm1, %v4021_v32  ;;  %v4053_v42 = vpop.trf.xlu1  ;;  %v3798_v32 = vadd.f32 %v7303_v6, %v6997_v51 }
 0x60c   :  { %4438 = vst.msk [vmem:[%s8204_s3 + $0x388] sm:$0xff] %vm4324_vm1, %v4053_v42 }
 0x60e   :  { %v4022_v9 = vpop.trf.xlu0 }
 0x60f   :  { %4423 = vst.msk [vmem:[%s8204_s3 + $0x310] sm:$0xff] %vm4324_vm1, %v4022_v9  ;;  %v4054_v47 = vpop.trf.xlu1 }
 0x610   :  { %4439 = vst.msk [vmem:[%s8204_s3 + $0x390] sm:$0xff] %vm4324_vm1, %v4054_v47 }
 0x612   :  { %v4023_v24 = vpop.trf.xlu0 }
 0x613   :  { %4424 = vst.msk [vmem:[%s8204_s3 + $0x318] sm:$0xff] %vm4324_vm1, %v4023_v24  ;;  %v4055_v2 = vpop.trf.xlu1 }
 0x614   :  { %4440 = vst.msk [vmem:[%s8204_s3 + $0x398] sm:$0xff] %vm4324_vm1, %v4055_v2 }
 0x616   :  { %v4024_v16 = vpop.trf.xlu0 }
 0x617   :  { %4425 = vst.msk [vmem:[%s8204_s3 + $0x320] sm:$0xff] %vm4324_vm1, %v4024_v16  ;;  %v4056_v30 = vpop.trf.xlu1 }
 0x618   :  { %4441 = vst.msk [vmem:[%s8204_s3 + $0x3a0] sm:$0xff] %vm4324_vm1, %v4056_v30 }
 0x61a   :  { %v4025_v7 = vpop.trf.xlu0 }
 0x61b   :  { %4426 = vst.msk [vmem:[%s8204_s3 + $0x328] sm:$0xff] %vm4324_vm1, %v4025_v7  ;;  %v4057_v21 = vpop.trf.xlu1 }
 0x61c   :  { %4442 = vst.msk [vmem:[%s8204_s3 + $0x3a8] sm:$0xff] %vm4324_vm1, %v4057_v21 }
 0x61e   :  { %v4026_v39 = vpop.trf.xlu0 }
 0x61f   :  { %4427 = vst.msk [vmem:[%s8204_s3 + $0x330] sm:$0xff] %vm4324_vm1, %v4026_v39  ;;  %v4058_v49 = vpop.trf.xlu1 }
 0x620   :  { %4443 = vst.msk [vmem:[%s8204_s3 + $0x3b0] sm:$0xff] %vm4324_vm1, %v4058_v49 }
 0x622   :  { %v4027_v11 = vpop.trf.xlu0 }
 0x623   :  { %4428 = vst.msk [vmem:[%s8204_s3 + $0x338] sm:$0xff] %vm4324_vm1, %v4027_v11  ;;  %v4059_v48 = vpop.trf.xlu1 }
 0x624   :  { %4444 = vst.msk [vmem:[%s8204_s3 + $0x3b8] sm:$0xff] %vm4324_vm1, %v4059_v48 }
 0x626   :  { %v4028_v3 = vpop.trf.xlu0 }
 0x627   :  { %4429 = vst.msk [vmem:[%s8204_s3 + $0x340] sm:$0xff] %vm4324_vm1, %v4028_v3  ;;  %v4060_v58 = vpop.trf.xlu1 }
 0x628   :  { %4445 = vst.msk [vmem:[%s8204_s3 + $0x3c0] sm:$0xff] %vm4324_vm1, %v4060_v58 }
 0x62a   :  { %v4029_v57 = vpop.trf.xlu0 }
 0x62b   :  { %4430 = vst.msk [vmem:[%s8204_s3 + $0x348] sm:$0xff] %vm4324_vm1, %v4029_v57  ;;  %v4061_v50 = vpop.trf.xlu1 }
 0x62c   :  { %4446 = vst.msk [vmem:[%s8204_s3 + $0x3c8] sm:$0xff] %vm4324_vm1, %v4061_v50 }
 0x62e   :  { %v4030_v28 = vpop.trf.xlu0 }
 0x62f   :  { %4431 = vst.msk [vmem:[%s8204_s3 + $0x350] sm:$0xff] %vm4324_vm1, %v4030_v28  ;;  %v4062_v17 = vpop.trf.xlu1 }
 0x630   :  { %4447 = vst.msk [vmem:[%s8204_s3 + $0x3d0] sm:$0xff] %vm4324_vm1, %v4062_v17 }
 0x632   :  { %v4031_v26 = vpop.trf.xlu0 }
 0x633   :  { %4432 = vst.msk [vmem:[%s8204_s3 + $0x358] sm:$0xff] %vm4324_vm1, %v4031_v26  ;;  %v4063_v0 = vpop.trf.xlu1 }
 0x634   :  { %4448 = vst.msk [vmem:[%s8204_s3 + $0x3d8] sm:$0xff] %vm4324_vm1, %v4063_v0 }
 0x636   :  { %v4032_v12 = vpop.trf.xlu0 }
 0x637   :  { %4433 = vst.msk [vmem:[%s8204_s3 + $0x360] sm:$0xff] %vm4324_vm1, %v4032_v12  ;;  %v4064_v20 = vpop.trf.xlu1 }
 0x638   :  { %4449 = vst.msk [vmem:[%s8204_s3 + $0x3e0] sm:$0xff] %vm4324_vm1, %v4064_v20 }
 0x63a   :  { %v4033_v8 = vpop.trf.xlu0 }
 0x63b   :  { %4434 = vst.msk [vmem:[%s8204_s3 + $0x368] sm:$0xff] %vm4324_vm1, %v4033_v8  ;;  %v4065_v37 = vpop.trf.xlu1 }
 0x63c   :  { %4450 = vst.msk [vmem:[%s8204_s3 + $0x3e8] sm:$0xff] %vm4324_vm1, %v4065_v37 }
 0x63e   :  { %v4034_v61 = vpop.trf.xlu0  ;;  %4196 = vxpose.xlu0.b32.start.end [1/1] (short) %v3713_v60, 128 }
 0x63f   :  { %4435 = vst.msk [vmem:[%s8204_s3 + $0x370] sm:$0xff] %vm4324_vm1, %v4034_v61  ;;  %v4066_v41 = vpop.trf.xlu1  ;;  %4228 = vxpose.xlu1.b32.start.end [1/1] (short) %v3715_v40, 128 }
 0x640   :  { %4451 = vst.msk [vmem:[%s8204_s3 + $0x3f0] sm:$0xff] %vm4324_vm1, %v4066_v41 }
 0x642   :  { %v4035_v10 = vpop.trf.xlu0 }
 0x643   :  { %4436 = vst.msk [vmem:[%s8204_s3 + $0x378] sm:$0xff] %vm4324_vm1, %v4035_v10  ;;  %v4067_v31 = vpop.trf.xlu1 }
 0x644   :  { %4452 = vst.msk [vmem:[%s8204_s3 + $0x3f8] sm:$0xff] %vm4324_vm1, %v4067_v31 }
 0x646   :  { %v4084_v34 = vpop.trf.xlu0 }
 0x647   :  { %4453 = vst.msk [vmem:[%s8204_s3 + $0x400] sm:$0xff] %vm4324_vm1, %v4084_v34  ;;  %v4116_v25 = vpop.trf.xlu1 }
 0x648   :  { %4469 = vst.msk [vmem:[%s8204_s3 + $0x480] sm:$0xff] %vm4324_vm1, %v4116_v25 }
 0x64a   :  { %v4085_v14 = vpop.trf.xlu0 }
 0x64b   :  { %4454 = vst.msk [vmem:[%s8204_s3 + $0x408] sm:$0xff] %vm4324_vm1, %v4085_v14  ;;  %v4117_v52 = vpop.trf.xlu1 }
 0x64c   :  { %4470 = vst.msk [vmem:[%s8204_s3 + $0x488] sm:$0xff] %vm4324_vm1, %v4117_v52 }
 0x64e   :  { %v4086_v44 = vpop.trf.xlu0 }
 0x64f   :  { %4455 = vst.msk [vmem:[%s8204_s3 + $0x410] sm:$0xff] %vm4324_vm1, %v4086_v44  ;;  %v4118_v15 = vpop.trf.xlu1 }
 0x650   :  { %4471 = vst.msk [vmem:[%s8204_s3 + $0x490] sm:$0xff] %vm4324_vm1, %v4118_v15 }
 0x652   :  { %v4087_v55 = vpop.trf.xlu0 }
 0x653   :  { %4456 = vst.msk [vmem:[%s8204_s3 + $0x418] sm:$0xff] %vm4324_vm1, %v4087_v55  ;;  %v4119_v46 = vpop.trf.xlu1 }
 0x654   :  { %4472 = vst.msk [vmem:[%s8204_s3 + $0x498] sm:$0xff] %vm4324_vm1, %v4119_v46 }
 0x656   :  { %v4088_v63 = vpop.trf.xlu0 }
 0x657   :  { %4457 = vst.msk [vmem:[%s8204_s3 + $0x420] sm:$0xff] %vm4324_vm1, %v4088_v63  ;;  %v4120_v43 = vpop.trf.xlu1 }
 0x658   :  { %4473 = vst.msk [vmem:[%s8204_s3 + $0x4a0] sm:$0xff] %vm4324_vm1, %v4120_v43 }
 0x65a   :  { %v4089_v56 = vpop.trf.xlu0 }
 0x65b   :  { %4458 = vst.msk [vmem:[%s8204_s3 + $0x428] sm:$0xff] %vm4324_vm1, %v4089_v56  ;;  %v4121_v22 = vpop.trf.xlu1 }
 0x65c   :  { %4474 = vst.msk [vmem:[%s8204_s3 + $0x4a8] sm:$0xff] %vm4324_vm1, %v4121_v22 }
 0x65e   :  { %v4090_v18 = vpop.trf.xlu0 }
 0x65f   :  { %4459 = vst.msk [vmem:[%s8204_s3 + $0x430] sm:$0xff] %vm4324_vm1, %v4090_v18  ;;  %v4122_v36 = vpop.trf.xlu1 }
 0x660   :  { %4475 = vst.msk [vmem:[%s8204_s3 + $0x4b0] sm:$0xff] %vm4324_vm1, %v4122_v36 }
 0x662   :  { %v4091_v13 = vpop.trf.xlu0 }
 0x663   :  { %4460 = vst.msk [vmem:[%s8204_s3 + $0x438] sm:$0xff] %vm4324_vm1, %v4091_v13  ;;  %v4123_v62 = vpop.trf.xlu1 }
 0x664   :  { %4476 = vst.msk [vmem:[%s8204_s3 + $0x4b8] sm:$0xff] %vm4324_vm1, %v4123_v62 }
 0x666   :  { %v4092_v38 = vpop.trf.xlu0 }
 0x667   :  { %4461 = vst.msk [vmem:[%s8204_s3 + $0x440] sm:$0xff] %vm4324_vm1, %v4092_v38  ;;  %v4124_v29 = vpop.trf.xlu1 }
 0x668   :  { %4477 = vst.msk [vmem:[%s8204_s3 + $0x4c0] sm:$0xff] %vm4324_vm1, %v4124_v29 }
 0x66a   :  { %v4093_v23 = vpop.trf.xlu0 }
 0x66b   :  { %4462 = vst.msk [vmem:[%s8204_s3 + $0x448] sm:$0xff] %vm4324_vm1, %v4093_v23  ;;  %v4125_v5 = vpop.trf.xlu1 }
 0x66c   :  { %4478 = vst.msk [vmem:[%s8204_s3 + $0x4c8] sm:$0xff] %vm4324_vm1, %v4125_v5 }
 0x66e   :  { %v4094_v27 = vpop.trf.xlu0 }
 0x66f   :  { %4463 = vst.msk [vmem:[%s8204_s3 + $0x450] sm:$0xff] %vm4324_vm1, %v4094_v27  ;;  %v4126_v33 = vpop.trf.xlu1 }
 0x670   :  { %4479 = vst.msk [vmem:[%s8204_s3 + $0x4d0] sm:$0xff] %vm4324_vm1, %v4126_v33 }
 0x672   :  { %v4095_v4 = vpop.trf.xlu0 }
 0x673   :  { %4464 = vst.msk [vmem:[%s8204_s3 + $0x458] sm:$0xff] %vm4324_vm1, %v4095_v4  ;;  %v4127_v54 = vpop.trf.xlu1 }
 0x674   :  { %4480 = vst.msk [vmem:[%s8204_s3 + $0x4d8] sm:$0xff] %vm4324_vm1, %v4127_v54 }
 0x676   :  { %v4096_v19 = vpop.trf.xlu0 }
 0x677   :  { %4465 = vst.msk [vmem:[%s8204_s3 + $0x460] sm:$0xff] %vm4324_vm1, %v4096_v19  ;;  %v4128_v1 = vpop.trf.xlu1 }
 0x678   :  { %4481 = vst.msk [vmem:[%s8204_s3 + $0x4e0] sm:$0xff] %vm4324_vm1, %v4128_v1 }
 0x67a   :  { %v4097_v53 = vpop.trf.xlu0 }
 0x67b   :  { %4466 = vst.msk [vmem:[%s8204_s3 + $0x468] sm:$0xff] %vm4324_vm1, %v4097_v53  ;;  %v4129_v35 = vpop.trf.xlu1 }
 0x67c   :  { %4482 = vst.msk [vmem:[%s8204_s3 + $0x4e8] sm:$0xff] %vm4324_vm1, %v4129_v35 }
 0x67e   :  { %v4098_v42 = vpop.trf.xlu0  ;;  %4260 = vxpose.xlu0.b32.start.end [1/1] (short) %v3796_v59, 128 }
 0x67f   :  { %4467 = vst.msk [vmem:[%s8204_s3 + $0x470] sm:$0xff] %vm4324_vm1, %v4098_v42  ;;  %v4130_v9 = vpop.trf.xlu1  ;;  %4292 = vxpose.xlu1.b32.start.end [1/1] (short) %v3798_v32, 128 }
 0x680   :  { %4483 = vst.msk [vmem:[%s8204_s3 + $0x4f0] sm:$0xff] %vm4324_vm1, %v4130_v9 }
 0x682   :  { %v4099_v45 = vpop.trf.xlu0 }
 0x683   :  { %v4131_v47 = vpop.trf.xlu1  ;;  %4468 = vst.msk [vmem:[%s8204_s3 + $0x478] sm:$0xff] %vm4324_vm1, %v4099_v45 }
 0x684   :  { %4484 = vst.msk [vmem:[%s8204_s3 + $0x4f8] sm:$0xff] %vm4324_vm1, %v4131_v47 }
 0x686   :  { %v4148_v51 = vpop.trf.xlu0 }
 0x687   :  { %v4180_v6 = vpop.trf.xlu1  ;;  %4485 = vst.msk [vmem:[%s8204_s3 + $0x500] sm:$0xff] %vm4324_vm1, %v4148_v51 }
 0x688   :  { %4501 = vst.msk [vmem:[%s8204_s3 + $0x580] sm:$0xff] %vm4324_vm1, %v4180_v6 }
 0x68a   :  { %v4149_v24 = vpop.trf.xlu0 }
 0x68b   :  { %v4181_v2 = vpop.trf.xlu1  ;;  %4486 = vst.msk [vmem:[%s8204_s3 + $0x508] sm:$0xff] %vm4324_vm1, %v4149_v24 }
 0x68c   :  { %4502 = vst.msk [vmem:[%s8204_s3 + $0x588] sm:$0xff] %vm4324_vm1, %v4181_v2 }
 0x68e   :  { %v4150_v16 = vpop.trf.xlu0 }
 0x68f   :  { %v4182_v30 = vpop.trf.xlu1  ;;  %4487 = vst.msk [vmem:[%s8204_s3 + $0x510] sm:$0xff] %vm4324_vm1, %v4150_v16 }
 0x690   :  { %4503 = vst.msk [vmem:[%s8204_s3 + $0x590] sm:$0xff] %vm4324_vm1, %v4182_v30 }
 0x692   :  { %v4151_v7 = vpop.trf.xlu0 }
 0x693   :  { %v4183_v21 = vpop.trf.xlu1  ;;  %4488 = vst.msk [vmem:[%s8204_s3 + $0x518] sm:$0xff] %vm4324_vm1, %v4151_v7 }
 0x694   :  { %4504 = vst.msk [vmem:[%s8204_s3 + $0x598] sm:$0xff] %vm4324_vm1, %v4183_v21 }
 0x696   :  { %v4152_v39 = vpop.trf.xlu0 }
 0x697   :  { %v4184_v49 = vpop.trf.xlu1  ;;  %4489 = vst.msk [vmem:[%s8204_s3 + $0x520] sm:$0xff] %vm4324_vm1, %v4152_v39 }
 0x698   :  { %4505 = vst.msk [vmem:[%s8204_s3 + $0x5a0] sm:$0xff] %vm4324_vm1, %v4184_v49 }
 0x69a   :  { %v4153_v11 = vpop.trf.xlu0 }
 0x69b   :  { %v4185_v48 = vpop.trf.xlu1  ;;  %4490 = vst.msk [vmem:[%s8204_s3 + $0x528] sm:$0xff] %vm4324_vm1, %v4153_v11 }
 0x69c   :  { %4506 = vst.msk [vmem:[%s8204_s3 + $0x5a8] sm:$0xff] %vm4324_vm1, %v4185_v48 }
 0x69e   :  { %v4154_v3 = vpop.trf.xlu0 }
 0x69f   :  { %v4186_v58 = vpop.trf.xlu1  ;;  %4491 = vst.msk [vmem:[%s8204_s3 + $0x530] sm:$0xff] %vm4324_vm1, %v4154_v3 }
 0x6a0   :  { %4507 = vst.msk [vmem:[%s8204_s3 + $0x5b0] sm:$0xff] %vm4324_vm1, %v4186_v58 }
 0x6a2   :  { %v4155_v57 = vpop.trf.xlu0 }
 0x6a3   :  { %v4187_v50 = vpop.trf.xlu1  ;;  %4492 = vst.msk [vmem:[%s8204_s3 + $0x538] sm:$0xff] %vm4324_vm1, %v4155_v57 }
 0x6a4   :  { %4508 = vst.msk [vmem:[%s8204_s3 + $0x5b8] sm:$0xff] %vm4324_vm1, %v4187_v50 }
 0x6a6   :  { %v4156_v28 = vpop.trf.xlu0 }
 0x6a7   :  { %v4188_v17 = vpop.trf.xlu1  ;;  %4493 = vst.msk [vmem:[%s8204_s3 + $0x540] sm:$0xff] %vm4324_vm1, %v4156_v28 }
 0x6a8   :  { %4509 = vst.msk [vmem:[%s8204_s3 + $0x5c0] sm:$0xff] %vm4324_vm1, %v4188_v17 }
 0x6aa   :  { %v4157_v26 = vpop.trf.xlu0 }
 0x6ab   :  { %v4189_v0 = vpop.trf.xlu1  ;;  %4494 = vst.msk [vmem:[%s8204_s3 + $0x548] sm:$0xff] %vm4324_vm1, %v4157_v26 }
 0x6ac   :  { %4510 = vst.msk [vmem:[%s8204_s3 + $0x5c8] sm:$0xff] %vm4324_vm1, %v4189_v0 }
 0x6ae   :  { %v4158_v12 = vpop.trf.xlu0 }
 0x6af   :  { %v4190_v20 = vpop.trf.xlu1  ;;  %4495 = vst.msk [vmem:[%s8204_s3 + $0x550] sm:$0xff] %vm4324_vm1, %v4158_v12 }
 0x6b0   :  { %4511 = vst.msk [vmem:[%s8204_s3 + $0x5d0] sm:$0xff] %vm4324_vm1, %v4190_v20 }
 0x6b2   :  { %v4159_v8 = vpop.trf.xlu0 }
 0x6b3   :  { %v4191_v37 = vpop.trf.xlu1  ;;  %4496 = vst.msk [vmem:[%s8204_s3 + $0x558] sm:$0xff] %vm4324_vm1, %v4159_v8 }
 0x6b4   :  { %4512 = vst.msk [vmem:[%s8204_s3 + $0x5d8] sm:$0xff] %vm4324_vm1, %v4191_v37 }
 0x6b6   :  { %v4160_v60 = vpop.trf.xlu0 }
 0x6b7   :  { %v4192_v40 = vpop.trf.xlu1  ;;  %4497 = vst.msk [vmem:[%s8204_s3 + $0x560] sm:$0xff] %vm4324_vm1, %v4160_v60 }
 0x6b8   :  { %4513 = vst.msk [vmem:[%s8204_s3 + $0x5e0] sm:$0xff] %vm4324_vm1, %v4192_v40 }
 0x6ba   :  { %v4161_v61 = vpop.trf.xlu0 }
 0x6bb   :  { %v4193_v41 = vpop.trf.xlu1  ;;  %4498 = vst.msk [vmem:[%s8204_s3 + $0x568] sm:$0xff] %vm4324_vm1, %v4161_v61 }
 0x6bc   :  { %4514 = vst.msk [vmem:[%s8204_s3 + $0x5e8] sm:$0xff] %vm4324_vm1, %v4193_v41 }
 0x6be   :  { %v4162_v10 = vpop.trf.xlu0 }
 0x6bf   :  { %v4194_v31 = vpop.trf.xlu1  ;;  %4499 = vst.msk [vmem:[%s8204_s3 + $0x570] sm:$0xff] %vm4324_vm1, %v4162_v10 }
 0x6c0   :  { %4515 = vst.msk [vmem:[%s8204_s3 + $0x5f0] sm:$0xff] %vm4324_vm1, %v4194_v31 }
 0x6c2   :  { %v4163_v34 = vpop.trf.xlu0 }
 0x6c3   :  { %v4195_v25 = vpop.trf.xlu1  ;;  %4500 = vst.msk [vmem:[%s8204_s3 + $0x578] sm:$0xff] %vm4324_vm1, %v4163_v34 }
 0x6c4   :  { %4516 = vst.msk [vmem:[%s8204_s3 + $0x5f8] sm:$0xff] %vm4324_vm1, %v4195_v25 }
 0x6c6   :  { %v4212_v14 = vpop.trf.xlu0 }
 0x6c7   :  { %v4244_v52 = vpop.trf.xlu1  ;;  %4517 = vst.msk [vmem:[%s8204_s3 + $0x600] sm:$0xff] %vm4324_vm1, %v4212_v14 }
 0x6c8   :  { %4533 = vst.msk [vmem:[%s8204_s3 + $0x680] sm:$0xff] %vm4324_vm1, %v4244_v52 }
 0x6ca   :  { %v4213_v44 = vpop.trf.xlu0 }
 0x6cb   :  { %v4245_v15 = vpop.trf.xlu1  ;;  %4518 = vst.msk [vmem:[%s8204_s3 + $0x608] sm:$0xff] %vm4324_vm1, %v4213_v44 }
 0x6cc   :  { %4534 = vst.msk [vmem:[%s8204_s3 + $0x688] sm:$0xff] %vm4324_vm1, %v4245_v15 }
 0x6ce   :  { %v4214_v55 = vpop.trf.xlu0 }
 0x6cf   :  { %v4246_v46 = vpop.trf.xlu1  ;;  %4519 = vst.msk [vmem:[%s8204_s3 + $0x610] sm:$0xff] %vm4324_vm1, %v4214_v55 }
 0x6d0   :  { %4535 = vst.msk [vmem:[%s8204_s3 + $0x690] sm:$0xff] %vm4324_vm1, %v4246_v46 }
 0x6d2   :  { %v4215_v63 = vpop.trf.xlu0 }
 0x6d3   :  { %v4247_v43 = vpop.trf.xlu1  ;;  %4520 = vst.msk [vmem:[%s8204_s3 + $0x618] sm:$0xff] %vm4324_vm1, %v4215_v63 }
 0x6d4   :  { %4536 = vst.msk [vmem:[%s8204_s3 + $0x698] sm:$0xff] %vm4324_vm1, %v4247_v43 }
 0x6d6   :  { %v4216_v56 = vpop.trf.xlu0 }
 0x6d7   :  { %v4248_v22 = vpop.trf.xlu1  ;;  %4521 = vst.msk [vmem:[%s8204_s3 + $0x620] sm:$0xff] %vm4324_vm1, %v4216_v56 }
 0x6d8   :  { %4537 = vst.msk [vmem:[%s8204_s3 + $0x6a0] sm:$0xff] %vm4324_vm1, %v4248_v22 }
 0x6da   :  { %v4217_v18 = vpop.trf.xlu0 }
 0x6db   :  { %v4249_v36 = vpop.trf.xlu1  ;;  %4522 = vst.msk [vmem:[%s8204_s3 + $0x628] sm:$0xff] %vm4324_vm1, %v4217_v18 }
 0x6dc   :  { %4538 = vst.msk [vmem:[%s8204_s3 + $0x6a8] sm:$0xff] %vm4324_vm1, %v4249_v36 }
 0x6de   :  { %v4218_v13 = vpop.trf.xlu0 }
 0x6df   :  { %v4250_v62 = vpop.trf.xlu1  ;;  %4523 = vst.msk [vmem:[%s8204_s3 + $0x630] sm:$0xff] %vm4324_vm1, %v4218_v13 }
 0x6e0   :  { %4539 = vst.msk [vmem:[%s8204_s3 + $0x6b0] sm:$0xff] %vm4324_vm1, %v4250_v62 }
 0x6e2   :  { %v4219_v38 = vpop.trf.xlu0 }
 0x6e3   :  { %v4251_v29 = vpop.trf.xlu1  ;;  %4524 = vst.msk [vmem:[%s8204_s3 + $0x638] sm:$0xff] %vm4324_vm1, %v4219_v38 }
 0x6e4   :  { %4540 = vst.msk [vmem:[%s8204_s3 + $0x6b8] sm:$0xff] %vm4324_vm1, %v4251_v29 }
 0x6e6   :  { %v4220_v23 = vpop.trf.xlu0 }
 0x6e7   :  { %v4252_v5 = vpop.trf.xlu1  ;;  %4525 = vst.msk [vmem:[%s8204_s3 + $0x640] sm:$0xff] %vm4324_vm1, %v4220_v23 }
 0x6e8   :  { %4541 = vst.msk [vmem:[%s8204_s3 + $0x6c0] sm:$0xff] %vm4324_vm1, %v4252_v5 }
 0x6ea   :  { %v4221_v27 = vpop.trf.xlu0 }
 0x6eb   :  { %v4253_v33 = vpop.trf.xlu1  ;;  %4526 = vst.msk [vmem:[%s8204_s3 + $0x648] sm:$0xff] %vm4324_vm1, %v4221_v27 }
 0x6ec   :  { %4542 = vst.msk [vmem:[%s8204_s3 + $0x6c8] sm:$0xff] %vm4324_vm1, %v4253_v33 }
 0x6ee   :  { %v4222_v4 = vpop.trf.xlu0 }
 0x6ef   :  { %v4254_v54 = vpop.trf.xlu1  ;;  %4527 = vst.msk [vmem:[%s8204_s3 + $0x650] sm:$0xff] %vm4324_vm1, %v4222_v4 }
 0x6f0   :  { %4543 = vst.msk [vmem:[%s8204_s3 + $0x6d0] sm:$0xff] %vm4324_vm1, %v4254_v54 }
 0x6f2   :  { %v4223_v19 = vpop.trf.xlu0 }
 0x6f3   :  { %v4255_v1 = vpop.trf.xlu1  ;;  %4528 = vst.msk [vmem:[%s8204_s3 + $0x658] sm:$0xff] %vm4324_vm1, %v4223_v19 }
 0x6f4   :  { %4544 = vst.msk [vmem:[%s8204_s3 + $0x6d8] sm:$0xff] %vm4324_vm1, %v4255_v1 }
 0x6f6   :  { %v4224_v53 = vpop.trf.xlu0 }
 0x6f7   :  { %v4256_v35 = vpop.trf.xlu1  ;;  %4529 = vst.msk [vmem:[%s8204_s3 + $0x660] sm:$0xff] %vm4324_vm1, %v4224_v53 }
 0x6f8   :  { %4545 = vst.msk [vmem:[%s8204_s3 + $0x6e0] sm:$0xff] %vm4324_vm1, %v4256_v35 }
 0x6fa   :  { %v4225_v59 = vpop.trf.xlu0 }
 0x6fb   :  { %v4257_v32 = vpop.trf.xlu1  ;;  %4530 = vst.msk [vmem:[%s8204_s3 + $0x668] sm:$0xff] %vm4324_vm1, %v4225_v59 }
 0x6fc   :  { %4546 = vst.msk [vmem:[%s8204_s3 + $0x6e8] sm:$0xff] %vm4324_vm1, %v4257_v32 }
 0x6fe   :  { %v4226_v42 = vpop.trf.xlu0 }
 0x6ff   :  { %v4258_v9 = vpop.trf.xlu1  ;;  %4531 = vst.msk [vmem:[%s8204_s3 + $0x670] sm:$0xff] %vm4324_vm1, %v4226_v42 }
 0x700   :  { %4547 = vst.msk [vmem:[%s8204_s3 + $0x6f0] sm:$0xff] %vm4324_vm1, %v4258_v9 }
 0x702   :  { %v4227_v45 = vpop.trf.xlu0 }
 0x703   :  { %v4259_v47 = vpop.trf.xlu1  ;;  %4532 = vst.msk [vmem:[%s8204_s3 + $0x678] sm:$0xff] %vm4324_vm1, %v4227_v45 }
 0x704   :  { %4548 = vst.msk [vmem:[%s8204_s3 + $0x6f8] sm:$0xff] %vm4324_vm1, %v4259_v47 }
 0x706   :  { %v4276_v51 = vpop.trf.xlu0 }
 0x707   :  { %v4308_v6 = vpop.trf.xlu1  ;;  %4549 = vst.msk [vmem:[%s8204_s3 + $0x700] sm:$0xff] %vm4324_vm1, %v4276_v51 }
 0x708   :  { %4565 = vst.msk [vmem:[%s8204_s3 + $0x780] sm:$0xff] %vm4324_vm1, %v4308_v6 }
 0x70a   :  { %v4277_v24 = vpop.trf.xlu0 }
 0x70b   :  { %v4309_v2 = vpop.trf.xlu1  ;;  %4550 = vst.msk [vmem:[%s8204_s3 + $0x708] sm:$0xff] %vm4324_vm1, %v4277_v24 }
 0x70c   :  { %4566 = vst.msk [vmem:[%s8204_s3 + $0x788] sm:$0xff] %vm4324_vm1, %v4309_v2 }
 0x70e   :  { %v4278_v16 = vpop.trf.xlu0 }
 0x70f   :  { %v4310_v30 = vpop.trf.xlu1  ;;  %4551 = vst.msk [vmem:[%s8204_s3 + $0x710] sm:$0xff] %vm4324_vm1, %v4278_v16 }
 0x710   :  { %4567 = vst.msk [vmem:[%s8204_s3 + $0x790] sm:$0xff] %vm4324_vm1, %v4310_v30 }
 0x712   :  { %v4279_v7 = vpop.trf.xlu0 }
 0x713   :  { %v4311_v21 = vpop.trf.xlu1  ;;  %4552 = vst.msk [vmem:[%s8204_s3 + $0x718] sm:$0xff] %vm4324_vm1, %v4279_v7 }
 0x714   :  { %4568 = vst.msk [vmem:[%s8204_s3 + $0x798] sm:$0xff] %vm4324_vm1, %v4311_v21 }
 0x716   :  { %v4280_v39 = vpop.trf.xlu0 }
 0x717   :  { %v4312_v49 = vpop.trf.xlu1  ;;  %4553 = vst.msk [vmem:[%s8204_s3 + $0x720] sm:$0xff] %vm4324_vm1, %v4280_v39 }
 0x718   :  { %4569 = vst.msk [vmem:[%s8204_s3 + $0x7a0] sm:$0xff] %vm4324_vm1, %v4312_v49 }
 0x71a   :  { %v4281_v11 = vpop.trf.xlu0 }
 0x71b   :  { %v4313_v48 = vpop.trf.xlu1  ;;  %4554 = vst.msk [vmem:[%s8204_s3 + $0x728] sm:$0xff] %vm4324_vm1, %v4281_v11 }
 0x71c   :  { %4570 = vst.msk [vmem:[%s8204_s3 + $0x7a8] sm:$0xff] %vm4324_vm1, %v4313_v48 }
 0x71e   :  { %v4282_v3 = vpop.trf.xlu0 }
 0x71f   :  { %v4314_v58 = vpop.trf.xlu1  ;;  %4555 = vst.msk [vmem:[%s8204_s3 + $0x730] sm:$0xff] %vm4324_vm1, %v4282_v3 }
 0x720   :  { %4571 = vst.msk [vmem:[%s8204_s3 + $0x7b0] sm:$0xff] %vm4324_vm1, %v4314_v58 }
 0x722   :  { %v4283_v57 = vpop.trf.xlu0 }
 0x723   :  { %v4315_v50 = vpop.trf.xlu1  ;;  %4556 = vst.msk [vmem:[%s8204_s3 + $0x738] sm:$0xff] %vm4324_vm1, %v4283_v57 }
 0x724   :  { %4572 = vst.msk [vmem:[%s8204_s3 + $0x7b8] sm:$0xff] %vm4324_vm1, %v4315_v50 }
 0x726   :  { %v4284_v28 = vpop.trf.xlu0 }
 0x727   :  { %v4316_v17 = vpop.trf.xlu1  ;;  %4557 = vst.msk [vmem:[%s8204_s3 + $0x740] sm:$0xff] %vm4324_vm1, %v4284_v28 }
 0x728   :  { %4573 = vst.msk [vmem:[%s8204_s3 + $0x7c0] sm:$0xff] %vm4324_vm1, %v4316_v17 }
 0x72a   :  { %v4285_v26 = vpop.trf.xlu0 }
 0x72b   :  { %v4317_v0 = vpop.trf.xlu1  ;;  %4558 = vst.msk [vmem:[%s8204_s3 + $0x748] sm:$0xff] %vm4324_vm1, %v4285_v26 }
 0x72c   :  { %4574 = vst.msk [vmem:[%s8204_s3 + $0x7c8] sm:$0xff] %vm4324_vm1, %v4317_v0 }
 0x72e   :  { %v4286_v12 = vpop.trf.xlu0 }
 0x72f   :  { %v4318_v20 = vpop.trf.xlu1  ;;  %4559 = vst.msk [vmem:[%s8204_s3 + $0x750] sm:$0xff] %vm4324_vm1, %v4286_v12 }
 0x730   :  { %4575 = vst.msk [vmem:[%s8204_s3 + $0x7d0] sm:$0xff] %vm4324_vm1, %v4318_v20 }
 0x732   :  { %v4287_v8 = vpop.trf.xlu0 }
 0x733   :  { %v4319_v37 = vpop.trf.xlu1  ;;  %4560 = vst.msk [vmem:[%s8204_s3 + $0x758] sm:$0xff] %vm4324_vm1, %v4287_v8 }
 0x734   :  { %4576 = vst.msk [vmem:[%s8204_s3 + $0x7d8] sm:$0xff] %vm4324_vm1, %v4319_v37 }
 0x736   :  { %v4288_v60 = vpop.trf.xlu0 }
 0x737   :  { %v4320_v40 = vpop.trf.xlu1  ;;  %4561 = vst.msk [vmem:[%s8204_s3 + $0x760] sm:$0xff] %vm4324_vm1, %v4288_v60 }
 0x738   :  { %4577 = vst.msk [vmem:[%s8204_s3 + $0x7e0] sm:$0xff] %vm4324_vm1, %v4320_v40 }
 0x73a   :  { %v4289_v61 = vpop.trf.xlu0 }
 0x73b   :  { %v4321_v41 = vpop.trf.xlu1  ;;  %4562 = vst.msk [vmem:[%s8204_s3 + $0x768] sm:$0xff] %vm4324_vm1, %v4289_v61 }
 0x73c   :  { %4578 = vst.msk [vmem:[%s8204_s3 + $0x7e8] sm:$0xff] %vm4324_vm1, %v4321_v41 }
 0x73e   :  { %v4290_v10 = vpop.trf.xlu0 }
 0x73f   :  { %v4322_v31 = vpop.trf.xlu1  ;;  %4563 = vst.msk [vmem:[%s8204_s3 + $0x770] sm:$0xff] %vm4324_vm1, %v4290_v10 }
 0x740   :  { %4579 = vst.msk [vmem:[%s8204_s3 + $0x7f0] sm:$0xff] %vm4324_vm1, %v4322_v31 }
 0x742   :  { %v4291_v34 = vpop.trf.xlu0 }
 0x743   :  { %v4323_v25 = vpop.trf.xlu1  ;;  %4564 = vst.msk [vmem:[%s8204_s3 + $0x778] sm:$0xff] %vm4324_vm1, %v4291_v34 }
 0x744   :  { %4580 = vst.msk [vmem:[%s8204_s3 + $0x7f8] sm:$0xff] %vm4324_vm1, %v4323_v25 }

</bundles_post_ra>
